<compile_context>
chip_gen: v6e
topology: v6e:2x2x1
jax: 0.10.0
libtpu: 0.0.40
codegen_flags: <defaults>
</compile_context>

<pallas_src>
import functools

import jax
import jax.numpy as jnp
from jax.experimental import pallas as pl
from jax.experimental.pallas import tpu as pltpu

# Safe on every generation: > default scoped limit (16/32 MiB), < v7x 64 MiB.
_VMEM_LIMIT = 40 * 1024 * 1024


# ----------------------------------------------------------------------------
# Pallas kernels
# ----------------------------------------------------------------------------
def _conv_block_kernel(x_ref, w1_ref, b1_ref, w2_ref, b2_ref, o_ref, pad_ref,
                       *, H, W, margin, eps=1e-5):
    """Fused (Conv3x3 -> InstanceNorm2d -> ReLU) x 2 for one batch element.

    x_ref  : (1, Cin, H*W)       f32 activations (channels on sublanes,
                                  flattened spatial on lanes)
    w*_ref : (3, Cout, 3*Cin)    bf16 conv weights, grouped by dx = kx-1;
                                  K axis ordered [ky=0 | ky=1 | ky=2] x Cin
    b*_ref : (Cout, 1)           f32 conv biases
    o_ref  : (1, Cout2, H*W)     f32 output (lane-dense)
    pad_ref: (Cmax, H*W + 2*margin) bf16 zero-padded line buffer (dy taps)
    """
    HW = H * W

    # Column masks for taps crossing a row boundary; applied POST-dot on the
    # (Cout, HW) dx-partials (the per-lane mask commutes with the channel
    # contraction), so only 2 mask multiplies per conv.
    col = jax.lax.broadcasted_iota(jnp.int32, (1, HW), 1) % W
    ok_left = (col > 0).astype(jnp.float32)           # source column w-1 valid
    ok_right = (col < (W - 1)).astype(jnp.float32)    # source column w+1 valid

    # Zero the margins once; they are never written afterwards, so both convs
    # see clean zero padding for the dy = +/-1 taps (top/bottom rows).
    cpad = pad_ref.shape[0]
    zeros_m = jnp.zeros((cpad, margin), jnp.bfloat16)
    pad_ref[:, pl.ds(0, margin)] = zeros_m
    pad_ref[:, pl.ds(margin + HW, margin)] = zeros_m

    def conv3x3_in_relu(x, w_ref, b_ref):
        cin = x.shape[0]
        # Stage the activation (bf16) into the line buffer at a 128-aligned
        # offset; dy shifts become plain slice loads with free zero padding.
        pad_ref[pl.ds(0, cin), pl.ds(margin, HW)] = x.astype(jnp.bfloat16)

        def slab(dx):
            # Stack dy = -1/0/+1 taps -> (3*cin, HW) bf16, K fused to 3*Cin.
            taps = [pad_ref[pl.ds(0, cin), pl.ds(margin + dy * W + dx, HW)]
                    for dy in (-1, 0, 1)]
            return jnp.concatenate(taps, axis=0)

        # One bf16 matmul per dx group (K = 3*Cin), f32 accumulate on MXU.
        p_l = jnp.dot(w_ref[0], slab(-1), preferred_element_type=jnp.float32)
        p_c = jnp.dot(w_ref[1], slab(0), preferred_element_type=jnp.float32)
        p_r = jnp.dot(w_ref[2], slab(1), preferred_element_type=jnp.float32)
        y = p_c + p_l * ok_left + p_r * ok_right + b_ref[...]

        # InstanceNorm2d(affine=False, eps): per-channel stats over the full
        # spatial extent, ONE-pass (sum / sum-of-squares), biased variance.
        mu = jnp.mean(y, axis=1, keepdims=True)
        ex2 = jnp.mean(y * y, axis=1, keepdims=True)
        var = jnp.maximum(ex2 - mu * mu, 0.0)
        y = (y - mu) * jax.lax.rsqrt(var + eps)
        # ReLU; Dropout2d is identity in eval mode.
        return jnp.maximum(y, 0.0)

    h = conv3x3_in_relu(x_ref[0], w1_ref, b1_ref)
    o_ref[0] = conv3x3_in_relu(h, w2_ref, b2_ref)


def _out_conv_kernel(x_ref, w_ref, b_ref, o_ref):
    """Single folded 1x1 conv (the three 1x1 convs collapsed in the wrapper)."""
    o_ref[0] = (jnp.dot(w_ref[...], x_ref[0].astype(jnp.bfloat16),
                        preferred_element_type=jnp.float32) + b_ref[...])


def _dc_merge_kernel(mask_ref, k_ref, kp_ref, o_ref):
    """out = mask * k_measured + (1 - mask) * k_predicted on one lane tile."""
    m = mask_ref[...]
    o_ref[...] = m * k_ref[...] + (1.0 - m) * kp_ref[...]


# ----------------------------------------------------------------------------
# Kernel wrappers
# ----------------------------------------------------------------------------
def _pack_conv_weight(w):
    """(Cout, Cin, 3, 3) -> (3[dx], Cout, 3*Cin) bf16, K ordered ky-major."""
    cout, cin = w.shape[0], w.shape[1]
    return jnp.transpose(w, (3, 0, 2, 1)).reshape(3, cout, 3 * cin).astype(
        jnp.bfloat16)


def conv_block(params, x):
    """ConvBlock (attention=False): fused (Conv3x3+IN+ReLU) x 2, NCHW in/out."""
    B, Cin, H, W = x.shape
    w1, b1, w2, b2 = params["w1"], params["b1"], params["w2"], params["b2"]
    Cmid, Cout = w1.shape[0], w2.shape[0]
    HW = H * W
    margin = ((W + 1 + 127) // 128) * 128  # 128-aligned buffer offset, >= W+1
    w1_t = _pack_conv_weight(w1)
    w2_t = _pack_conv_weight(w2)
    x_f = x.reshape(B, Cin, HW)  # contiguous reshape, no transpose
    kern = functools.partial(_conv_block_kernel, H=H, W=W, margin=margin)
    out = pl.pallas_call(
        kern,
        out_shape=jax.ShapeDtypeStruct((B, Cout, HW), jnp.float32),
        grid_spec=pltpu.PrefetchScalarGridSpec(
            num_scalar_prefetch=0,
            grid=(B,),
            in_specs=[
                pl.BlockSpec((1, Cin, HW), lambda b: (b, 0, 0)),
                pl.BlockSpec((3, Cmid, 3 * Cin), lambda b: (0, 0, 0)),
                pl.BlockSpec((Cmid, 1), lambda b: (0, 0)),
                pl.BlockSpec((3, Cout, 3 * Cmid), lambda b: (0, 0, 0)),
                pl.BlockSpec((Cout, 1), lambda b: (0, 0)),
            ],
            out_specs=pl.BlockSpec((1, Cout, HW), lambda b: (b, 0, 0)),
            scratch_shapes=[
                pltpu.VMEM((max(Cin, Cmid), HW + 2 * margin), jnp.bfloat16)],
        ),
        # TODO(synk): add a "parallel" spatial-tile grid axis (two-pass IN,
        # halo'd blocks) for v7x and realistic MRI sizes.
        compiler_params=pltpu.CompilerParams(
            dimension_semantics=("parallel",),
            vmem_limit_bytes=_VMEM_LIMIT),
    )(x_f, w1_t, b1.reshape(Cmid, 1), w2_t, b2.reshape(Cout, 1))
    return out.reshape(B, Cout, H, W)


def _fold_1x1_chain(convs):
    """Collapse Conv1x1 -> Conv1x1 -> Conv1x1 (no nonlinearities) into one."""
    (w1, b1), (w2, b2), (w3, b3) = convs
    m1 = w1.reshape(w1.shape[0], w1.shape[1])
    m2 = w2.reshape(w2.shape[0], w2.shape[1])
    m3 = w3.reshape(w3.shape[0], w3.shape[1])
    wf = m3 @ m2 @ m1
    bf = m3 @ (m2 @ b1 + b2) + b3
    return wf, bf


def out_convs(convs, x):
    """nn.Sequential of three Conv2d(kernel_size=1) folded to one matmul."""
    B, Cin, H, W = x.shape
    HW = H * W
    wf, bf = _fold_1x1_chain(convs)
    Cout = wf.shape[0]
    out = pl.pallas_call(
        _out_conv_kernel,
        out_shape=jax.ShapeDtypeStruct((B, Cout, HW), jnp.float32),
        grid_spec=pltpu.PrefetchScalarGridSpec(
            num_scalar_prefetch=0,
            grid=(B,),
            in_specs=[
                pl.BlockSpec((1, Cin, HW), lambda b: (b, 0, 0)),
                pl.BlockSpec((Cout, Cin), lambda b: (0, 0)),
                pl.BlockSpec((Cout, 1), lambda b: (0, 0)),
            ],
            out_specs=pl.BlockSpec((1, Cout, HW), lambda b: (b, 0, 0)),
        ),
        compiler_params=pltpu.CompilerParams(
            dimension_semantics=("parallel",),
            vmem_limit_bytes=_VMEM_LIMIT),
    )(x.reshape(B, Cin, HW), wf.astype(jnp.bfloat16), bf.reshape(Cout, 1))
    return out.reshape(B, Cout, H, W)


def dc_merge(mask_1f, k_2bf, kp_2bf):
    """Lane-dense, column-tiled elementwise k-space merge (pipelined)."""
    R, HW = k_2bf.shape
    tc = HW
    if HW > 8192:
        for cand in (8192, 4096, 2048, 1024, 512, 256, 128):
            if HW % cand == 0:
                tc = cand
                break
    return pl.pallas_call(
        _dc_merge_kernel,
        out_shape=jax.ShapeDtypeStruct((R, HW), jnp.float32),
        grid_spec=pltpu.PrefetchScalarGridSpec(
            num_scalar_prefetch=0,
            grid=(HW // tc,),
            in_specs=[
                pl.BlockSpec((1, tc), lambda j: (0, j)),
                pl.BlockSpec((R, tc), lambda j: (0, j)),
                pl.BlockSpec((R, tc), lambda j: (0, j)),
            ],
            out_specs=pl.BlockSpec((R, tc), lambda j: (0, j)),
        ),
        compiler_params=pltpu.CompilerParams(
            dimension_semantics=("parallel",),
            vmem_limit_bytes=_VMEM_LIMIT),
    )(mask_1f, k_2bf, kp_2bf)


# ----------------------------------------------------------------------------
# Pooling / upsampling glue (plain JAX, NCHW)
# ----------------------------------------------------------------------------
# TODO(synk): fuse max_pool2 into the conv-block epilogue and feed up-path
# blocks directly from coarse+skip tiles to cut HBM round trips per level.
def max_pool2(x):
    B, C, H, W = x.shape
    return x.reshape(B, C, H // 2, 2, W // 2, 2).max(axis=(3, 5))


def _upsample2x_1d(a, axis):
    """F.interpolate(scale_factor=2, mode='bilinear', align_corners=False)
    along one axis: exact 2-tap 0.25/0.75 stencil with edge clamping."""
    n = a.shape[axis]
    sl = lambda s, e: jax.lax.slice_in_dim(a, s, e, axis=axis)
    lo = jnp.concatenate([sl(0, 1), sl(0, n - 1)], axis=axis)   # x[max(i-1,0)]
    hi = jnp.concatenate([sl(1, n), sl(n - 1, n)], axis=axis)   # x[min(i+1,n-1)]
    even = 0.75 * a + 0.25 * lo        # output index 2i
    odd = 0.75 * a + 0.25 * hi         # output index 2i+1
    out = jnp.stack([even, odd], axis=axis + 1)
    shape = list(a.shape)
    shape[axis] = 2 * n
    return out.reshape(shape)


def upsample2x_bilinear(x):
    return _upsample2x_1d(_upsample2x_1d(x, 2), 3)


# ----------------------------------------------------------------------------
# U-Net
# ----------------------------------------------------------------------------
def init_conv(key, cout, cin, k):
    kw, kb = jax.random.split(key)
    fan_in = cin * k * k
    w = jax.random.normal(kw, (cout, cin, k, k), jnp.float32) / jnp.sqrt(
        jnp.float32(fan_in))
    b = jax.random.normal(kb, (cout,), jnp.float32) * 0.01
    return w, b


def init_conv_block(key, cin, cout):
    k1, k2 = jax.random.split(key)
    w1, b1 = init_conv(k1, cout, cin, 3)
    w2, b2 = init_conv(k2, cout, cout, 3)
    return dict(w1=w1, b1=b1, w2=w2, b2=b2)


def init_unet(key, in_chans, out_chans, chans, num_pool_layers):
    keys = iter(jax.random.split(key, 4 * num_pool_layers + 8))
    down = [init_conv_block(next(keys), in_chans, chans)]
    ch = chans
    for _ in range(num_pool_layers - 1):
        down.append(init_conv_block(next(keys), ch, ch * 2))
        ch *= 2
    mid = init_conv_block(next(keys), ch, ch)
    up = []
    for _ in range(num_pool_layers - 1):
        up.append(init_conv_block(next(keys), ch * 2, ch // 2))
        ch //= 2
    up.append(init_conv_block(next(keys), ch * 2, ch))
    c2a = init_conv(next(keys), ch // 2, ch, 1)
    c2b = init_conv(next(keys), out_chans, ch // 2, 1)
    c2c = init_conv(next(keys), out_chans, out_chans, 1)
    return dict(down=down, mid=mid, up=up, conv2=[c2a, c2b, c2c])


def unet_forward(params, x):
    stack = []
    out = x
    for blk in params["down"]:
        out = conv_block(blk, out)
        stack.append(out)
        out = max_pool2(out)
    out = conv_block(params["mid"], out)
    for blk in params["up"]:
        out = upsample2x_bilinear(out)
        out = jnp.concatenate([out, stack.pop()], axis=1)
        out = conv_block(blk, out)
    return out_convs(params["conv2"], out)


# ----------------------------------------------------------------------------
# Data consistency (torch.rfft/ifft with normalized=True  <=>  norm='ortho')
# ----------------------------------------------------------------------------
def data_consistency(x, k, mask):
    """x: [B,1,H,W] f32; k: [B,1,H,W,2] f32; mask: [H,W] f32."""
    B, _, H, W = x.shape
    pred = x[:, 0, :, :]
    kp = jnp.fft.fft2(pred.astype(jnp.complex64), norm="ortho")
    kp_ri = jnp.stack([jnp.real(kp), jnp.imag(kp)], axis=1)           # [B,2,H,W]
    k_ri = jnp.transpose(k[:, 0], (0, 3, 1, 2)).astype(jnp.float32)   # [B,2,H,W]
    # TODO(synk): reference code upcasts k-space to float64 (.double()); kept
    # float32/complex64 here (same semantics, small numeric drift expected).
    upd = dc_merge(mask.reshape(1, H * W),
                   k_ri.reshape(B * 2, H * W),
                   kp_ri.reshape(B * 2, H * W))                        # Pallas
    upd = upd.reshape(B, 2, H, W)
    img = jnp.fft.ifft2(upd[:, 0] + 1j * upd[:, 1], norm="ortho")
    return jnp.real(img)[:, None, :, :].astype(jnp.float32)


# ----------------------------------------------------------------------------
# DnCn cascade
# ----------------------------------------------------------------------------
def dncn_forward(params, x, k, mask, *, nc=3, dataset_type="mrbrain"):
    for i in range(nc):
        x_cnn = unet_forward(params["unets"][i], x)
        x = x + x_cnn
        xcrop = x
        if dataset_type == "cardiac":
            xcrop = x[:, :, 5:x.shape[2] - 5, 5:x.shape[3] - 5]
        x = data_consistency(xcrop, k, mask)
        if dataset_type == "cardiac":
            x = jnp.pad(x, ((0, 0), (0, 0), (5, 5), (5, 5)))
    return x


# ----------------------------------------------------------------------------
# Main
# ----------------------------------------------------------------------------
if __name__ == "__main__":
    B, H, W = 2, 16, 16
    num_chans, num_pools, nc = 4, 2, 3

    key = jax.random.PRNGKey(0)
    k_params, k_img, k_mask = jax.random.split(key, 3)

    # Cascade of nc U-Nets (deterministic synthetic weights).
    unet_keys = jax.random.split(k_params, nc)
    params = dict(unets=[init_unet(uk, 1, 1, num_chans, num_pools)
                         for uk in unet_keys])

    # Synthetic Cartesian undersampling mask (columns), center always sampled.
    col_keep = jax.random.bernoulli(k_mask, 0.3, (W,))
    col_keep = col_keep.at[W // 2 - 2:W // 2 + 2].set(True)
    mask = jnp.broadcast_to(col_keep.astype(jnp.float32)[None, :], (H, W))

    # Synthetic ground truth -> undersampled k-space + zero-filled input image.
    gt = jax.random.normal(k_img, (B, H, W), jnp.float32)
    full_k = jnp.fft.fft2(gt, norm="ortho")
    us_k = full_k * mask[None, :, :]
    k_in = jnp.stack([jnp.real(us_k), jnp.imag(us_k)], axis=-1)[:, None]  # [B,1,H,W,2]
    x0 = jnp.real(jnp.fft.ifft2(us_k, norm="ortho"))[:, None].astype(jnp.float32)

    fwd = jax.jit(functools.partial(dncn_forward, nc=nc,
                                    dataset_type="mrbrain"))
    out = fwd(params, x0, k_in, mask)
    jax.block_until_ready(out)
    assert out.shape == (B, 1, H, W) and out.dtype == jnp.float32
    print("KERNEL_OK")
</pallas_src>

<mosaic_0001>
module attributes {stable_mosaic.version = 11 : i64} {
  func.func @_conv_block_kernel(%arg0: i32, %arg1: memref<1x1x256xf32, #tpu.memory_space<vmem>>, %arg2: memref<3x4x3xbf16, #tpu.memory_space<vmem>>, %arg3: memref<4x1xf32, #tpu.memory_space<vmem>>, %arg4: memref<3x4x12xbf16, #tpu.memory_space<vmem>>, %arg5: memref<4x1xf32, #tpu.memory_space<vmem>>, %arg6: memref<1x4x256xf32, #tpu.memory_space<vmem>>, %arg7: memref<4x512xbf16, #tpu.memory_space<vmem>>) attributes {dimension_semantics = [#tpu.dimension_semantics<parallel>], iteration_bounds = array<i64: 2>, scalar_prefetch = 0 : i64, scratch_operands = 1 : i64, tpu.core_type = #tpu.core_type<tc>, window_params = [{transform_indices = @transform_0, window_bounds = array<i64: 1, 1, 256>}, {pipeline_mode = #tpu.pipeline_mode<synchronous>, transform_indices = @transform_1, window_bounds = array<i64: 3, 4, 3>}, {pipeline_mode = #tpu.pipeline_mode<synchronous>, transform_indices = @transform_2, window_bounds = array<i64: 4, 1>}, {pipeline_mode = #tpu.pipeline_mode<synchronous>, transform_indices = @transform_3, window_bounds = array<i64: 3, 4, 12>}, {pipeline_mode = #tpu.pipeline_mode<synchronous>, transform_indices = @transform_4, window_bounds = array<i64: 4, 1>}, {transform_indices = @transform_5, window_bounds = array<i64: 1, 4, 256>}]} {
    %0 = tpu.iota {dimensions = array<i32: 1>} : vector<1x256xi32>
    %c16_i32 = arith.constant 16 : i32
    %c0_i32 = arith.constant 0 : i32
    %1 = arith.cmpi eq, %c16_i32, %c0_i32 : i32
    %c1_i32 = arith.constant 1 : i32
    %2 = arith.select %1, %c1_i32, %c16_i32 : i32
    %3 = vector.broadcast %2 : i32 to vector<1x256xi32>
    %4 = arith.remsi %0, %3 : vector<1x256xi32>
    %c0_i32_0 = arith.constant 0 : i32
    %5 = vector.broadcast %c0_i32_0 : i32 to vector<1x256xi32>
    %6 = arith.cmpi ne, %4, %5 : vector<1x256xi32>
    %c0_i32_1 = arith.constant 0 : i32
    %7 = vector.broadcast %c0_i32_1 : i32 to vector<1x256xi32>
    %8 = arith.cmpi slt, %4, %7 : vector<1x256xi32>
    %c0_i32_2 = arith.constant 0 : i32
    %9 = arith.cmpi slt, %2, %c0_i32_2 : i32
    %10 = vector.broadcast %9 : i1 to vector<1x256xi1>
    %11 = vector.broadcast %10 : vector<1x256xi1> to vector<1x256xi1>
    %12 = arith.xori %8, %11 : vector<1x256xi1>
    %13 = arith.andi %12, %6 : vector<1x256xi1>
    %14 = vector.broadcast %2 : i32 to vector<1x256xi32>
    %15 = arith.addi %4, %14 : vector<1x256xi32>
    %16 = arith.select %13, %15, %4 : vector<1x256xi1>, vector<1x256xi32>
    %c0_i32_3 = arith.constant 0 : i32
    %17 = vector.broadcast %c0_i32_3 : i32 to vector<1x256xi32>
    %18 = arith.cmpi sgt, %16, %17 : vector<1x256xi32>
    %19 = arith.extui %18 : vector<1x256xi1> to vector<1x256xi32>
    %20 = arith.sitofp %19 : vector<1x256xi32> to vector<1x256xf32>
    %c15_i32 = arith.constant 15 : i32
    %21 = vector.broadcast %c15_i32 : i32 to vector<1x256xi32>
    %22 = arith.cmpi slt, %16, %21 : vector<1x256xi32>
    %23 = arith.extui %22 : vector<1x256xi1> to vector<1x256xi32>
    %24 = arith.sitofp %23 : vector<1x256xi32> to vector<1x256xf32>
    %cst = arith.constant 0.000000e+00 : bf16
    %25 = vector.broadcast %cst : bf16 to vector<4x128xbf16>
    %c0 = arith.constant 0 : index
    %c0_4 = arith.constant 0 : index
    %26 = vector.load %arg7[%c0, %c0_4] : memref<4x512xbf16, #tpu.memory_space<vmem>>, vector<4x128xbf16>
    tpu.vector_store %arg7[%c0, %c0_4], %25 {strides = array<i32>} : memref<4x512xbf16, #tpu.memory_space<vmem>>, vector<4x128xbf16>,
    %c0_5 = arith.constant 0 : index
    %c384 = arith.constant 384 : index
    %27 = vector.load %arg7[%c0_5, %c384] : memref<4x512xbf16, #tpu.memory_space<vmem>>, vector<4x128xbf16>
    tpu.vector_store %arg7[%c0_5, %c384], %25 {strides = array<i32>} : memref<4x512xbf16, #tpu.memory_space<vmem>>, vector<4x128xbf16>,
    %c0_6 = arith.constant 0 : index
    %c0_7 = arith.constant 0 : index
    %c0_8 = arith.constant 0 : index
    %28 = vector.load %arg1[%c0_6, %c0_7, %c0_8] : memref<1x1x256xf32, #tpu.memory_space<vmem>>, vector<1x1x256xf32>
    %29 = vector.shape_cast %28 : vector<1x1x256xf32> to vector<1x256xf32>
    %30 = arith.truncf %29 : vector<1x256xf32> to vector<1x256xbf16>
    %c0_9 = arith.constant 0 : index
    %c128 = arith.constant 128 : index
    %31 = vector.load %arg7[%c0_9, %c128] : memref<4x512xbf16, #tpu.memory_space<vmem>>, vector<1x256xbf16>
    tpu.vector_store %arg7[%c0_9, %c128], %30 {strides = array<i32>} : memref<4x512xbf16, #tpu.memory_space<vmem>>, vector<1x256xbf16>,
    %c0_10 = arith.constant 0 : index
    %c0_11 = arith.constant 0 : index
    %c0_12 = arith.constant 0 : index
    %32 = vector.load %arg2[%c0_10, %c0_11, %c0_12] : memref<3x4x3xbf16, #tpu.memory_space<vmem>>, vector<1x4x3xbf16>
    %33 = vector.shape_cast %32 : vector<1x4x3xbf16> to vector<4x3xbf16>
    %c0_13 = arith.constant 0 : index
    %c111 = arith.constant 111 : index
    %34 = vector.load %arg7[%c0_13, %c111] : memref<4x512xbf16, #tpu.memory_space<vmem>>, vector<1x256xbf16>
    %c0_14 = arith.constant 0 : index
    %c127 = arith.constant 127 : index
    %35 = vector.load %arg7[%c0_14, %c127] : memref<4x512xbf16, #tpu.memory_space<vmem>>, vector<1x256xbf16>
    %c0_15 = arith.constant 0 : index
    %c143 = arith.constant 143 : index
    %36 = vector.load %arg7[%c0_15, %c143] : memref<4x512xbf16, #tpu.memory_space<vmem>>, vector<1x256xbf16>
    %37 = tpu.concatenate %34, %35, %36 in 0 : vector<1x256xbf16>, vector<1x256xbf16>, vector<1x256xbf16> -> vector<3x256xbf16>
    %cst_16 = arith.constant dense<0.000000e+00> : vector<4x256xf32>
    %38 = tpu.matmul %33, %37, %cst_16 {dimension_numbers = #tpu.dot_dimension_numbers<[1], [0], [0], [1], [0, 0, 1, 1], [], []>} : vector<4x3xbf16>, vector<3x256xbf16>, vector<4x256xf32> -> vector<4x256xf32>
    %c1 = arith.constant 1 : index
    %c0_17 = arith.constant 0 : index
    %c0_18 = arith.constant 0 : index
    %39 = vector.load %arg2[%c1, %c0_17, %c0_18] : memref<3x4x3xbf16, #tpu.memory_space<vmem>>, vector<1x4x3xbf16>
    %40 = vector.shape_cast %39 : vector<1x4x3xbf16> to vector<4x3xbf16>
    %c0_19 = arith.constant 0 : index
    %c112 = arith.constant 112 : index
    %41 = vector.load %arg7[%c0_19, %c112] : memref<4x512xbf16, #tpu.memory_space<vmem>>, vector<1x256xbf16>
    %c0_20 = arith.constant 0 : index
    %c128_21 = arith.constant 128 : index
    %42 = vector.load %arg7[%c0_20, %c128_21] : memref<4x512xbf16, #tpu.memory_space<vmem>>, vector<1x256xbf16>
    %c0_22 = arith.constant 0 : index
    %c144 = arith.constant 144 : index
    %43 = vector.load %arg7[%c0_22, %c144] : memref<4x512xbf16, #tpu.memory_space<vmem>>, vector<1x256xbf16>
    %44 = tpu.concatenate %41, %42, %43 in 0 : vector<1x256xbf16>, vector<1x256xbf16>, vector<1x256xbf16> -> vector<3x256xbf16>
    %cst_23 = arith.constant dense<0.000000e+00> : vector<4x256xf32>
    %45 = tpu.matmul %40, %44, %cst_23 {dimension_numbers = #tpu.dot_dimension_numbers<[1], [0], [0], [1], [0, 0, 1, 1], [], []>} : vector<4x3xbf16>, vector<3x256xbf16>, vector<4x256xf32> -> vector<4x256xf32>
    %c2 = arith.constant 2 : index
    %c0_24 = arith.constant 0 : index
    %c0_25 = arith.constant 0 : index
    %46 = vector.load %arg2[%c2, %c0_24, %c0_25] : memref<3x4x3xbf16, #tpu.memory_space<vmem>>, vector<1x4x3xbf16>
    %47 = vector.shape_cast %46 : vector<1x4x3xbf16> to vector<4x3xbf16>
    %c0_26 = arith.constant 0 : index
    %c113 = arith.constant 113 : index
    %48 = vector.load %arg7[%c0_26, %c113] : memref<4x512xbf16, #tpu.memory_space<vmem>>, vector<1x256xbf16>
    %c0_27 = arith.constant 0 : index
    %c129 = arith.constant 129 : index
    %49 = vector.load %arg7[%c0_27, %c129] : memref<4x512xbf16, #tpu.memory_space<vmem>>, vector<1x256xbf16>
    %c0_28 = arith.constant 0 : index
    %c145 = arith.constant 145 : index
    %50 = vector.load %arg7[%c0_28, %c145] : memref<4x512xbf16, #tpu.memory_space<vmem>>, vector<1x256xbf16>
    %51 = tpu.concatenate %48, %49, %50 in 0 : vector<1x256xbf16>, vector<1x256xbf16>, vector<1x256xbf16> -> vector<3x256xbf16>
    %cst_29 = arith.constant dense<0.000000e+00> : vector<4x256xf32>
    %52 = tpu.matmul %47, %51, %cst_29 {dimension_numbers = #tpu.dot_dimension_numbers<[1], [0], [0], [1], [0, 0, 1, 1], [], []>} : vector<4x3xbf16>, vector<3x256xbf16>, vector<4x256xf32> -> vector<4x256xf32>
    %53 = vector.broadcast %20 : vector<1x256xf32> to vector<4x256xf32>
    %54 = arith.mulf %38, %53 : vector<4x256xf32>
    %55 = arith.addf %45, %54 : vector<4x256xf32>
    %56 = vector.broadcast %24 : vector<1x256xf32> to vector<4x256xf32>
    %57 = arith.mulf %52, %56 : vector<4x256xf32>
    %58 = arith.addf %55, %57 : vector<4x256xf32>
    %c0_30 = arith.constant 0 : index
    %c0_31 = arith.constant 0 : index
    %59 = vector.load %arg3[%c0_30, %c0_31] : memref<4x1xf32, #tpu.memory_space<vmem>>, vector<4x1xf32>
    %60 = vector.broadcast %59 : vector<4x1xf32> to vector<4x256xf32>
    %61 = arith.addf %58, %60 : vector<4x256xf32>
    %cst_32 = arith.constant dense<0.000000e+00> : vector<4xf32>
    %62 = vector.multi_reduction <add>, %61, %cst_32 [1] : vector<4x256xf32> to vector<4xf32>
    %63 = vector.shape_cast %62 : vector<4xf32> to vector<4x1xf32>
    %cst_33 = arith.constant 2.560000e+02 : f32
    %64 = vector.broadcast %cst_33 : f32 to vector<4x1xf32>
    %65 = arith.divf %63, %64 : vector<4x1xf32>
    %66 = arith.mulf %61, %61 : vector<4x256xf32>
    %cst_34 = arith.constant dense<0.000000e+00> : vector<4xf32>
    %67 = vector.multi_reduction <add>, %66, %cst_34 [1] : vector<4x256xf32> to vector<4xf32>
    %68 = vector.shape_cast %67 : vector<4xf32> to vector<4x1xf32>
    %cst_35 = arith.constant 2.560000e+02 : f32
    %69 = vector.broadcast %cst_35 : f32 to vector<4x1xf32>
    %70 = arith.divf %68, %69 : vector<4x1xf32>
    %71 = arith.mulf %65, %65 : vector<4x1xf32>
    %72 = arith.subf %70, %71 : vector<4x1xf32>
    %cst_36 = arith.constant 0.000000e+00 : f32
    %73 = vector.broadcast %cst_36 : f32 to vector<4x1xf32>
    %74 = arith.maximumf %72, %73 : vector<4x1xf32>
    %75 = vector.broadcast %65 : vector<4x1xf32> to vector<4x256xf32>
    %76 = arith.subf %61, %75 : vector<4x256xf32>
    %cst_37 = arith.constant 9.99999974E-6 : f32
    %77 = vector.broadcast %cst_37 : f32 to vector<4x1xf32>
    %78 = arith.addf %74, %77 : vector<4x1xf32>
    %79 = math.rsqrt %78 : vector<4x1xf32>
    %80 = vector.broadcast %79 : vector<4x1xf32> to vector<4x256xf32>
    %81 = arith.mulf %76, %80 : vector<4x256xf32>
    %cst_38 = arith.constant 0.000000e+00 : f32
    %82 = vector.broadcast %cst_38 : f32 to vector<4x256xf32>
    %83 = arith.maximumf %81, %82 : vector<4x256xf32>
    %84 = arith.truncf %83 : vector<4x256xf32> to vector<4x256xbf16>
    %c0_39 = arith.constant 0 : index
    %c128_40 = arith.constant 128 : index
    %85 = vector.load %arg7[%c0_39, %c128_40] : memref<4x512xbf16, #tpu.memory_space<vmem>>, vector<4x256xbf16>
    tpu.vector_store %arg7[%c0_39, %c128_40], %84 {strides = array<i32>} : memref<4x512xbf16, #tpu.memory_space<vmem>>, vector<4x256xbf16>,
    %c0_41 = arith.constant 0 : index
    %c0_42 = arith.constant 0 : index
    %c0_43 = arith.constant 0 : index
    %86 = vector.load %arg4[%c0_41, %c0_42, %c0_43] : memref<3x4x12xbf16, #tpu.memory_space<vmem>>, vector<1x4x12xbf16>
    %87 = vector.shape_cast %86 : vector<1x4x12xbf16> to vector<4x12xbf16>
    %c0_44 = arith.constant 0 : index
    %c111_45 = arith.constant 111 : index
    %88 = vector.load %arg7[%c0_44, %c111_45] : memref<4x512xbf16, #tpu.memory_space<vmem>>, vector<4x256xbf16>
    %c0_46 = arith.constant 0 : index
    %c127_47 = arith.constant 127 : index
    %89 = vector.load %arg7[%c0_46, %c127_47] : memref<4x512xbf16, #tpu.memory_space<vmem>>, vector<4x256xbf16>
    %c0_48 = arith.constant 0 : index
    %c143_49 = arith.constant 143 : index
    %90 = vector.load %arg7[%c0_48, %c143_49] : memref<4x512xbf16, #tpu.memory_space<vmem>>, vector<4x256xbf16>
    %91 = tpu.concatenate %88, %89, %90 in 0 : vector<4x256xbf16>, vector<4x256xbf16>, vector<4x256xbf16> -> vector<12x256xbf16>
    %cst_50 = arith.constant dense<0.000000e+00> : vector<4x256xf32>
    %92 = tpu.matmul %87, %91, %cst_50 {dimension_numbers = #tpu.dot_dimension_numbers<[1], [0], [0], [1], [0, 0, 1, 1], [], []>} : vector<4x12xbf16>, vector<12x256xbf16>, vector<4x256xf32> -> vector<4x256xf32>
    %c1_51 = arith.constant 1 : index
    %c0_52 = arith.constant 0 : index
    %c0_53 = arith.constant 0 : index
    %93 = vector.load %arg4[%c1_51, %c0_52, %c0_53] : memref<3x4x12xbf16, #tpu.memory_space<vmem>>, vector<1x4x12xbf16>
    %94 = vector.shape_cast %93 : vector<1x4x12xbf16> to vector<4x12xbf16>
    %c0_54 = arith.constant 0 : index
    %c112_55 = arith.constant 112 : index
    %95 = vector.load %arg7[%c0_54, %c112_55] : memref<4x512xbf16, #tpu.memory_space<vmem>>, vector<4x256xbf16>
    %c0_56 = arith.constant 0 : index
    %c128_57 = arith.constant 128 : index
    %96 = vector.load %arg7[%c0_56, %c128_57] : memref<4x512xbf16, #tpu.memory_space<vmem>>, vector<4x256xbf16>
    %c0_58 = arith.constant 0 : index
    %c144_59 = arith.constant 144 : index
    %97 = vector.load %arg7[%c0_58, %c144_59] : memref<4x512xbf16, #tpu.memory_space<vmem>>, vector<4x256xbf16>
    %98 = tpu.concatenate %95, %96, %97 in 0 : vector<4x256xbf16>, vector<4x256xbf16>, vector<4x256xbf16> -> vector<12x256xbf16>
    %cst_60 = arith.constant dense<0.000000e+00> : vector<4x256xf32>
    %99 = tpu.matmul %94, %98, %cst_60 {dimension_numbers = #tpu.dot_dimension_numbers<[1], [0], [0], [1], [0, 0, 1, 1], [], []>} : vector<4x12xbf16>, vector<12x256xbf16>, vector<4x256xf32> -> vector<4x256xf32>
    %c2_61 = arith.constant 2 : index
    %c0_62 = arith.constant 0 : index
    %c0_63 = arith.constant 0 : index
    %100 = vector.load %arg4[%c2_61, %c0_62, %c0_63] : memref<3x4x12xbf16, #tpu.memory_space<vmem>>, vector<1x4x12xbf16>
    %101 = vector.shape_cast %100 : vector<1x4x12xbf16> to vector<4x12xbf16>
    %c0_64 = arith.constant 0 : index
    %c113_65 = arith.constant 113 : index
    %102 = vector.load %arg7[%c0_64, %c113_65] : memref<4x512xbf16, #tpu.memory_space<vmem>>, vector<4x256xbf16>
    %c0_66 = arith.constant 0 : index
    %c129_67 = arith.constant 129 : index
    %103 = vector.load %arg7[%c0_66, %c129_67] : memref<4x512xbf16, #tpu.memory_space<vmem>>, vector<4x256xbf16>
    %c0_68 = arith.constant 0 : index
    %c145_69 = arith.constant 145 : index
    %104 = vector.load %arg7[%c0_68, %c145_69] : memref<4x512xbf16, #tpu.memory_space<vmem>>, vector<4x256xbf16>
    %105 = tpu.concatenate %102, %103, %104 in 0 : vector<4x256xbf16>, vector<4x256xbf16>, vector<4x256xbf16> -> vector<12x256xbf16>
    %cst_70 = arith.constant dense<0.000000e+00> : vector<4x256xf32>
    %106 = tpu.matmul %101, %105, %cst_70 {dimension_numbers = #tpu.dot_dimension_numbers<[1], [0], [0], [1], [0, 0, 1, 1], [], []>} : vector<4x12xbf16>, vector<12x256xbf16>, vector<4x256xf32> -> vector<4x256xf32>
    %107 = vector.broadcast %20 : vector<1x256xf32> to vector<4x256xf32>
    %108 = arith.mulf %92, %107 : vector<4x256xf32>
    %109 = arith.addf %99, %108 : vector<4x256xf32>
    %110 = vector.broadcast %24 : vector<1x256xf32> to vector<4x256xf32>
    %111 = arith.mulf %106, %110 : vector<4x256xf32>
    %112 = arith.addf %109, %111 : vector<4x256xf32>
    %c0_71 = arith.constant 0 : index
    %c0_72 = arith.constant 0 : index
    %113 = vector.load %arg5[%c0_71, %c0_72] : memref<4x1xf32, #tpu.memory_space<vmem>>, vector<4x1xf32>
    %114 = vector.broadcast %113 : vector<4x1xf32> to vector<4x256xf32>
    %115 = arith.addf %112, %114 : vector<4x256xf32>
    %cst_73 = arith.constant dense<0.000000e+00> : vector<4xf32>
    %116 = vector.multi_reduction <add>, %115, %cst_73 [1] : vector<4x256xf32> to vector<4xf32>
    %117 = vector.shape_cast %116 : vector<4xf32> to vector<4x1xf32>
    %cst_74 = arith.constant 2.560000e+02 : f32
    %118 = vector.broadcast %cst_74 : f32 to vector<4x1xf32>
    %119 = arith.divf %117, %118 : vector<4x1xf32>
    %120 = arith.mulf %115, %115 : vector<4x256xf32>
    %cst_75 = arith.constant dense<0.000000e+00> : vector<4xf32>
    %121 = vector.multi_reduction <add>, %120, %cst_75 [1] : vector<4x256xf32> to vector<4xf32>
    %122 = vector.shape_cast %121 : vector<4xf32> to vector<4x1xf32>
    %cst_76 = arith.constant 2.560000e+02 : f32
    %123 = vector.broadcast %cst_76 : f32 to vector<4x1xf32>
    %124 = arith.divf %122, %123 : vector<4x1xf32>
    %125 = arith.mulf %119, %119 : vector<4x1xf32>
    %126 = arith.subf %124, %125 : vector<4x1xf32>
    %cst_77 = arith.constant 0.000000e+00 : f32
    %127 = vector.broadcast %cst_77 : f32 to vector<4x1xf32>
    %128 = arith.maximumf %126, %127 : vector<4x1xf32>
    %129 = vector.broadcast %119 : vector<4x1xf32> to vector<4x256xf32>
    %130 = arith.subf %115, %129 : vector<4x256xf32>
    %cst_78 = arith.constant 9.99999974E-6 : f32
    %131 = vector.broadcast %cst_78 : f32 to vector<4x1xf32>
    %132 = arith.addf %128, %131 : vector<4x1xf32>
    %133 = math.rsqrt %132 : vector<4x1xf32>
    %134 = vector.broadcast %133 : vector<4x1xf32> to vector<4x256xf32>
    %135 = arith.mulf %130, %134 : vector<4x256xf32>
    %cst_79 = arith.constant 0.000000e+00 : f32
    %136 = vector.broadcast %cst_79 : f32 to vector<4x256xf32>
    %137 = arith.maximumf %135, %136 : vector<4x256xf32>
    %c0_80 = arith.constant 0 : index
    %c0_81 = arith.constant 0 : index
    %c0_82 = arith.constant 0 : index
    %138 = vector.load %arg6[%c0_80, %c0_81, %c0_82] : memref<1x4x256xf32, #tpu.memory_space<vmem>>, vector<1x4x256xf32>
    %139 = vector.shape_cast %138 : vector<1x4x256xf32> to vector<4x256xf32>
    %140 = vector.shape_cast %137 : vector<4x256xf32> to vector<1x4x256xf32>
    tpu.vector_store %arg6[%c0_80, %c0_81, %c0_82], %140 {strides = array<i32>} : memref<1x4x256xf32, #tpu.memory_space<vmem>>, vector<1x4x256xf32>,
    return
  }
  func.func @transform_0(%arg0: i32) -> (i32, i32, i32) {
    %c0_i32 = arith.constant 0 : i32
    %c0_i32_0 = arith.constant 0 : i32
    %c0_i32_1 = arith.constant 0 : i32
    return %arg0, %c0_i32, %c0_i32_0 : i32, i32, i32
  }
  func.func @transform_1(%arg0: i32) -> (i32, i32, i32) {
    %c0_i32 = arith.constant 0 : i32
    %c0_i32_0 = arith.constant 0 : i32
    %c0_i32_1 = arith.constant 0 : i32
    %c0_i32_2 = arith.constant 0 : i32
    return %c0_i32, %c0_i32_0, %c0_i32_1 : i32, i32, i32
  }
  func.func @transform_2(%arg0: i32) -> (i32, i32) {
    %c0_i32 = arith.constant 0 : i32
    %c0_i32_0 = arith.constant 0 : i32
    %c0_i32_1 = arith.constant 0 : i32
    return %c0_i32, %c0_i32_0 : i32, i32
  }
  func.func @transform_3(%arg0: i32) -> (i32, i32, i32) {
    %c0_i32 = arith.constant 0 : i32
    %c0_i32_0 = arith.constant 0 : i32
    %c0_i32_1 = arith.constant 0 : i32
    %c0_i32_2 = arith.constant 0 : i32
    return %c0_i32, %c0_i32_0, %c0_i32_1 : i32, i32, i32
  }
  func.func @transform_4(%arg0: i32) -> (i32, i32) {
    %c0_i32 = arith.constant 0 : i32
    %c0_i32_0 = arith.constant 0 : i32
    %c0_i32_1 = arith.constant 0 : i32
    return %c0_i32, %c0_i32_0 : i32, i32
  }
  func.func @transform_5(%arg0: i32) -> (i32, i32, i32) {
    %c0_i32 = arith.constant 0 : i32
    %c0_i32_0 = arith.constant 0 : i32
    %c0_i32_1 = arith.constant 0 : i32
    return %arg0, %c0_i32, %c0_i32_0 : i32, i32, i32
  }
}

module attributes {stable_mosaic.version = 11 : i64} {
  func.func @_conv_block_kernel(%arg0: i32, %arg1: memref<1x4x64xf32, #tpu.memory_space<vmem>>, %arg2: memref<3x8x12xbf16, #tpu.memory_space<vmem>>, %arg3: memref<8x1xf32, #tpu.memory_space<vmem>>, %arg4: memref<3x8x24xbf16, #tpu.memory_space<vmem>>, %arg5: memref<8x1xf32, #tpu.memory_space<vmem>>, %arg6: memref<1x8x64xf32, #tpu.memory_space<vmem>>, %arg7: memref<8x320xbf16, #tpu.memory_space<vmem>>) attributes {dimension_semantics = [#tpu.dimension_semantics<parallel>], iteration_bounds = array<i64: 2>, scalar_prefetch = 0 : i64, scratch_operands = 1 : i64, tpu.core_type = #tpu.core_type<tc>, window_params = [{transform_indices = @transform_0, window_bounds = array<i64: 1, 4, 64>}, {pipeline_mode = #tpu.pipeline_mode<synchronous>, transform_indices = @transform_1, window_bounds = array<i64: 3, 8, 12>}, {pipeline_mode = #tpu.pipeline_mode<synchronous>, transform_indices = @transform_2, window_bounds = array<i64: 8, 1>}, {pipeline_mode = #tpu.pipeline_mode<synchronous>, transform_indices = @transform_3, window_bounds = array<i64: 3, 8, 24>}, {pipeline_mode = #tpu.pipeline_mode<synchronous>, transform_indices = @transform_4, window_bounds = array<i64: 8, 1>}, {transform_indices = @transform_5, window_bounds = array<i64: 1, 8, 64>}]} {
    %0 = tpu.iota {dimensions = array<i32: 1>} : vector<1x64xi32>
    %c8_i32 = arith.constant 8 : i32
    %c0_i32 = arith.constant 0 : i32
    %1 = arith.cmpi eq, %c8_i32, %c0_i32 : i32
    %c1_i32 = arith.constant 1 : i32
    %2 = arith.select %1, %c1_i32, %c8_i32 : i32
    %3 = vector.broadcast %2 : i32 to vector<1x64xi32>
    %4 = arith.remsi %0, %3 : vector<1x64xi32>
    %c0_i32_0 = arith.constant 0 : i32
    %5 = vector.broadcast %c0_i32_0 : i32 to vector<1x64xi32>
    %6 = arith.cmpi ne, %4, %5 : vector<1x64xi32>
    %c0_i32_1 = arith.constant 0 : i32
    %7 = vector.broadcast %c0_i32_1 : i32 to vector<1x64xi32>
    %8 = arith.cmpi slt, %4, %7 : vector<1x64xi32>
    %c0_i32_2 = arith.constant 0 : i32
    %9 = arith.cmpi slt, %2, %c0_i32_2 : i32
    %10 = vector.broadcast %9 : i1 to vector<1x64xi1>
    %11 = vector.broadcast %10 : vector<1x64xi1> to vector<1x64xi1>
    %12 = arith.xori %8, %11 : vector<1x64xi1>
    %13 = arith.andi %12, %6 : vector<1x64xi1>
    %14 = vector.broadcast %2 : i32 to vector<1x64xi32>
    %15 = arith.addi %4, %14 : vector<1x64xi32>
    %16 = arith.select %13, %15, %4 : vector<1x64xi1>, vector<1x64xi32>
    %c0_i32_3 = arith.constant 0 : i32
    %17 = vector.broadcast %c0_i32_3 : i32 to vector<1x64xi32>
    %18 = arith.cmpi sgt, %16, %17 : vector<1x64xi32>
    %19 = arith.extui %18 : vector<1x64xi1> to vector<1x64xi32>
    %20 = arith.sitofp %19 : vector<1x64xi32> to vector<1x64xf32>
    %c7_i32 = arith.constant 7 : i32
    %21 = vector.broadcast %c7_i32 : i32 to vector<1x64xi32>
    %22 = arith.cmpi slt, %16, %21 : vector<1x64xi32>
    %23 = arith.extui %22 : vector<1x64xi1> to vector<1x64xi32>
    %24 = arith.sitofp %23 : vector<1x64xi32> to vector<1x64xf32>
    %cst = arith.constant 0.000000e+00 : bf16
    %25 = vector.broadcast %cst : bf16 to vector<8x128xbf16>
    %c0 = arith.constant 0 : index
    %c0_4 = arith.constant 0 : index
    %26 = vector.load %arg7[%c0, %c0_4] : memref<8x320xbf16, #tpu.memory_space<vmem>>, vector<8x128xbf16>
    tpu.vector_store %arg7[%c0, %c0_4], %25 {strides = array<i32>} : memref<8x320xbf16, #tpu.memory_space<vmem>>, vector<8x128xbf16>,
    %c0_5 = arith.constant 0 : index
    %c192 = arith.constant 192 : index
    %27 = vector.load %arg7[%c0_5, %c192] : memref<8x320xbf16, #tpu.memory_space<vmem>>, vector<8x128xbf16>
    tpu.vector_store %arg7[%c0_5, %c192], %25 {strides = array<i32>} : memref<8x320xbf16, #tpu.memory_space<vmem>>, vector<8x128xbf16>,
    %c0_6 = arith.constant 0 : index
    %c0_7 = arith.constant 0 : index
    %c0_8 = arith.constant 0 : index
    %28 = vector.load %arg1[%c0_6, %c0_7, %c0_8] : memref<1x4x64xf32, #tpu.memory_space<vmem>>, vector<1x4x64xf32>
    %29 = vector.shape_cast %28 : vector<1x4x64xf32> to vector<4x64xf32>
    %30 = arith.truncf %29 : vector<4x64xf32> to vector<4x64xbf16>
    %c0_9 = arith.constant 0 : index
    %c128 = arith.constant 128 : index
    %31 = vector.load %arg7[%c0_9, %c128] : memref<8x320xbf16, #tpu.memory_space<vmem>>, vector<4x64xbf16>
    tpu.vector_store %arg7[%c0_9, %c128], %30 {strides = array<i32>} : memref<8x320xbf16, #tpu.memory_space<vmem>>, vector<4x64xbf16>,
    %c0_10 = arith.constant 0 : index
    %c0_11 = arith.constant 0 : index
    %c0_12 = arith.constant 0 : index
    %32 = vector.load %arg2[%c0_10, %c0_11, %c0_12] : memref<3x8x12xbf16, #tpu.memory_space<vmem>>, vector<1x8x12xbf16>
    %33 = vector.shape_cast %32 : vector<1x8x12xbf16> to vector<8x12xbf16>
    %c0_13 = arith.constant 0 : index
    %c119 = arith.constant 119 : index
    %34 = vector.load %arg7[%c0_13, %c119] : memref<8x320xbf16, #tpu.memory_space<vmem>>, vector<4x64xbf16>
    %c0_14 = arith.constant 0 : index
    %c127 = arith.constant 127 : index
    %35 = vector.load %arg7[%c0_14, %c127] : memref<8x320xbf16, #tpu.memory_space<vmem>>, vector<4x64xbf16>
    %c0_15 = arith.constant 0 : index
    %c135 = arith.constant 135 : index
    %36 = vector.load %arg7[%c0_15, %c135] : memref<8x320xbf16, #tpu.memory_space<vmem>>, vector<4x64xbf16>
    %37 = tpu.concatenate %34, %35, %36 in 0 : vector<4x64xbf16>, vector<4x64xbf16>, vector<4x64xbf16> -> vector<12x64xbf16>
    %cst_16 = arith.constant dense<0.000000e+00> : vector<8x64xf32>
    %38 = tpu.matmul %33, %37, %cst_16 {dimension_numbers = #tpu.dot_dimension_numbers<[1], [0], [0], [1], [0, 0, 1, 1], [], []>} : vector<8x12xbf16>, vector<12x64xbf16>, vector<8x64xf32> -> vector<8x64xf32>
    %c1 = arith.constant 1 : index
    %c0_17 = arith.constant 0 : index
    %c0_18 = arith.constant 0 : index
    %39 = vector.load %arg2[%c1, %c0_17, %c0_18] : memref<3x8x12xbf16, #tpu.memory_space<vmem>>, vector<1x8x12xbf16>
    %40 = vector.shape_cast %39 : vector<1x8x12xbf16> to vector<8x12xbf16>
    %c0_19 = arith.constant 0 : index
    %c120 = arith.constant 120 : index
    %41 = vector.load %arg7[%c0_19, %c120] : memref<8x320xbf16, #tpu.memory_space<vmem>>, vector<4x64xbf16>
    %c0_20 = arith.constant 0 : index
    %c128_21 = arith.constant 128 : index
    %42 = vector.load %arg7[%c0_20, %c128_21] : memref<8x320xbf16, #tpu.memory_space<vmem>>, vector<4x64xbf16>
    %c0_22 = arith.constant 0 : index
    %c136 = arith.constant 136 : index
    %43 = vector.load %arg7[%c0_22, %c136] : memref<8x320xbf16, #tpu.memory_space<vmem>>, vector<4x64xbf16>
    %44 = tpu.concatenate %41, %42, %43 in 0 : vector<4x64xbf16>, vector<4x64xbf16>, vector<4x64xbf16> -> vector<12x64xbf16>
    %cst_23 = arith.constant dense<0.000000e+00> : vector<8x64xf32>
    %45 = tpu.matmul %40, %44, %cst_23 {dimension_numbers = #tpu.dot_dimension_numbers<[1], [0], [0], [1], [0, 0, 1, 1], [], []>} : vector<8x12xbf16>, vector<12x64xbf16>, vector<8x64xf32> -> vector<8x64xf32>
    %c2 = arith.constant 2 : index
    %c0_24 = arith.constant 0 : index
    %c0_25 = arith.constant 0 : index
    %46 = vector.load %arg2[%c2, %c0_24, %c0_25] : memref<3x8x12xbf16, #tpu.memory_space<vmem>>, vector<1x8x12xbf16>
    %47 = vector.shape_cast %46 : vector<1x8x12xbf16> to vector<8x12xbf16>
    %c0_26 = arith.constant 0 : index
    %c121 = arith.constant 121 : index
    %48 = vector.load %arg7[%c0_26, %c121] : memref<8x320xbf16, #tpu.memory_space<vmem>>, vector<4x64xbf16>
    %c0_27 = arith.constant 0 : index
    %c129 = arith.constant 129 : index
    %49 = vector.load %arg7[%c0_27, %c129] : memref<8x320xbf16, #tpu.memory_space<vmem>>, vector<4x64xbf16>
    %c0_28 = arith.constant 0 : index
    %c137 = arith.constant 137 : index
    %50 = vector.load %arg7[%c0_28, %c137] : memref<8x320xbf16, #tpu.memory_space<vmem>>, vector<4x64xbf16>
    %51 = tpu.concatenate %48, %49, %50 in 0 : vector<4x64xbf16>, vector<4x64xbf16>, vector<4x64xbf16> -> vector<12x64xbf16>
    %cst_29 = arith.constant dense<0.000000e+00> : vector<8x64xf32>
    %52 = tpu.matmul %47, %51, %cst_29 {dimension_numbers = #tpu.dot_dimension_numbers<[1], [0], [0], [1], [0, 0, 1, 1], [], []>} : vector<8x12xbf16>, vector<12x64xbf16>, vector<8x64xf32> -> vector<8x64xf32>
    %53 = vector.broadcast %20 : vector<1x64xf32> to vector<8x64xf32>
    %54 = arith.mulf %38, %53 : vector<8x64xf32>
    %55 = arith.addf %45, %54 : vector<8x64xf32>
    %56 = vector.broadcast %24 : vector<1x64xf32> to vector<8x64xf32>
    %57 = arith.mulf %52, %56 : vector<8x64xf32>
    %58 = arith.addf %55, %57 : vector<8x64xf32>
    %c0_30 = arith.constant 0 : index
    %c0_31 = arith.constant 0 : index
    %59 = vector.load %arg3[%c0_30, %c0_31] : memref<8x1xf32, #tpu.memory_space<vmem>>, vector<8x1xf32>
    %60 = vector.broadcast %59 : vector<8x1xf32> to vector<8x64xf32>
    %61 = arith.addf %58, %60 : vector<8x64xf32>
    %cst_32 = arith.constant dense<0.000000e+00> : vector<8xf32>
    %62 = vector.multi_reduction <add>, %61, %cst_32 [1] : vector<8x64xf32> to vector<8xf32>
    %63 = vector.shape_cast %62 : vector<8xf32> to vector<8x1xf32>
    %cst_33 = arith.constant 6.400000e+01 : f32
    %64 = vector.broadcast %cst_33 : f32 to vector<8x1xf32>
    %65 = arith.divf %63, %64 : vector<8x1xf32>
    %66 = arith.mulf %61, %61 : vector<8x64xf32>
    %cst_34 = arith.constant dense<0.000000e+00> : vector<8xf32>
    %67 = vector.multi_reduction <add>, %66, %cst_34 [1] : vector<8x64xf32> to vector<8xf32>
    %68 = vector.shape_cast %67 : vector<8xf32> to vector<8x1xf32>
    %cst_35 = arith.constant 6.400000e+01 : f32
    %69 = vector.broadcast %cst_35 : f32 to vector<8x1xf32>
    %70 = arith.divf %68, %69 : vector<8x1xf32>
    %71 = arith.mulf %65, %65 : vector<8x1xf32>
    %72 = arith.subf %70, %71 : vector<8x1xf32>
    %cst_36 = arith.constant 0.000000e+00 : f32
    %73 = vector.broadcast %cst_36 : f32 to vector<8x1xf32>
    %74 = arith.maximumf %72, %73 : vector<8x1xf32>
    %75 = vector.broadcast %65 : vector<8x1xf32> to vector<8x64xf32>
    %76 = arith.subf %61, %75 : vector<8x64xf32>
    %cst_37 = arith.constant 9.99999974E-6 : f32
    %77 = vector.broadcast %cst_37 : f32 to vector<8x1xf32>
    %78 = arith.addf %74, %77 : vector<8x1xf32>
    %79 = math.rsqrt %78 : vector<8x1xf32>
    %80 = vector.broadcast %79 : vector<8x1xf32> to vector<8x64xf32>
    %81 = arith.mulf %76, %80 : vector<8x64xf32>
    %cst_38 = arith.constant 0.000000e+00 : f32
    %82 = vector.broadcast %cst_38 : f32 to vector<8x64xf32>
    %83 = arith.maximumf %81, %82 : vector<8x64xf32>
    %84 = arith.truncf %83 : vector<8x64xf32> to vector<8x64xbf16>
    %c0_39 = arith.constant 0 : index
    %c128_40 = arith.constant 128 : index
    %85 = vector.load %arg7[%c0_39, %c128_40] : memref<8x320xbf16, #tpu.memory_space<vmem>>, vector<8x64xbf16>
    tpu.vector_store %arg7[%c0_39, %c128_40], %84 {strides = array<i32>} : memref<8x320xbf16, #tpu.memory_space<vmem>>, vector<8x64xbf16>,
    %c0_41 = arith.constant 0 : index
    %c0_42 = arith.constant 0 : index
    %c0_43 = arith.constant 0 : index
    %86 = vector.load %arg4[%c0_41, %c0_42, %c0_43] : memref<3x8x24xbf16, #tpu.memory_space<vmem>>, vector<1x8x24xbf16>
    %87 = vector.shape_cast %86 : vector<1x8x24xbf16> to vector<8x24xbf16>
    %c0_44 = arith.constant 0 : index
    %c119_45 = arith.constant 119 : index
    %88 = vector.load %arg7[%c0_44, %c119_45] : memref<8x320xbf16, #tpu.memory_space<vmem>>, vector<8x64xbf16>
    %c0_46 = arith.constant 0 : index
    %c127_47 = arith.constant 127 : index
    %89 = vector.load %arg7[%c0_46, %c127_47] : memref<8x320xbf16, #tpu.memory_space<vmem>>, vector<8x64xbf16>
    %c0_48 = arith.constant 0 : index
    %c135_49 = arith.constant 135 : index
    %90 = vector.load %arg7[%c0_48, %c135_49] : memref<8x320xbf16, #tpu.memory_space<vmem>>, vector<8x64xbf16>
    %91 = tpu.concatenate %88, %89, %90 in 0 : vector<8x64xbf16>, vector<8x64xbf16>, vector<8x64xbf16> -> vector<24x64xbf16>
    %cst_50 = arith.constant dense<0.000000e+00> : vector<8x64xf32>
    %92 = tpu.matmul %87, %91, %cst_50 {dimension_numbers = #tpu.dot_dimension_numbers<[1], [0], [0], [1], [0, 0, 1, 1], [], []>} : vector<8x24xbf16>, vector<24x64xbf16>, vector<8x64xf32> -> vector<8x64xf32>
    %c1_51 = arith.constant 1 : index
    %c0_52 = arith.constant 0 : index
    %c0_53 = arith.constant 0 : index
    %93 = vector.load %arg4[%c1_51, %c0_52, %c0_53] : memref<3x8x24xbf16, #tpu.memory_space<vmem>>, vector<1x8x24xbf16>
    %94 = vector.shape_cast %93 : vector<1x8x24xbf16> to vector<8x24xbf16>
    %c0_54 = arith.constant 0 : index
    %c120_55 = arith.constant 120 : index
    %95 = vector.load %arg7[%c0_54, %c120_55] : memref<8x320xbf16, #tpu.memory_space<vmem>>, vector<8x64xbf16>
    %c0_56 = arith.constant 0 : index
    %c128_57 = arith.constant 128 : index
    %96 = vector.load %arg7[%c0_56, %c128_57] : memref<8x320xbf16, #tpu.memory_space<vmem>>, vector<8x64xbf16>
    %c0_58 = arith.constant 0 : index
    %c136_59 = arith.constant 136 : index
    %97 = vector.load %arg7[%c0_58, %c136_59] : memref<8x320xbf16, #tpu.memory_space<vmem>>, vector<8x64xbf16>
    %98 = tpu.concatenate %95, %96, %97 in 0 : vector<8x64xbf16>, vector<8x64xbf16>, vector<8x64xbf16> -> vector<24x64xbf16>
    %cst_60 = arith.constant dense<0.000000e+00> : vector<8x64xf32>
    %99 = tpu.matmul %94, %98, %cst_60 {dimension_numbers = #tpu.dot_dimension_numbers<[1], [0], [0], [1], [0, 0, 1, 1], [], []>} : vector<8x24xbf16>, vector<24x64xbf16>, vector<8x64xf32> -> vector<8x64xf32>
    %c2_61 = arith.constant 2 : index
    %c0_62 = arith.constant 0 : index
    %c0_63 = arith.constant 0 : index
    %100 = vector.load %arg4[%c2_61, %c0_62, %c0_63] : memref<3x8x24xbf16, #tpu.memory_space<vmem>>, vector<1x8x24xbf16>
    %101 = vector.shape_cast %100 : vector<1x8x24xbf16> to vector<8x24xbf16>
    %c0_64 = arith.constant 0 : index
    %c121_65 = arith.constant 121 : index
    %102 = vector.load %arg7[%c0_64, %c121_65] : memref<8x320xbf16, #tpu.memory_space<vmem>>, vector<8x64xbf16>
    %c0_66 = arith.constant 0 : index
    %c129_67 = arith.constant 129 : index
    %103 = vector.load %arg7[%c0_66, %c129_67] : memref<8x320xbf16, #tpu.memory_space<vmem>>, vector<8x64xbf16>
    %c0_68 = arith.constant 0 : index
    %c137_69 = arith.constant 137 : index
    %104 = vector.load %arg7[%c0_68, %c137_69] : memref<8x320xbf16, #tpu.memory_space<vmem>>, vector<8x64xbf16>
    %105 = tpu.concatenate %102, %103, %104 in 0 : vector<8x64xbf16>, vector<8x64xbf16>, vector<8x64xbf16> -> vector<24x64xbf16>
    %cst_70 = arith.constant dense<0.000000e+00> : vector<8x64xf32>
    %106 = tpu.matmul %101, %105, %cst_70 {dimension_numbers = #tpu.dot_dimension_numbers<[1], [0], [0], [1], [0, 0, 1, 1], [], []>} : vector<8x24xbf16>, vector<24x64xbf16>, vector<8x64xf32> -> vector<8x64xf32>
    %107 = vector.broadcast %20 : vector<1x64xf32> to vector<8x64xf32>
    %108 = arith.mulf %92, %107 : vector<8x64xf32>
    %109 = arith.addf %99, %108 : vector<8x64xf32>
    %110 = vector.broadcast %24 : vector<1x64xf32> to vector<8x64xf32>
    %111 = arith.mulf %106, %110 : vector<8x64xf32>
    %112 = arith.addf %109, %111 : vector<8x64xf32>
    %c0_71 = arith.constant 0 : index
    %c0_72 = arith.constant 0 : index
    %113 = vector.load %arg5[%c0_71, %c0_72] : memref<8x1xf32, #tpu.memory_space<vmem>>, vector<8x1xf32>
    %114 = vector.broadcast %113 : vector<8x1xf32> to vector<8x64xf32>
    %115 = arith.addf %112, %114 : vector<8x64xf32>
    %cst_73 = arith.constant dense<0.000000e+00> : vector<8xf32>
    %116 = vector.multi_reduction <add>, %115, %cst_73 [1] : vector<8x64xf32> to vector<8xf32>
    %117 = vector.shape_cast %116 : vector<8xf32> to vector<8x1xf32>
    %cst_74 = arith.constant 6.400000e+01 : f32
    %118 = vector.broadcast %cst_74 : f32 to vector<8x1xf32>
    %119 = arith.divf %117, %118 : vector<8x1xf32>
    %120 = arith.mulf %115, %115 : vector<8x64xf32>
    %cst_75 = arith.constant dense<0.000000e+00> : vector<8xf32>
    %121 = vector.multi_reduction <add>, %120, %cst_75 [1] : vector<8x64xf32> to vector<8xf32>
    %122 = vector.shape_cast %121 : vector<8xf32> to vector<8x1xf32>
    %cst_76 = arith.constant 6.400000e+01 : f32
    %123 = vector.broadcast %cst_76 : f32 to vector<8x1xf32>
    %124 = arith.divf %122, %123 : vector<8x1xf32>
    %125 = arith.mulf %119, %119 : vector<8x1xf32>
    %126 = arith.subf %124, %125 : vector<8x1xf32>
    %cst_77 = arith.constant 0.000000e+00 : f32
    %127 = vector.broadcast %cst_77 : f32 to vector<8x1xf32>
    %128 = arith.maximumf %126, %127 : vector<8x1xf32>
    %129 = vector.broadcast %119 : vector<8x1xf32> to vector<8x64xf32>
    %130 = arith.subf %115, %129 : vector<8x64xf32>
    %cst_78 = arith.constant 9.99999974E-6 : f32
    %131 = vector.broadcast %cst_78 : f32 to vector<8x1xf32>
    %132 = arith.addf %128, %131 : vector<8x1xf32>
    %133 = math.rsqrt %132 : vector<8x1xf32>
    %134 = vector.broadcast %133 : vector<8x1xf32> to vector<8x64xf32>
    %135 = arith.mulf %130, %134 : vector<8x64xf32>
    %cst_79 = arith.constant 0.000000e+00 : f32
    %136 = vector.broadcast %cst_79 : f32 to vector<8x64xf32>
    %137 = arith.maximumf %135, %136 : vector<8x64xf32>
    %c0_80 = arith.constant 0 : index
    %c0_81 = arith.constant 0 : index
    %c0_82 = arith.constant 0 : index
    %138 = vector.load %arg6[%c0_80, %c0_81, %c0_82] : memref<1x8x64xf32, #tpu.memory_space<vmem>>, vector<1x8x64xf32>
    %139 = vector.shape_cast %138 : vector<1x8x64xf32> to vector<8x64xf32>
    %140 = vector.shape_cast %137 : vector<8x64xf32> to vector<1x8x64xf32>
    tpu.vector_store %arg6[%c0_80, %c0_81, %c0_82], %140 {strides = array<i32>} : memref<1x8x64xf32, #tpu.memory_space<vmem>>, vector<1x8x64xf32>,
    return
  }
  func.func @transform_0(%arg0: i32) -> (i32, i32, i32) {
    %c0_i32 = arith.constant 0 : i32
    %c0_i32_0 = arith.constant 0 : i32
    %c0_i32_1 = arith.constant 0 : i32
    return %arg0, %c0_i32, %c0_i32_0 : i32, i32, i32
  }
  func.func @transform_1(%arg0: i32) -> (i32, i32, i32) {
    %c0_i32 = arith.constant 0 : i32
    %c0_i32_0 = arith.constant 0 : i32
    %c0_i32_1 = arith.constant 0 : i32
    %c0_i32_2 = arith.constant 0 : i32
    return %c0_i32, %c0_i32_0, %c0_i32_1 : i32, i32, i32
  }
  func.func @transform_2(%arg0: i32) -> (i32, i32) {
    %c0_i32 = arith.constant 0 : i32
    %c0_i32_0 = arith.constant 0 : i32
    %c0_i32_1 = arith.constant 0 : i32
    return %c0_i32, %c0_i32_0 : i32, i32
  }
  func.func @transform_3(%arg0: i32) -> (i32, i32, i32) {
    %c0_i32 = arith.constant 0 : i32
    %c0_i32_0 = arith.constant 0 : i32
    %c0_i32_1 = arith.constant 0 : i32
    %c0_i32_2 = arith.constant 0 : i32
    return %c0_i32, %c0_i32_0, %c0_i32_1 : i32, i32, i32
  }
  func.func @transform_4(%arg0: i32) -> (i32, i32) {
    %c0_i32 = arith.constant 0 : i32
    %c0_i32_0 = arith.constant 0 : i32
    %c0_i32_1 = arith.constant 0 : i32
    return %c0_i32, %c0_i32_0 : i32, i32
  }
  func.func @transform_5(%arg0: i32) -> (i32, i32, i32) {
    %c0_i32 = arith.constant 0 : i32
    %c0_i32_0 = arith.constant 0 : i32
    %c0_i32_1 = arith.constant 0 : i32
    return %arg0, %c0_i32, %c0_i32_0 : i32, i32, i32
  }
}

module attributes {stable_mosaic.version = 11 : i64} {
  func.func @_conv_block_kernel(%arg0: i32, %arg1: memref<1x8x16xf32, #tpu.memory_space<vmem>>, %arg2: memref<3x8x24xbf16, #tpu.memory_space<vmem>>, %arg3: memref<8x1xf32, #tpu.memory_space<vmem>>, %arg4: memref<3x8x24xbf16, #tpu.memory_space<vmem>>, %arg5: memref<8x1xf32, #tpu.memory_space<vmem>>, %arg6: memref<1x8x16xf32, #tpu.memory_space<vmem>>, %arg7: memref<8x272xbf16, #tpu.memory_space<vmem>>) attributes {dimension_semantics = [#tpu.dimension_semantics<parallel>], iteration_bounds = array<i64: 2>, scalar_prefetch = 0 : i64, scratch_operands = 1 : i64, tpu.core_type = #tpu.core_type<tc>, window_params = [{transform_indices = @transform_0, window_bounds = array<i64: 1, 8, 16>}, {pipeline_mode = #tpu.pipeline_mode<synchronous>, transform_indices = @transform_1, window_bounds = array<i64: 3, 8, 24>}, {pipeline_mode = #tpu.pipeline_mode<synchronous>, transform_indices = @transform_2, window_bounds = array<i64: 8, 1>}, {pipeline_mode = #tpu.pipeline_mode<synchronous>, transform_indices = @transform_3, window_bounds = array<i64: 3, 8, 24>}, {pipeline_mode = #tpu.pipeline_mode<synchronous>, transform_indices = @transform_4, window_bounds = array<i64: 8, 1>}, {transform_indices = @transform_5, window_bounds = array<i64: 1, 8, 16>}]} {
    %0 = tpu.iota {dimensions = array<i32: 1>} : vector<1x16xi32>
    %c4_i32 = arith.constant 4 : i32
    %c0_i32 = arith.constant 0 : i32
    %1 = arith.cmpi eq, %c4_i32, %c0_i32 : i32
    %c1_i32 = arith.constant 1 : i32
    %2 = arith.select %1, %c1_i32, %c4_i32 : i32
    %3 = vector.broadcast %2 : i32 to vector<1x16xi32>
    %4 = arith.remsi %0, %3 : vector<1x16xi32>
    %c0_i32_0 = arith.constant 0 : i32
    %5 = vector.broadcast %c0_i32_0 : i32 to vector<1x16xi32>
    %6 = arith.cmpi ne, %4, %5 : vector<1x16xi32>
    %c0_i32_1 = arith.constant 0 : i32
    %7 = vector.broadcast %c0_i32_1 : i32 to vector<1x16xi32>
    %8 = arith.cmpi slt, %4, %7 : vector<1x16xi32>
    %c0_i32_2 = arith.constant 0 : i32
    %9 = arith.cmpi slt, %2, %c0_i32_2 : i32
    %10 = vector.broadcast %9 : i1 to vector<1x16xi1>
    %11 = vector.broadcast %10 : vector<1x16xi1> to vector<1x16xi1>
    %12 = arith.xori %8, %11 : vector<1x16xi1>
    %13 = arith.andi %12, %6 : vector<1x16xi1>
    %14 = vector.broadcast %2 : i32 to vector<1x16xi32>
    %15 = arith.addi %4, %14 : vector<1x16xi32>
    %16 = arith.select %13, %15, %4 : vector<1x16xi1>, vector<1x16xi32>
    %c0_i32_3 = arith.constant 0 : i32
    %17 = vector.broadcast %c0_i32_3 : i32 to vector<1x16xi32>
    %18 = arith.cmpi sgt, %16, %17 : vector<1x16xi32>
    %19 = arith.extui %18 : vector<1x16xi1> to vector<1x16xi32>
    %20 = arith.sitofp %19 : vector<1x16xi32> to vector<1x16xf32>
    %c3_i32 = arith.constant 3 : i32
    %21 = vector.broadcast %c3_i32 : i32 to vector<1x16xi32>
    %22 = arith.cmpi slt, %16, %21 : vector<1x16xi32>
    %23 = arith.extui %22 : vector<1x16xi1> to vector<1x16xi32>
    %24 = arith.sitofp %23 : vector<1x16xi32> to vector<1x16xf32>
    %cst = arith.constant 0.000000e+00 : bf16
    %25 = vector.broadcast %cst : bf16 to vector<8x128xbf16>
    %c0 = arith.constant 0 : index
    %c0_4 = arith.constant 0 : index
    %26 = vector.load %arg7[%c0, %c0_4] : memref<8x272xbf16, #tpu.memory_space<vmem>>, vector<8x128xbf16>
    tpu.vector_store %arg7[%c0, %c0_4], %25 {strides = array<i32>} : memref<8x272xbf16, #tpu.memory_space<vmem>>, vector<8x128xbf16>,
    %c0_5 = arith.constant 0 : index
    %c144 = arith.constant 144 : index
    %27 = vector.load %arg7[%c0_5, %c144] : memref<8x272xbf16, #tpu.memory_space<vmem>>, vector<8x128xbf16>
    tpu.vector_store %arg7[%c0_5, %c144], %25 {strides = array<i32>} : memref<8x272xbf16, #tpu.memory_space<vmem>>, vector<8x128xbf16>,
    %c0_6 = arith.constant 0 : index
    %c0_7 = arith.constant 0 : index
    %c0_8 = arith.constant 0 : index
    %28 = vector.load %arg1[%c0_6, %c0_7, %c0_8] : memref<1x8x16xf32, #tpu.memory_space<vmem>>, vector<1x8x16xf32>
    %29 = vector.shape_cast %28 : vector<1x8x16xf32> to vector<8x16xf32>
    %30 = arith.truncf %29 : vector<8x16xf32> to vector<8x16xbf16>
    %c0_9 = arith.constant 0 : index
    %c128 = arith.constant 128 : index
    %31 = vector.load %arg7[%c0_9, %c128] : memref<8x272xbf16, #tpu.memory_space<vmem>>, vector<8x16xbf16>
    tpu.vector_store %arg7[%c0_9, %c128], %30 {strides = array<i32>} : memref<8x272xbf16, #tpu.memory_space<vmem>>, vector<8x16xbf16>,
    %c0_10 = arith.constant 0 : index
    %c0_11 = arith.constant 0 : index
    %c0_12 = arith.constant 0 : index
    %32 = vector.load %arg2[%c0_10, %c0_11, %c0_12] : memref<3x8x24xbf16, #tpu.memory_space<vmem>>, vector<1x8x24xbf16>
    %33 = vector.shape_cast %32 : vector<1x8x24xbf16> to vector<8x24xbf16>
    %c0_13 = arith.constant 0 : index
    %c123 = arith.constant 123 : index
    %34 = vector.load %arg7[%c0_13, %c123] : memref<8x272xbf16, #tpu.memory_space<vmem>>, vector<8x16xbf16>
    %c0_14 = arith.constant 0 : index
    %c127 = arith.constant 127 : index
    %35 = vector.load %arg7[%c0_14, %c127] : memref<8x272xbf16, #tpu.memory_space<vmem>>, vector<8x16xbf16>
    %c0_15 = arith.constant 0 : index
    %c131 = arith.constant 131 : index
    %36 = vector.load %arg7[%c0_15, %c131] : memref<8x272xbf16, #tpu.memory_space<vmem>>, vector<8x16xbf16>
    %37 = tpu.concatenate %34, %35, %36 in 0 : vector<8x16xbf16>, vector<8x16xbf16>, vector<8x16xbf16> -> vector<24x16xbf16>
    %cst_16 = arith.constant dense<0.000000e+00> : vector<8x16xf32>
    %38 = tpu.matmul %33, %37, %cst_16 {dimension_numbers = #tpu.dot_dimension_numbers<[1], [0], [0], [1], [0, 0, 1, 1], [], []>} : vector<8x24xbf16>, vector<24x16xbf16>, vector<8x16xf32> -> vector<8x16xf32>
    %c1 = arith.constant 1 : index
    %c0_17 = arith.constant 0 : index
    %c0_18 = arith.constant 0 : index
    %39 = vector.load %arg2[%c1, %c0_17, %c0_18] : memref<3x8x24xbf16, #tpu.memory_space<vmem>>, vector<1x8x24xbf16>
    %40 = vector.shape_cast %39 : vector<1x8x24xbf16> to vector<8x24xbf16>
    %c0_19 = arith.constant 0 : index
    %c124 = arith.constant 124 : index
    %41 = vector.load %arg7[%c0_19, %c124] : memref<8x272xbf16, #tpu.memory_space<vmem>>, vector<8x16xbf16>
    %c0_20 = arith.constant 0 : index
    %c128_21 = arith.constant 128 : index
    %42 = vector.load %arg7[%c0_20, %c128_21] : memref<8x272xbf16, #tpu.memory_space<vmem>>, vector<8x16xbf16>
    %c0_22 = arith.constant 0 : index
    %c132 = arith.constant 132 : index
    %43 = vector.load %arg7[%c0_22, %c132] : memref<8x272xbf16, #tpu.memory_space<vmem>>, vector<8x16xbf16>
    %44 = tpu.concatenate %41, %42, %43 in 0 : vector<8x16xbf16>, vector<8x16xbf16>, vector<8x16xbf16> -> vector<24x16xbf16>
    %cst_23 = arith.constant dense<0.000000e+00> : vector<8x16xf32>
    %45 = tpu.matmul %40, %44, %cst_23 {dimension_numbers = #tpu.dot_dimension_numbers<[1], [0], [0], [1], [0, 0, 1, 1], [], []>} : vector<8x24xbf16>, vector<24x16xbf16>, vector<8x16xf32> -> vector<8x16xf32>
    %c2 = arith.constant 2 : index
    %c0_24 = arith.constant 0 : index
    %c0_25 = arith.constant 0 : index
    %46 = vector.load %arg2[%c2, %c0_24, %c0_25] : memref<3x8x24xbf16, #tpu.memory_space<vmem>>, vector<1x8x24xbf16>
    %47 = vector.shape_cast %46 : vector<1x8x24xbf16> to vector<8x24xbf16>
    %c0_26 = arith.constant 0 : index
    %c125 = arith.constant 125 : index
    %48 = vector.load %arg7[%c0_26, %c125] : memref<8x272xbf16, #tpu.memory_space<vmem>>, vector<8x16xbf16>
    %c0_27 = arith.constant 0 : index
    %c129 = arith.constant 129 : index
    %49 = vector.load %arg7[%c0_27, %c129] : memref<8x272xbf16, #tpu.memory_space<vmem>>, vector<8x16xbf16>
    %c0_28 = arith.constant 0 : index
    %c133 = arith.constant 133 : index
    %50 = vector.load %arg7[%c0_28, %c133] : memref<8x272xbf16, #tpu.memory_space<vmem>>, vector<8x16xbf16>
    %51 = tpu.concatenate %48, %49, %50 in 0 : vector<8x16xbf16>, vector<8x16xbf16>, vector<8x16xbf16> -> vector<24x16xbf16>
    %cst_29 = arith.constant dense<0.000000e+00> : vector<8x16xf32>
    %52 = tpu.matmul %47, %51, %cst_29 {dimension_numbers = #tpu.dot_dimension_numbers<[1], [0], [0], [1], [0, 0, 1, 1], [], []>} : vector<8x24xbf16>, vector<24x16xbf16>, vector<8x16xf32> -> vector<8x16xf32>
    %53 = vector.broadcast %20 : vector<1x16xf32> to vector<8x16xf32>
    %54 = arith.mulf %38, %53 : vector<8x16xf32>
    %55 = arith.addf %45, %54 : vector<8x16xf32>
    %56 = vector.broadcast %24 : vector<1x16xf32> to vector<8x16xf32>
    %57 = arith.mulf %52, %56 : vector<8x16xf32>
    %58 = arith.addf %55, %57 : vector<8x16xf32>
    %c0_30 = arith.constant 0 : index
    %c0_31 = arith.constant 0 : index
    %59 = vector.load %arg3[%c0_30, %c0_31] : memref<8x1xf32, #tpu.memory_space<vmem>>, vector<8x1xf32>
    %60 = vector.broadcast %59 : vector<8x1xf32> to vector<8x16xf32>
    %61 = arith.addf %58, %60 : vector<8x16xf32>
    %cst_32 = arith.constant dense<0.000000e+00> : vector<8xf32>
    %62 = vector.multi_reduction <add>, %61, %cst_32 [1] : vector<8x16xf32> to vector<8xf32>
    %63 = vector.shape_cast %62 : vector<8xf32> to vector<8x1xf32>
    %cst_33 = arith.constant 1.600000e+01 : f32
    %64 = vector.broadcast %cst_33 : f32 to vector<8x1xf32>
    %65 = arith.divf %63, %64 : vector<8x1xf32>
    %66 = arith.mulf %61, %61 : vector<8x16xf32>
    %cst_34 = arith.constant dense<0.000000e+00> : vector<8xf32>
    %67 = vector.multi_reduction <add>, %66, %cst_34 [1] : vector<8x16xf32> to vector<8xf32>
    %68 = vector.shape_cast %67 : vector<8xf32> to vector<8x1xf32>
    %cst_35 = arith.constant 1.600000e+01 : f32
    %69 = vector.broadcast %cst_35 : f32 to vector<8x1xf32>
    %70 = arith.divf %68, %69 : vector<8x1xf32>
    %71 = arith.mulf %65, %65 : vector<8x1xf32>
    %72 = arith.subf %70, %71 : vector<8x1xf32>
    %cst_36 = arith.constant 0.000000e+00 : f32
    %73 = vector.broadcast %cst_36 : f32 to vector<8x1xf32>
    %74 = arith.maximumf %72, %73 : vector<8x1xf32>
    %75 = vector.broadcast %65 : vector<8x1xf32> to vector<8x16xf32>
    %76 = arith.subf %61, %75 : vector<8x16xf32>
    %cst_37 = arith.constant 9.99999974E-6 : f32
    %77 = vector.broadcast %cst_37 : f32 to vector<8x1xf32>
    %78 = arith.addf %74, %77 : vector<8x1xf32>
    %79 = math.rsqrt %78 : vector<8x1xf32>
    %80 = vector.broadcast %79 : vector<8x1xf32> to vector<8x16xf32>
    %81 = arith.mulf %76, %80 : vector<8x16xf32>
    %cst_38 = arith.constant 0.000000e+00 : f32
    %82 = vector.broadcast %cst_38 : f32 to vector<8x16xf32>
    %83 = arith.maximumf %81, %82 : vector<8x16xf32>
    %84 = arith.truncf %83 : vector<8x16xf32> to vector<8x16xbf16>
    %c0_39 = arith.constant 0 : index
    %c128_40 = arith.constant 128 : index
    %85 = vector.load %arg7[%c0_39, %c128_40] : memref<8x272xbf16, #tpu.memory_space<vmem>>, vector<8x16xbf16>
    tpu.vector_store %arg7[%c0_39, %c128_40], %84 {strides = array<i32>} : memref<8x272xbf16, #tpu.memory_space<vmem>>, vector<8x16xbf16>,
    %c0_41 = arith.constant 0 : index
    %c0_42 = arith.constant 0 : index
    %c0_43 = arith.constant 0 : index
    %86 = vector.load %arg4[%c0_41, %c0_42, %c0_43] : memref<3x8x24xbf16, #tpu.memory_space<vmem>>, vector<1x8x24xbf16>
    %87 = vector.shape_cast %86 : vector<1x8x24xbf16> to vector<8x24xbf16>
    %c0_44 = arith.constant 0 : index
    %c123_45 = arith.constant 123 : index
    %88 = vector.load %arg7[%c0_44, %c123_45] : memref<8x272xbf16, #tpu.memory_space<vmem>>, vector<8x16xbf16>
    %c0_46 = arith.constant 0 : index
    %c127_47 = arith.constant 127 : index
    %89 = vector.load %arg7[%c0_46, %c127_47] : memref<8x272xbf16, #tpu.memory_space<vmem>>, vector<8x16xbf16>
    %c0_48 = arith.constant 0 : index
    %c131_49 = arith.constant 131 : index
    %90 = vector.load %arg7[%c0_48, %c131_49] : memref<8x272xbf16, #tpu.memory_space<vmem>>, vector<8x16xbf16>
    %91 = tpu.concatenate %88, %89, %90 in 0 : vector<8x16xbf16>, vector<8x16xbf16>, vector<8x16xbf16> -> vector<24x16xbf16>
    %cst_50 = arith.constant dense<0.000000e+00> : vector<8x16xf32>
    %92 = tpu.matmul %87, %91, %cst_50 {dimension_numbers = #tpu.dot_dimension_numbers<[1], [0], [0], [1], [0, 0, 1, 1], [], []>} : vector<8x24xbf16>, vector<24x16xbf16>, vector<8x16xf32> -> vector<8x16xf32>
    %c1_51 = arith.constant 1 : index
    %c0_52 = arith.constant 0 : index
    %c0_53 = arith.constant 0 : index
    %93 = vector.load %arg4[%c1_51, %c0_52, %c0_53] : memref<3x8x24xbf16, #tpu.memory_space<vmem>>, vector<1x8x24xbf16>
    %94 = vector.shape_cast %93 : vector<1x8x24xbf16> to vector<8x24xbf16>
    %c0_54 = arith.constant 0 : index
    %c124_55 = arith.constant 124 : index
    %95 = vector.load %arg7[%c0_54, %c124_55] : memref<8x272xbf16, #tpu.memory_space<vmem>>, vector<8x16xbf16>
    %c0_56 = arith.constant 0 : index
    %c128_57 = arith.constant 128 : index
    %96 = vector.load %arg7[%c0_56, %c128_57] : memref<8x272xbf16, #tpu.memory_space<vmem>>, vector<8x16xbf16>
    %c0_58 = arith.constant 0 : index
    %c132_59 = arith.constant 132 : index
    %97 = vector.load %arg7[%c0_58, %c132_59] : memref<8x272xbf16, #tpu.memory_space<vmem>>, vector<8x16xbf16>
    %98 = tpu.concatenate %95, %96, %97 in 0 : vector<8x16xbf16>, vector<8x16xbf16>, vector<8x16xbf16> -> vector<24x16xbf16>
    %cst_60 = arith.constant dense<0.000000e+00> : vector<8x16xf32>
    %99 = tpu.matmul %94, %98, %cst_60 {dimension_numbers = #tpu.dot_dimension_numbers<[1], [0], [0], [1], [0, 0, 1, 1], [], []>} : vector<8x24xbf16>, vector<24x16xbf16>, vector<8x16xf32> -> vector<8x16xf32>
    %c2_61 = arith.constant 2 : index
    %c0_62 = arith.constant 0 : index
    %c0_63 = arith.constant 0 : index
    %100 = vector.load %arg4[%c2_61, %c0_62, %c0_63] : memref<3x8x24xbf16, #tpu.memory_space<vmem>>, vector<1x8x24xbf16>
    %101 = vector.shape_cast %100 : vector<1x8x24xbf16> to vector<8x24xbf16>
    %c0_64 = arith.constant 0 : index
    %c125_65 = arith.constant 125 : index
    %102 = vector.load %arg7[%c0_64, %c125_65] : memref<8x272xbf16, #tpu.memory_space<vmem>>, vector<8x16xbf16>
    %c0_66 = arith.constant 0 : index
    %c129_67 = arith.constant 129 : index
    %103 = vector.load %arg7[%c0_66, %c129_67] : memref<8x272xbf16, #tpu.memory_space<vmem>>, vector<8x16xbf16>
    %c0_68 = arith.constant 0 : index
    %c133_69 = arith.constant 133 : index
    %104 = vector.load %arg7[%c0_68, %c133_69] : memref<8x272xbf16, #tpu.memory_space<vmem>>, vector<8x16xbf16>
    %105 = tpu.concatenate %102, %103, %104 in 0 : vector<8x16xbf16>, vector<8x16xbf16>, vector<8x16xbf16> -> vector<24x16xbf16>
    %cst_70 = arith.constant dense<0.000000e+00> : vector<8x16xf32>
    %106 = tpu.matmul %101, %105, %cst_70 {dimension_numbers = #tpu.dot_dimension_numbers<[1], [0], [0], [1], [0, 0, 1, 1], [], []>} : vector<8x24xbf16>, vector<24x16xbf16>, vector<8x16xf32> -> vector<8x16xf32>
    %107 = vector.broadcast %20 : vector<1x16xf32> to vector<8x16xf32>
    %108 = arith.mulf %92, %107 : vector<8x16xf32>
    %109 = arith.addf %99, %108 : vector<8x16xf32>
    %110 = vector.broadcast %24 : vector<1x16xf32> to vector<8x16xf32>
    %111 = arith.mulf %106, %110 : vector<8x16xf32>
    %112 = arith.addf %109, %111 : vector<8x16xf32>
    %c0_71 = arith.constant 0 : index
    %c0_72 = arith.constant 0 : index
    %113 = vector.load %arg5[%c0_71, %c0_72] : memref<8x1xf32, #tpu.memory_space<vmem>>, vector<8x1xf32>
    %114 = vector.broadcast %113 : vector<8x1xf32> to vector<8x16xf32>
    %115 = arith.addf %112, %114 : vector<8x16xf32>
    %cst_73 = arith.constant dense<0.000000e+00> : vector<8xf32>
    %116 = vector.multi_reduction <add>, %115, %cst_73 [1] : vector<8x16xf32> to vector<8xf32>
    %117 = vector.shape_cast %116 : vector<8xf32> to vector<8x1xf32>
    %cst_74 = arith.constant 1.600000e+01 : f32
    %118 = vector.broadcast %cst_74 : f32 to vector<8x1xf32>
    %119 = arith.divf %117, %118 : vector<8x1xf32>
    %120 = arith.mulf %115, %115 : vector<8x16xf32>
    %cst_75 = arith.constant dense<0.000000e+00> : vector<8xf32>
    %121 = vector.multi_reduction <add>, %120, %cst_75 [1] : vector<8x16xf32> to vector<8xf32>
    %122 = vector.shape_cast %121 : vector<8xf32> to vector<8x1xf32>
    %cst_76 = arith.constant 1.600000e+01 : f32
    %123 = vector.broadcast %cst_76 : f32 to vector<8x1xf32>
    %124 = arith.divf %122, %123 : vector<8x1xf32>
    %125 = arith.mulf %119, %119 : vector<8x1xf32>
    %126 = arith.subf %124, %125 : vector<8x1xf32>
    %cst_77 = arith.constant 0.000000e+00 : f32
    %127 = vector.broadcast %cst_77 : f32 to vector<8x1xf32>
    %128 = arith.maximumf %126, %127 : vector<8x1xf32>
    %129 = vector.broadcast %119 : vector<8x1xf32> to vector<8x16xf32>
    %130 = arith.subf %115, %129 : vector<8x16xf32>
    %cst_78 = arith.constant 9.99999974E-6 : f32
    %131 = vector.broadcast %cst_78 : f32 to vector<8x1xf32>
    %132 = arith.addf %128, %131 : vector<8x1xf32>
    %133 = math.rsqrt %132 : vector<8x1xf32>
    %134 = vector.broadcast %133 : vector<8x1xf32> to vector<8x16xf32>
    %135 = arith.mulf %130, %134 : vector<8x16xf32>
    %cst_79 = arith.constant 0.000000e+00 : f32
    %136 = vector.broadcast %cst_79 : f32 to vector<8x16xf32>
    %137 = arith.maximumf %135, %136 : vector<8x16xf32>
    %c0_80 = arith.constant 0 : index
    %c0_81 = arith.constant 0 : index
    %c0_82 = arith.constant 0 : index
    %138 = vector.load %arg6[%c0_80, %c0_81, %c0_82] : memref<1x8x16xf32, #tpu.memory_space<vmem>>, vector<1x8x16xf32>
    %139 = vector.shape_cast %138 : vector<1x8x16xf32> to vector<8x16xf32>
    %140 = vector.shape_cast %137 : vector<8x16xf32> to vector<1x8x16xf32>
    tpu.vector_store %arg6[%c0_80, %c0_81, %c0_82], %140 {strides = array<i32>} : memref<1x8x16xf32, #tpu.memory_space<vmem>>, vector<1x8x16xf32>,
    return
  }
  func.func @transform_0(%arg0: i32) -> (i32, i32, i32) {
    %c0_i32 = arith.constant 0 : i32
    %c0_i32_0 = arith.constant 0 : i32
    %c0_i32_1 = arith.constant 0 : i32
    return %arg0, %c0_i32, %c0_i32_0 : i32, i32, i32
  }
  func.func @transform_1(%arg0: i32) -> (i32, i32, i32) {
    %c0_i32 = arith.constant 0 : i32
    %c0_i32_0 = arith.constant 0 : i32
    %c0_i32_1 = arith.constant 0 : i32
    %c0_i32_2 = arith.constant 0 : i32
    return %c0_i32, %c0_i32_0, %c0_i32_1 : i32, i32, i32
  }
  func.func @transform_2(%arg0: i32) -> (i32, i32) {
    %c0_i32 = arith.constant 0 : i32
    %c0_i32_0 = arith.constant 0 : i32
    %c0_i32_1 = arith.constant 0 : i32
    return %c0_i32, %c0_i32_0 : i32, i32
  }
  func.func @transform_3(%arg0: i32) -> (i32, i32, i32) {
    %c0_i32 = arith.constant 0 : i32
    %c0_i32_0 = arith.constant 0 : i32
    %c0_i32_1 = arith.constant 0 : i32
    %c0_i32_2 = arith.constant 0 : i32
    return %c0_i32, %c0_i32_0, %c0_i32_1 : i32, i32, i32
  }
  func.func @transform_4(%arg0: i32) -> (i32, i32) {
    %c0_i32 = arith.constant 0 : i32
    %c0_i32_0 = arith.constant 0 : i32
    %c0_i32_1 = arith.constant 0 : i32
    return %c0_i32, %c0_i32_0 : i32, i32
  }
  func.func @transform_5(%arg0: i32) -> (i32, i32, i32) {
    %c0_i32 = arith.constant 0 : i32
    %c0_i32_0 = arith.constant 0 : i32
    %c0_i32_1 = arith.constant 0 : i32
    return %arg0, %c0_i32, %c0_i32_0 : i32, i32, i32
  }
}

module attributes {stable_mosaic.version = 11 : i64} {
  func.func @_conv_block_kernel(%arg0: i32, %arg1: memref<1x16x64xf32, #tpu.memory_space<vmem>>, %arg2: memref<3x4x48xbf16, #tpu.memory_space<vmem>>, %arg3: memref<4x1xf32, #tpu.memory_space<vmem>>, %arg4: memref<3x4x12xbf16, #tpu.memory_space<vmem>>, %arg5: memref<4x1xf32, #tpu.memory_space<vmem>>, %arg6: memref<1x4x64xf32, #tpu.memory_space<vmem>>, %arg7: memref<16x320xbf16, #tpu.memory_space<vmem>>) attributes {dimension_semantics = [#tpu.dimension_semantics<parallel>], iteration_bounds = array<i64: 2>, scalar_prefetch = 0 : i64, scratch_operands = 1 : i64, tpu.core_type = #tpu.core_type<tc>, window_params = [{transform_indices = @transform_0, window_bounds = array<i64: 1, 16, 64>}, {pipeline_mode = #tpu.pipeline_mode<synchronous>, transform_indices = @transform_1, window_bounds = array<i64: 3, 4, 48>}, {pipeline_mode = #tpu.pipeline_mode<synchronous>, transform_indices = @transform_2, window_bounds = array<i64: 4, 1>}, {pipeline_mode = #tpu.pipeline_mode<synchronous>, transform_indices = @transform_3, window_bounds = array<i64: 3, 4, 12>}, {pipeline_mode = #tpu.pipeline_mode<synchronous>, transform_indices = @transform_4, window_bounds = array<i64: 4, 1>}, {transform_indices = @transform_5, window_bounds = array<i64: 1, 4, 64>}]} {
    %0 = tpu.iota {dimensions = array<i32: 1>} : vector<1x64xi32>
    %c8_i32 = arith.constant 8 : i32
    %c0_i32 = arith.constant 0 : i32
    %1 = arith.cmpi eq, %c8_i32, %c0_i32 : i32
    %c1_i32 = arith.constant 1 : i32
    %2 = arith.select %1, %c1_i32, %c8_i32 : i32
    %3 = vector.broadcast %2 : i32 to vector<1x64xi32>
    %4 = arith.remsi %0, %3 : vector<1x64xi32>
    %c0_i32_0 = arith.constant 0 : i32
    %5 = vector.broadcast %c0_i32_0 : i32 to vector<1x64xi32>
    %6 = arith.cmpi ne, %4, %5 : vector<1x64xi32>
    %c0_i32_1 = arith.constant 0 : i32
    %7 = vector.broadcast %c0_i32_1 : i32 to vector<1x64xi32>
    %8 = arith.cmpi slt, %4, %7 : vector<1x64xi32>
    %c0_i32_2 = arith.constant 0 : i32
    %9 = arith.cmpi slt, %2, %c0_i32_2 : i32
    %10 = vector.broadcast %9 : i1 to vector<1x64xi1>
    %11 = vector.broadcast %10 : vector<1x64xi1> to vector<1x64xi1>
    %12 = arith.xori %8, %11 : vector<1x64xi1>
    %13 = arith.andi %12, %6 : vector<1x64xi1>
    %14 = vector.broadcast %2 : i32 to vector<1x64xi32>
    %15 = arith.addi %4, %14 : vector<1x64xi32>
    %16 = arith.select %13, %15, %4 : vector<1x64xi1>, vector<1x64xi32>
    %c0_i32_3 = arith.constant 0 : i32
    %17 = vector.broadcast %c0_i32_3 : i32 to vector<1x64xi32>
    %18 = arith.cmpi sgt, %16, %17 : vector<1x64xi32>
    %19 = arith.extui %18 : vector<1x64xi1> to vector<1x64xi32>
    %20 = arith.sitofp %19 : vector<1x64xi32> to vector<1x64xf32>
    %c7_i32 = arith.constant 7 : i32
    %21 = vector.broadcast %c7_i32 : i32 to vector<1x64xi32>
    %22 = arith.cmpi slt, %16, %21 : vector<1x64xi32>
    %23 = arith.extui %22 : vector<1x64xi1> to vector<1x64xi32>
    %24 = arith.sitofp %23 : vector<1x64xi32> to vector<1x64xf32>
    %cst = arith.constant 0.000000e+00 : bf16
    %25 = vector.broadcast %cst : bf16 to vector<16x128xbf16>
    %c0 = arith.constant 0 : index
    %c0_4 = arith.constant 0 : index
    %26 = vector.load %arg7[%c0, %c0_4] : memref<16x320xbf16, #tpu.memory_space<vmem>>, vector<16x128xbf16>
    tpu.vector_store %arg7[%c0, %c0_4], %25 {strides = array<i32>} : memref<16x320xbf16, #tpu.memory_space<vmem>>, vector<16x128xbf16>,
    %c0_5 = arith.constant 0 : index
    %c192 = arith.constant 192 : index
    %27 = vector.load %arg7[%c0_5, %c192] : memref<16x320xbf16, #tpu.memory_space<vmem>>, vector<16x128xbf16>
    tpu.vector_store %arg7[%c0_5, %c192], %25 {strides = array<i32>} : memref<16x320xbf16, #tpu.memory_space<vmem>>, vector<16x128xbf16>,
    %c0_6 = arith.constant 0 : index
    %c0_7 = arith.constant 0 : index
    %c0_8 = arith.constant 0 : index
    %28 = vector.load %arg1[%c0_6, %c0_7, %c0_8] : memref<1x16x64xf32, #tpu.memory_space<vmem>>, vector<1x16x64xf32>
    %29 = vector.shape_cast %28 : vector<1x16x64xf32> to vector<16x64xf32>
    %30 = arith.truncf %29 : vector<16x64xf32> to vector<16x64xbf16>
    %c0_9 = arith.constant 0 : index
    %c128 = arith.constant 128 : index
    %31 = vector.load %arg7[%c0_9, %c128] : memref<16x320xbf16, #tpu.memory_space<vmem>>, vector<16x64xbf16>
    tpu.vector_store %arg7[%c0_9, %c128], %30 {strides = array<i32>} : memref<16x320xbf16, #tpu.memory_space<vmem>>, vector<16x64xbf16>,
    %c0_10 = arith.constant 0 : index
    %c0_11 = arith.constant 0 : index
    %c0_12 = arith.constant 0 : index
    %32 = vector.load %arg2[%c0_10, %c0_11, %c0_12] : memref<3x4x48xbf16, #tpu.memory_space<vmem>>, vector<1x4x48xbf16>
    %33 = vector.shape_cast %32 : vector<1x4x48xbf16> to vector<4x48xbf16>
    %c0_13 = arith.constant 0 : index
    %c119 = arith.constant 119 : index
    %34 = vector.load %arg7[%c0_13, %c119] : memref<16x320xbf16, #tpu.memory_space<vmem>>, vector<16x64xbf16>
    %c0_14 = arith.constant 0 : index
    %c127 = arith.constant 127 : index
    %35 = vector.load %arg7[%c0_14, %c127] : memref<16x320xbf16, #tpu.memory_space<vmem>>, vector<16x64xbf16>
    %c0_15 = arith.constant 0 : index
    %c135 = arith.constant 135 : index
    %36 = vector.load %arg7[%c0_15, %c135] : memref<16x320xbf16, #tpu.memory_space<vmem>>, vector<16x64xbf16>
    %37 = tpu.concatenate %34, %35, %36 in 0 : vector<16x64xbf16>, vector<16x64xbf16>, vector<16x64xbf16> -> vector<48x64xbf16>
    %cst_16 = arith.constant dense<0.000000e+00> : vector<4x64xf32>
    %38 = tpu.matmul %33, %37, %cst_16 {dimension_numbers = #tpu.dot_dimension_numbers<[1], [0], [0], [1], [0, 0, 1, 1], [], []>} : vector<4x48xbf16>, vector<48x64xbf16>, vector<4x64xf32> -> vector<4x64xf32>
    %c1 = arith.constant 1 : index
    %c0_17 = arith.constant 0 : index
    %c0_18 = arith.constant 0 : index
    %39 = vector.load %arg2[%c1, %c0_17, %c0_18] : memref<3x4x48xbf16, #tpu.memory_space<vmem>>, vector<1x4x48xbf16>
    %40 = vector.shape_cast %39 : vector<1x4x48xbf16> to vector<4x48xbf16>
    %c0_19 = arith.constant 0 : index
    %c120 = arith.constant 120 : index
    %41 = vector.load %arg7[%c0_19, %c120] : memref<16x320xbf16, #tpu.memory_space<vmem>>, vector<16x64xbf16>
    %c0_20 = arith.constant 0 : index
    %c128_21 = arith.constant 128 : index
    %42 = vector.load %arg7[%c0_20, %c128_21] : memref<16x320xbf16, #tpu.memory_space<vmem>>, vector<16x64xbf16>
    %c0_22 = arith.constant 0 : index
    %c136 = arith.constant 136 : index
    %43 = vector.load %arg7[%c0_22, %c136] : memref<16x320xbf16, #tpu.memory_space<vmem>>, vector<16x64xbf16>
    %44 = tpu.concatenate %41, %42, %43 in 0 : vector<16x64xbf16>, vector<16x64xbf16>, vector<16x64xbf16> -> vector<48x64xbf16>
    %cst_23 = arith.constant dense<0.000000e+00> : vector<4x64xf32>
    %45 = tpu.matmul %40, %44, %cst_23 {dimension_numbers = #tpu.dot_dimension_numbers<[1], [0], [0], [1], [0, 0, 1, 1], [], []>} : vector<4x48xbf16>, vector<48x64xbf16>, vector<4x64xf32> -> vector<4x64xf32>
    %c2 = arith.constant 2 : index
    %c0_24 = arith.constant 0 : index
    %c0_25 = arith.constant 0 : index
    %46 = vector.load %arg2[%c2, %c0_24, %c0_25] : memref<3x4x48xbf16, #tpu.memory_space<vmem>>, vector<1x4x48xbf16>
    %47 = vector.shape_cast %46 : vector<1x4x48xbf16> to vector<4x48xbf16>
    %c0_26 = arith.constant 0 : index
    %c121 = arith.constant 121 : index
    %48 = vector.load %arg7[%c0_26, %c121] : memref<16x320xbf16, #tpu.memory_space<vmem>>, vector<16x64xbf16>
    %c0_27 = arith.constant 0 : index
    %c129 = arith.constant 129 : index
    %49 = vector.load %arg7[%c0_27, %c129] : memref<16x320xbf16, #tpu.memory_space<vmem>>, vector<16x64xbf16>
    %c0_28 = arith.constant 0 : index
    %c137 = arith.constant 137 : index
    %50 = vector.load %arg7[%c0_28, %c137] : memref<16x320xbf16, #tpu.memory_space<vmem>>, vector<16x64xbf16>
    %51 = tpu.concatenate %48, %49, %50 in 0 : vector<16x64xbf16>, vector<16x64xbf16>, vector<16x64xbf16> -> vector<48x64xbf16>
    %cst_29 = arith.constant dense<0.000000e+00> : vector<4x64xf32>
    %52 = tpu.matmul %47, %51, %cst_29 {dimension_numbers = #tpu.dot_dimension_numbers<[1], [0], [0], [1], [0, 0, 1, 1], [], []>} : vector<4x48xbf16>, vector<48x64xbf16>, vector<4x64xf32> -> vector<4x64xf32>
    %53 = vector.broadcast %20 : vector<1x64xf32> to vector<4x64xf32>
    %54 = arith.mulf %38, %53 : vector<4x64xf32>
    %55 = arith.addf %45, %54 : vector<4x64xf32>
    %56 = vector.broadcast %24 : vector<1x64xf32> to vector<4x64xf32>
    %57 = arith.mulf %52, %56 : vector<4x64xf32>
    %58 = arith.addf %55, %57 : vector<4x64xf32>
    %c0_30 = arith.constant 0 : index
    %c0_31 = arith.constant 0 : index
    %59 = vector.load %arg3[%c0_30, %c0_31] : memref<4x1xf32, #tpu.memory_space<vmem>>, vector<4x1xf32>
    %60 = vector.broadcast %59 : vector<4x1xf32> to vector<4x64xf32>
    %61 = arith.addf %58, %60 : vector<4x64xf32>
    %cst_32 = arith.constant dense<0.000000e+00> : vector<4xf32>
    %62 = vector.multi_reduction <add>, %61, %cst_32 [1] : vector<4x64xf32> to vector<4xf32>
    %63 = vector.shape_cast %62 : vector<4xf32> to vector<4x1xf32>
    %cst_33 = arith.constant 6.400000e+01 : f32
    %64 = vector.broadcast %cst_33 : f32 to vector<4x1xf32>
    %65 = arith.divf %63, %64 : vector<4x1xf32>
    %66 = arith.mulf %61, %61 : vector<4x64xf32>
    %cst_34 = arith.constant dense<0.000000e+00> : vector<4xf32>
    %67 = vector.multi_reduction <add>, %66, %cst_34 [1] : vector<4x64xf32> to vector<4xf32>
    %68 = vector.shape_cast %67 : vector<4xf32> to vector<4x1xf32>
    %cst_35 = arith.constant 6.400000e+01 : f32
    %69 = vector.broadcast %cst_35 : f32 to vector<4x1xf32>
    %70 = arith.divf %68, %69 : vector<4x1xf32>
    %71 = arith.mulf %65, %65 : vector<4x1xf32>
    %72 = arith.subf %70, %71 : vector<4x1xf32>
    %cst_36 = arith.constant 0.000000e+00 : f32
    %73 = vector.broadcast %cst_36 : f32 to vector<4x1xf32>
    %74 = arith.maximumf %72, %73 : vector<4x1xf32>
    %75 = vector.broadcast %65 : vector<4x1xf32> to vector<4x64xf32>
    %76 = arith.subf %61, %75 : vector<4x64xf32>
    %cst_37 = arith.constant 9.99999974E-6 : f32
    %77 = vector.broadcast %cst_37 : f32 to vector<4x1xf32>
    %78 = arith.addf %74, %77 : vector<4x1xf32>
    %79 = math.rsqrt %78 : vector<4x1xf32>
    %80 = vector.broadcast %79 : vector<4x1xf32> to vector<4x64xf32>
    %81 = arith.mulf %76, %80 : vector<4x64xf32>
    %cst_38 = arith.constant 0.000000e+00 : f32
    %82 = vector.broadcast %cst_38 : f32 to vector<4x64xf32>
    %83 = arith.maximumf %81, %82 : vector<4x64xf32>
    %84 = arith.truncf %83 : vector<4x64xf32> to vector<4x64xbf16>
    %c0_39 = arith.constant 0 : index
    %c128_40 = arith.constant 128 : index
    %85 = vector.load %arg7[%c0_39, %c128_40] : memref<16x320xbf16, #tpu.memory_space<vmem>>, vector<4x64xbf16>
    tpu.vector_store %arg7[%c0_39, %c128_40], %84 {strides = array<i32>} : memref<16x320xbf16, #tpu.memory_space<vmem>>, vector<4x64xbf16>,
    %c0_41 = arith.constant 0 : index
    %c0_42 = arith.constant 0 : index
    %c0_43 = arith.constant 0 : index
    %86 = vector.load %arg4[%c0_41, %c0_42, %c0_43] : memref<3x4x12xbf16, #tpu.memory_space<vmem>>, vector<1x4x12xbf16>
    %87 = vector.shape_cast %86 : vector<1x4x12xbf16> to vector<4x12xbf16>
    %c0_44 = arith.constant 0 : index
    %c119_45 = arith.constant 119 : index
    %88 = vector.load %arg7[%c0_44, %c119_45] : memref<16x320xbf16, #tpu.memory_space<vmem>>, vector<4x64xbf16>
    %c0_46 = arith.constant 0 : index
    %c127_47 = arith.constant 127 : index
    %89 = vector.load %arg7[%c0_46, %c127_47] : memref<16x320xbf16, #tpu.memory_space<vmem>>, vector<4x64xbf16>
    %c0_48 = arith.constant 0 : index
    %c135_49 = arith.constant 135 : index
    %90 = vector.load %arg7[%c0_48, %c135_49] : memref<16x320xbf16, #tpu.memory_space<vmem>>, vector<4x64xbf16>
    %91 = tpu.concatenate %88, %89, %90 in 0 : vector<4x64xbf16>, vector<4x64xbf16>, vector<4x64xbf16> -> vector<12x64xbf16>
    %cst_50 = arith.constant dense<0.000000e+00> : vector<4x64xf32>
    %92 = tpu.matmul %87, %91, %cst_50 {dimension_numbers = #tpu.dot_dimension_numbers<[1], [0], [0], [1], [0, 0, 1, 1], [], []>} : vector<4x12xbf16>, vector<12x64xbf16>, vector<4x64xf32> -> vector<4x64xf32>
    %c1_51 = arith.constant 1 : index
    %c0_52 = arith.constant 0 : index
    %c0_53 = arith.constant 0 : index
    %93 = vector.load %arg4[%c1_51, %c0_52, %c0_53] : memref<3x4x12xbf16, #tpu.memory_space<vmem>>, vector<1x4x12xbf16>
    %94 = vector.shape_cast %93 : vector<1x4x12xbf16> to vector<4x12xbf16>
    %c0_54 = arith.constant 0 : index
    %c120_55 = arith.constant 120 : index
    %95 = vector.load %arg7[%c0_54, %c120_55] : memref<16x320xbf16, #tpu.memory_space<vmem>>, vector<4x64xbf16>
    %c0_56 = arith.constant 0 : index
    %c128_57 = arith.constant 128 : index
    %96 = vector.load %arg7[%c0_56, %c128_57] : memref<16x320xbf16, #tpu.memory_space<vmem>>, vector<4x64xbf16>
    %c0_58 = arith.constant 0 : index
    %c136_59 = arith.constant 136 : index
    %97 = vector.load %arg7[%c0_58, %c136_59] : memref<16x320xbf16, #tpu.memory_space<vmem>>, vector<4x64xbf16>
    %98 = tpu.concatenate %95, %96, %97 in 0 : vector<4x64xbf16>, vector<4x64xbf16>, vector<4x64xbf16> -> vector<12x64xbf16>
    %cst_60 = arith.constant dense<0.000000e+00> : vector<4x64xf32>
    %99 = tpu.matmul %94, %98, %cst_60 {dimension_numbers = #tpu.dot_dimension_numbers<[1], [0], [0], [1], [0, 0, 1, 1], [], []>} : vector<4x12xbf16>, vector<12x64xbf16>, vector<4x64xf32> -> vector<4x64xf32>
    %c2_61 = arith.constant 2 : index
    %c0_62 = arith.constant 0 : index
    %c0_63 = arith.constant 0 : index
    %100 = vector.load %arg4[%c2_61, %c0_62, %c0_63] : memref<3x4x12xbf16, #tpu.memory_space<vmem>>, vector<1x4x12xbf16>
    %101 = vector.shape_cast %100 : vector<1x4x12xbf16> to vector<4x12xbf16>
    %c0_64 = arith.constant 0 : index
    %c121_65 = arith.constant 121 : index
    %102 = vector.load %arg7[%c0_64, %c121_65] : memref<16x320xbf16, #tpu.memory_space<vmem>>, vector<4x64xbf16>
    %c0_66 = arith.constant 0 : index
    %c129_67 = arith.constant 129 : index
    %103 = vector.load %arg7[%c0_66, %c129_67] : memref<16x320xbf16, #tpu.memory_space<vmem>>, vector<4x64xbf16>
    %c0_68 = arith.constant 0 : index
    %c137_69 = arith.constant 137 : index
    %104 = vector.load %arg7[%c0_68, %c137_69] : memref<16x320xbf16, #tpu.memory_space<vmem>>, vector<4x64xbf16>
    %105 = tpu.concatenate %102, %103, %104 in 0 : vector<4x64xbf16>, vector<4x64xbf16>, vector<4x64xbf16> -> vector<12x64xbf16>
    %cst_70 = arith.constant dense<0.000000e+00> : vector<4x64xf32>
    %106 = tpu.matmul %101, %105, %cst_70 {dimension_numbers = #tpu.dot_dimension_numbers<[1], [0], [0], [1], [0, 0, 1, 1], [], []>} : vector<4x12xbf16>, vector<12x64xbf16>, vector<4x64xf32> -> vector<4x64xf32>
    %107 = vector.broadcast %20 : vector<1x64xf32> to vector<4x64xf32>
    %108 = arith.mulf %92, %107 : vector<4x64xf32>
    %109 = arith.addf %99, %108 : vector<4x64xf32>
    %110 = vector.broadcast %24 : vector<1x64xf32> to vector<4x64xf32>
    %111 = arith.mulf %106, %110 : vector<4x64xf32>
    %112 = arith.addf %109, %111 : vector<4x64xf32>
    %c0_71 = arith.constant 0 : index
    %c0_72 = arith.constant 0 : index
    %113 = vector.load %arg5[%c0_71, %c0_72] : memref<4x1xf32, #tpu.memory_space<vmem>>, vector<4x1xf32>
    %114 = vector.broadcast %113 : vector<4x1xf32> to vector<4x64xf32>
    %115 = arith.addf %112, %114 : vector<4x64xf32>
    %cst_73 = arith.constant dense<0.000000e+00> : vector<4xf32>
    %116 = vector.multi_reduction <add>, %115, %cst_73 [1] : vector<4x64xf32> to vector<4xf32>
    %117 = vector.shape_cast %116 : vector<4xf32> to vector<4x1xf32>
    %cst_74 = arith.constant 6.400000e+01 : f32
    %118 = vector.broadcast %cst_74 : f32 to vector<4x1xf32>
    %119 = arith.divf %117, %118 : vector<4x1xf32>
    %120 = arith.mulf %115, %115 : vector<4x64xf32>
    %cst_75 = arith.constant dense<0.000000e+00> : vector<4xf32>
    %121 = vector.multi_reduction <add>, %120, %cst_75 [1] : vector<4x64xf32> to vector<4xf32>
    %122 = vector.shape_cast %121 : vector<4xf32> to vector<4x1xf32>
    %cst_76 = arith.constant 6.400000e+01 : f32
    %123 = vector.broadcast %cst_76 : f32 to vector<4x1xf32>
    %124 = arith.divf %122, %123 : vector<4x1xf32>
    %125 = arith.mulf %119, %119 : vector<4x1xf32>
    %126 = arith.subf %124, %125 : vector<4x1xf32>
    %cst_77 = arith.constant 0.000000e+00 : f32
    %127 = vector.broadcast %cst_77 : f32 to vector<4x1xf32>
    %128 = arith.maximumf %126, %127 : vector<4x1xf32>
    %129 = vector.broadcast %119 : vector<4x1xf32> to vector<4x64xf32>
    %130 = arith.subf %115, %129 : vector<4x64xf32>
    %cst_78 = arith.constant 9.99999974E-6 : f32
    %131 = vector.broadcast %cst_78 : f32 to vector<4x1xf32>
    %132 = arith.addf %128, %131 : vector<4x1xf32>
    %133 = math.rsqrt %132 : vector<4x1xf32>
    %134 = vector.broadcast %133 : vector<4x1xf32> to vector<4x64xf32>
    %135 = arith.mulf %130, %134 : vector<4x64xf32>
    %cst_79 = arith.constant 0.000000e+00 : f32
    %136 = vector.broadcast %cst_79 : f32 to vector<4x64xf32>
    %137 = arith.maximumf %135, %136 : vector<4x64xf32>
    %c0_80 = arith.constant 0 : index
    %c0_81 = arith.constant 0 : index
    %c0_82 = arith.constant 0 : index
    %138 = vector.load %arg6[%c0_80, %c0_81, %c0_82] : memref<1x4x64xf32, #tpu.memory_space<vmem>>, vector<1x4x64xf32>
    %139 = vector.shape_cast %138 : vector<1x4x64xf32> to vector<4x64xf32>
    %140 = vector.shape_cast %137 : vector<4x64xf32> to vector<1x4x64xf32>
    tpu.vector_store %arg6[%c0_80, %c0_81, %c0_82], %140 {strides = array<i32>} : memref<1x4x64xf32, #tpu.memory_space<vmem>>, vector<1x4x64xf32>,
    return
  }
  func.func @transform_0(%arg0: i32) -> (i32, i32, i32) {
    %c0_i32 = arith.constant 0 : i32
    %c0_i32_0 = arith.constant 0 : i32
    %c0_i32_1 = arith.constant 0 : i32
    return %arg0, %c0_i32, %c0_i32_0 : i32, i32, i32
  }
  func.func @transform_1(%arg0: i32) -> (i32, i32, i32) {
    %c0_i32 = arith.constant 0 : i32
    %c0_i32_0 = arith.constant 0 : i32
    %c0_i32_1 = arith.constant 0 : i32
    %c0_i32_2 = arith.constant 0 : i32
    return %c0_i32, %c0_i32_0, %c0_i32_1 : i32, i32, i32
  }
  func.func @transform_2(%arg0: i32) -> (i32, i32) {
    %c0_i32 = arith.constant 0 : i32
    %c0_i32_0 = arith.constant 0 : i32
    %c0_i32_1 = arith.constant 0 : i32
    return %c0_i32, %c0_i32_0 : i32, i32
  }
  func.func @transform_3(%arg0: i32) -> (i32, i32, i32) {
    %c0_i32 = arith.constant 0 : i32
    %c0_i32_0 = arith.constant 0 : i32
    %c0_i32_1 = arith.constant 0 : i32
    %c0_i32_2 = arith.constant 0 : i32
    return %c0_i32, %c0_i32_0, %c0_i32_1 : i32, i32, i32
  }
  func.func @transform_4(%arg0: i32) -> (i32, i32) {
    %c0_i32 = arith.constant 0 : i32
    %c0_i32_0 = arith.constant 0 : i32
    %c0_i32_1 = arith.constant 0 : i32
    return %c0_i32, %c0_i32_0 : i32, i32
  }
  func.func @transform_5(%arg0: i32) -> (i32, i32, i32) {
    %c0_i32 = arith.constant 0 : i32
    %c0_i32_0 = arith.constant 0 : i32
    %c0_i32_1 = arith.constant 0 : i32
    return %arg0, %c0_i32, %c0_i32_0 : i32, i32, i32
  }
}

module attributes {stable_mosaic.version = 11 : i64} {
  func.func @_conv_block_kernel(%arg0: i32, %arg1: memref<1x8x256xf32, #tpu.memory_space<vmem>>, %arg2: memref<3x4x24xbf16, #tpu.memory_space<vmem>>, %arg3: memref<4x1xf32, #tpu.memory_space<vmem>>, %arg4: memref<3x4x12xbf16, #tpu.memory_space<vmem>>, %arg5: memref<4x1xf32, #tpu.memory_space<vmem>>, %arg6: memref<1x4x256xf32, #tpu.memory_space<vmem>>, %arg7: memref<8x512xbf16, #tpu.memory_space<vmem>>) attributes {dimension_semantics = [#tpu.dimension_semantics<parallel>], iteration_bounds = array<i64: 2>, scalar_prefetch = 0 : i64, scratch_operands = 1 : i64, tpu.core_type = #tpu.core_type<tc>, window_params = [{transform_indices = @transform_0, window_bounds = array<i64: 1, 8, 256>}, {pipeline_mode = #tpu.pipeline_mode<synchronous>, transform_indices = @transform_1, window_bounds = array<i64: 3, 4, 24>}, {pipeline_mode = #tpu.pipeline_mode<synchronous>, transform_indices = @transform_2, window_bounds = array<i64: 4, 1>}, {pipeline_mode = #tpu.pipeline_mode<synchronous>, transform_indices = @transform_3, window_bounds = array<i64: 3, 4, 12>}, {pipeline_mode = #tpu.pipeline_mode<synchronous>, transform_indices = @transform_4, window_bounds = array<i64: 4, 1>}, {transform_indices = @transform_5, window_bounds = array<i64: 1, 4, 256>}]} {
    %0 = tpu.iota {dimensions = array<i32: 1>} : vector<1x256xi32>
    %c16_i32 = arith.constant 16 : i32
    %c0_i32 = arith.constant 0 : i32
    %1 = arith.cmpi eq, %c16_i32, %c0_i32 : i32
    %c1_i32 = arith.constant 1 : i32
    %2 = arith.select %1, %c1_i32, %c16_i32 : i32
    %3 = vector.broadcast %2 : i32 to vector<1x256xi32>
    %4 = arith.remsi %0, %3 : vector<1x256xi32>
    %c0_i32_0 = arith.constant 0 : i32
    %5 = vector.broadcast %c0_i32_0 : i32 to vector<1x256xi32>
    %6 = arith.cmpi ne, %4, %5 : vector<1x256xi32>
    %c0_i32_1 = arith.constant 0 : i32
    %7 = vector.broadcast %c0_i32_1 : i32 to vector<1x256xi32>
    %8 = arith.cmpi slt, %4, %7 : vector<1x256xi32>
    %c0_i32_2 = arith.constant 0 : i32
    %9 = arith.cmpi slt, %2, %c0_i32_2 : i32
    %10 = vector.broadcast %9 : i1 to vector<1x256xi1>
    %11 = vector.broadcast %10 : vector<1x256xi1> to vector<1x256xi1>
    %12 = arith.xori %8, %11 : vector<1x256xi1>
    %13 = arith.andi %12, %6 : vector<1x256xi1>
    %14 = vector.broadcast %2 : i32 to vector<1x256xi32>
    %15 = arith.addi %4, %14 : vector<1x256xi32>
    %16 = arith.select %13, %15, %4 : vector<1x256xi1>, vector<1x256xi32>
    %c0_i32_3 = arith.constant 0 : i32
    %17 = vector.broadcast %c0_i32_3 : i32 to vector<1x256xi32>
    %18 = arith.cmpi sgt, %16, %17 : vector<1x256xi32>
    %19 = arith.extui %18 : vector<1x256xi1> to vector<1x256xi32>
    %20 = arith.sitofp %19 : vector<1x256xi32> to vector<1x256xf32>
    %c15_i32 = arith.constant 15 : i32
    %21 = vector.broadcast %c15_i32 : i32 to vector<1x256xi32>
    %22 = arith.cmpi slt, %16, %21 : vector<1x256xi32>
    %23 = arith.extui %22 : vector<1x256xi1> to vector<1x256xi32>
    %24 = arith.sitofp %23 : vector<1x256xi32> to vector<1x256xf32>
    %cst = arith.constant 0.000000e+00 : bf16
    %25 = vector.broadcast %cst : bf16 to vector<8x128xbf16>
    %c0 = arith.constant 0 : index
    %c0_4 = arith.constant 0 : index
    %26 = vector.load %arg7[%c0, %c0_4] : memref<8x512xbf16, #tpu.memory_space<vmem>>, vector<8x128xbf16>
    tpu.vector_store %arg7[%c0, %c0_4], %25 {strides = array<i32>} : memref<8x512xbf16, #tpu.memory_space<vmem>>, vector<8x128xbf16>,
    %c0_5 = arith.constant 0 : index
    %c384 = arith.constant 384 : index
    %27 = vector.load %arg7[%c0_5, %c384] : memref<8x512xbf16, #tpu.memory_space<vmem>>, vector<8x128xbf16>
    tpu.vector_store %arg7[%c0_5, %c384], %25 {strides = array<i32>} : memref<8x512xbf16, #tpu.memory_space<vmem>>, vector<8x128xbf16>,
    %c0_6 = arith.constant 0 : index
    %c0_7 = arith.constant 0 : index
    %c0_8 = arith.constant 0 : index
    %28 = vector.load %arg1[%c0_6, %c0_7, %c0_8] : memref<1x8x256xf32, #tpu.memory_space<vmem>>, vector<1x8x256xf32>
    %29 = vector.shape_cast %28 : vector<1x8x256xf32> to vector<8x256xf32>
    %30 = arith.truncf %29 : vector<8x256xf32> to vector<8x256xbf16>
    %c0_9 = arith.constant 0 : index
    %c128 = arith.constant 128 : index
    %31 = vector.load %arg7[%c0_9, %c128] : memref<8x512xbf16, #tpu.memory_space<vmem>>, vector<8x256xbf16>
    tpu.vector_store %arg7[%c0_9, %c128], %30 {strides = array<i32>} : memref<8x512xbf16, #tpu.memory_space<vmem>>, vector<8x256xbf16>,
    %c0_10 = arith.constant 0 : index
    %c0_11 = arith.constant 0 : index
    %c0_12 = arith.constant 0 : index
    %32 = vector.load %arg2[%c0_10, %c0_11, %c0_12] : memref<3x4x24xbf16, #tpu.memory_space<vmem>>, vector<1x4x24xbf16>
    %33 = vector.shape_cast %32 : vector<1x4x24xbf16> to vector<4x24xbf16>
    %c0_13 = arith.constant 0 : index
    %c111 = arith.constant 111 : index
    %34 = vector.load %arg7[%c0_13, %c111] : memref<8x512xbf16, #tpu.memory_space<vmem>>, vector<8x256xbf16>
    %c0_14 = arith.constant 0 : index
    %c127 = arith.constant 127 : index
    %35 = vector.load %arg7[%c0_14, %c127] : memref<8x512xbf16, #tpu.memory_space<vmem>>, vector<8x256xbf16>
    %c0_15 = arith.constant 0 : index
    %c143 = arith.constant 143 : index
    %36 = vector.load %arg7[%c0_15, %c143] : memref<8x512xbf16, #tpu.memory_space<vmem>>, vector<8x256xbf16>
    %37 = tpu.concatenate %34, %35, %36 in 0 : vector<8x256xbf16>, vector<8x256xbf16>, vector<8x256xbf16> -> vector<24x256xbf16>
    %cst_16 = arith.constant dense<0.000000e+00> : vector<4x256xf32>
    %38 = tpu.matmul %33, %37, %cst_16 {dimension_numbers = #tpu.dot_dimension_numbers<[1], [0], [0], [1], [0, 0, 1, 1], [], []>} : vector<4x24xbf16>, vector<24x256xbf16>, vector<4x256xf32> -> vector<4x256xf32>
    %c1 = arith.constant 1 : index
    %c0_17 = arith.constant 0 : index
    %c0_18 = arith.constant 0 : index
    %39 = vector.load %arg2[%c1, %c0_17, %c0_18] : memref<3x4x24xbf16, #tpu.memory_space<vmem>>, vector<1x4x24xbf16>
    %40 = vector.shape_cast %39 : vector<1x4x24xbf16> to vector<4x24xbf16>
    %c0_19 = arith.constant 0 : index
    %c112 = arith.constant 112 : index
    %41 = vector.load %arg7[%c0_19, %c112] : memref<8x512xbf16, #tpu.memory_space<vmem>>, vector<8x256xbf16>
    %c0_20 = arith.constant 0 : index
    %c128_21 = arith.constant 128 : index
    %42 = vector.load %arg7[%c0_20, %c128_21] : memref<8x512xbf16, #tpu.memory_space<vmem>>, vector<8x256xbf16>
    %c0_22 = arith.constant 0 : index
    %c144 = arith.constant 144 : index
    %43 = vector.load %arg7[%c0_22, %c144] : memref<8x512xbf16, #tpu.memory_space<vmem>>, vector<8x256xbf16>
    %44 = tpu.concatenate %41, %42, %43 in 0 : vector<8x256xbf16>, vector<8x256xbf16>, vector<8x256xbf16> -> vector<24x256xbf16>
    %cst_23 = arith.constant dense<0.000000e+00> : vector<4x256xf32>
    %45 = tpu.matmul %40, %44, %cst_23 {dimension_numbers = #tpu.dot_dimension_numbers<[1], [0], [0], [1], [0, 0, 1, 1], [], []>} : vector<4x24xbf16>, vector<24x256xbf16>, vector<4x256xf32> -> vector<4x256xf32>
    %c2 = arith.constant 2 : index
    %c0_24 = arith.constant 0 : index
    %c0_25 = arith.constant 0 : index
    %46 = vector.load %arg2[%c2, %c0_24, %c0_25] : memref<3x4x24xbf16, #tpu.memory_space<vmem>>, vector<1x4x24xbf16>
    %47 = vector.shape_cast %46 : vector<1x4x24xbf16> to vector<4x24xbf16>
    %c0_26 = arith.constant 0 : index
    %c113 = arith.constant 113 : index
    %48 = vector.load %arg7[%c0_26, %c113] : memref<8x512xbf16, #tpu.memory_space<vmem>>, vector<8x256xbf16>
    %c0_27 = arith.constant 0 : index
    %c129 = arith.constant 129 : index
    %49 = vector.load %arg7[%c0_27, %c129] : memref<8x512xbf16, #tpu.memory_space<vmem>>, vector<8x256xbf16>
    %c0_28 = arith.constant 0 : index
    %c145 = arith.constant 145 : index
    %50 = vector.load %arg7[%c0_28, %c145] : memref<8x512xbf16, #tpu.memory_space<vmem>>, vector<8x256xbf16>
    %51 = tpu.concatenate %48, %49, %50 in 0 : vector<8x256xbf16>, vector<8x256xbf16>, vector<8x256xbf16> -> vector<24x256xbf16>
    %cst_29 = arith.constant dense<0.000000e+00> : vector<4x256xf32>
    %52 = tpu.matmul %47, %51, %cst_29 {dimension_numbers = #tpu.dot_dimension_numbers<[1], [0], [0], [1], [0, 0, 1, 1], [], []>} : vector<4x24xbf16>, vector<24x256xbf16>, vector<4x256xf32> -> vector<4x256xf32>
    %53 = vector.broadcast %20 : vector<1x256xf32> to vector<4x256xf32>
    %54 = arith.mulf %38, %53 : vector<4x256xf32>
    %55 = arith.addf %45, %54 : vector<4x256xf32>
    %56 = vector.broadcast %24 : vector<1x256xf32> to vector<4x256xf32>
    %57 = arith.mulf %52, %56 : vector<4x256xf32>
    %58 = arith.addf %55, %57 : vector<4x256xf32>
    %c0_30 = arith.constant 0 : index
    %c0_31 = arith.constant 0 : index
    %59 = vector.load %arg3[%c0_30, %c0_31] : memref<4x1xf32, #tpu.memory_space<vmem>>, vector<4x1xf32>
    %60 = vector.broadcast %59 : vector<4x1xf32> to vector<4x256xf32>
    %61 = arith.addf %58, %60 : vector<4x256xf32>
    %cst_32 = arith.constant dense<0.000000e+00> : vector<4xf32>
    %62 = vector.multi_reduction <add>, %61, %cst_32 [1] : vector<4x256xf32> to vector<4xf32>
    %63 = vector.shape_cast %62 : vector<4xf32> to vector<4x1xf32>
    %cst_33 = arith.constant 2.560000e+02 : f32
    %64 = vector.broadcast %cst_33 : f32 to vector<4x1xf32>
    %65 = arith.divf %63, %64 : vector<4x1xf32>
    %66 = arith.mulf %61, %61 : vector<4x256xf32>
    %cst_34 = arith.constant dense<0.000000e+00> : vector<4xf32>
    %67 = vector.multi_reduction <add>, %66, %cst_34 [1] : vector<4x256xf32> to vector<4xf32>
    %68 = vector.shape_cast %67 : vector<4xf32> to vector<4x1xf32>
    %cst_35 = arith.constant 2.560000e+02 : f32
    %69 = vector.broadcast %cst_35 : f32 to vector<4x1xf32>
    %70 = arith.divf %68, %69 : vector<4x1xf32>
    %71 = arith.mulf %65, %65 : vector<4x1xf32>
    %72 = arith.subf %70, %71 : vector<4x1xf32>
    %cst_36 = arith.constant 0.000000e+00 : f32
    %73 = vector.broadcast %cst_36 : f32 to vector<4x1xf32>
    %74 = arith.maximumf %72, %73 : vector<4x1xf32>
    %75 = vector.broadcast %65 : vector<4x1xf32> to vector<4x256xf32>
    %76 = arith.subf %61, %75 : vector<4x256xf32>
    %cst_37 = arith.constant 9.99999974E-6 : f32
    %77 = vector.broadcast %cst_37 : f32 to vector<4x1xf32>
    %78 = arith.addf %74, %77 : vector<4x1xf32>
    %79 = math.rsqrt %78 : vector<4x1xf32>
    %80 = vector.broadcast %79 : vector<4x1xf32> to vector<4x256xf32>
    %81 = arith.mulf %76, %80 : vector<4x256xf32>
    %cst_38 = arith.constant 0.000000e+00 : f32
    %82 = vector.broadcast %cst_38 : f32 to vector<4x256xf32>
    %83 = arith.maximumf %81, %82 : vector<4x256xf32>
    %84 = arith.truncf %83 : vector<4x256xf32> to vector<4x256xbf16>
    %c0_39 = arith.constant 0 : index
    %c128_40 = arith.constant 128 : index
    %85 = vector.load %arg7[%c0_39, %c128_40] : memref<8x512xbf16, #tpu.memory_space<vmem>>, vector<4x256xbf16>
    tpu.vector_store %arg7[%c0_39, %c128_40], %84 {strides = array<i32>} : memref<8x512xbf16, #tpu.memory_space<vmem>>, vector<4x256xbf16>,
    %c0_41 = arith.constant 0 : index
    %c0_42 = arith.constant 0 : index
    %c0_43 = arith.constant 0 : index
    %86 = vector.load %arg4[%c0_41, %c0_42, %c0_43] : memref<3x4x12xbf16, #tpu.memory_space<vmem>>, vector<1x4x12xbf16>
    %87 = vector.shape_cast %86 : vector<1x4x12xbf16> to vector<4x12xbf16>
    %c0_44 = arith.constant 0 : index
    %c111_45 = arith.constant 111 : index
    %88 = vector.load %arg7[%c0_44, %c111_45] : memref<8x512xbf16, #tpu.memory_space<vmem>>, vector<4x256xbf16>
    %c0_46 = arith.constant 0 : index
    %c127_47 = arith.constant 127 : index
    %89 = vector.load %arg7[%c0_46, %c127_47] : memref<8x512xbf16, #tpu.memory_space<vmem>>, vector<4x256xbf16>
    %c0_48 = arith.constant 0 : index
    %c143_49 = arith.constant 143 : index
    %90 = vector.load %arg7[%c0_48, %c143_49] : memref<8x512xbf16, #tpu.memory_space<vmem>>, vector<4x256xbf16>
    %91 = tpu.concatenate %88, %89, %90 in 0 : vector<4x256xbf16>, vector<4x256xbf16>, vector<4x256xbf16> -> vector<12x256xbf16>
    %cst_50 = arith.constant dense<0.000000e+00> : vector<4x256xf32>
    %92 = tpu.matmul %87, %91, %cst_50 {dimension_numbers = #tpu.dot_dimension_numbers<[1], [0], [0], [1], [0, 0, 1, 1], [], []>} : vector<4x12xbf16>, vector<12x256xbf16>, vector<4x256xf32> -> vector<4x256xf32>
    %c1_51 = arith.constant 1 : index
    %c0_52 = arith.constant 0 : index
    %c0_53 = arith.constant 0 : index
    %93 = vector.load %arg4[%c1_51, %c0_52, %c0_53] : memref<3x4x12xbf16, #tpu.memory_space<vmem>>, vector<1x4x12xbf16>
    %94 = vector.shape_cast %93 : vector<1x4x12xbf16> to vector<4x12xbf16>
    %c0_54 = arith.constant 0 : index
    %c112_55 = arith.constant 112 : index
    %95 = vector.load %arg7[%c0_54, %c112_55] : memref<8x512xbf16, #tpu.memory_space<vmem>>, vector<4x256xbf16>
    %c0_56 = arith.constant 0 : index
    %c128_57 = arith.constant 128 : index
    %96 = vector.load %arg7[%c0_56, %c128_57] : memref<8x512xbf16, #tpu.memory_space<vmem>>, vector<4x256xbf16>
    %c0_58 = arith.constant 0 : index
    %c144_59 = arith.constant 144 : index
    %97 = vector.load %arg7[%c0_58, %c144_59] : memref<8x512xbf16, #tpu.memory_space<vmem>>, vector<4x256xbf16>
    %98 = tpu.concatenate %95, %96, %97 in 0 : vector<4x256xbf16>, vector<4x256xbf16>, vector<4x256xbf16> -> vector<12x256xbf16>
    %cst_60 = arith.constant dense<0.000000e+00> : vector<4x256xf32>
    %99 = tpu.matmul %94, %98, %cst_60 {dimension_numbers = #tpu.dot_dimension_numbers<[1], [0], [0], [1], [0, 0, 1, 1], [], []>} : vector<4x12xbf16>, vector<12x256xbf16>, vector<4x256xf32> -> vector<4x256xf32>
    %c2_61 = arith.constant 2 : index
    %c0_62 = arith.constant 0 : index
    %c0_63 = arith.constant 0 : index
    %100 = vector.load %arg4[%c2_61, %c0_62, %c0_63] : memref<3x4x12xbf16, #tpu.memory_space<vmem>>, vector<1x4x12xbf16>
    %101 = vector.shape_cast %100 : vector<1x4x12xbf16> to vector<4x12xbf16>
    %c0_64 = arith.constant 0 : index
    %c113_65 = arith.constant 113 : index
    %102 = vector.load %arg7[%c0_64, %c113_65] : memref<8x512xbf16, #tpu.memory_space<vmem>>, vector<4x256xbf16>
    %c0_66 = arith.constant 0 : index
    %c129_67 = arith.constant 129 : index
    %103 = vector.load %arg7[%c0_66, %c129_67] : memref<8x512xbf16, #tpu.memory_space<vmem>>, vector<4x256xbf16>
    %c0_68 = arith.constant 0 : index
    %c145_69 = arith.constant 145 : index
    %104 = vector.load %arg7[%c0_68, %c145_69] : memref<8x512xbf16, #tpu.memory_space<vmem>>, vector<4x256xbf16>
    %105 = tpu.concatenate %102, %103, %104 in 0 : vector<4x256xbf16>, vector<4x256xbf16>, vector<4x256xbf16> -> vector<12x256xbf16>
    %cst_70 = arith.constant dense<0.000000e+00> : vector<4x256xf32>
    %106 = tpu.matmul %101, %105, %cst_70 {dimension_numbers = #tpu.dot_dimension_numbers<[1], [0], [0], [1], [0, 0, 1, 1], [], []>} : vector<4x12xbf16>, vector<12x256xbf16>, vector<4x256xf32> -> vector<4x256xf32>
    %107 = vector.broadcast %20 : vector<1x256xf32> to vector<4x256xf32>
    %108 = arith.mulf %92, %107 : vector<4x256xf32>
    %109 = arith.addf %99, %108 : vector<4x256xf32>
    %110 = vector.broadcast %24 : vector<1x256xf32> to vector<4x256xf32>
    %111 = arith.mulf %106, %110 : vector<4x256xf32>
    %112 = arith.addf %109, %111 : vector<4x256xf32>
    %c0_71 = arith.constant 0 : index
    %c0_72 = arith.constant 0 : index
    %113 = vector.load %arg5[%c0_71, %c0_72] : memref<4x1xf32, #tpu.memory_space<vmem>>, vector<4x1xf32>
    %114 = vector.broadcast %113 : vector<4x1xf32> to vector<4x256xf32>
    %115 = arith.addf %112, %114 : vector<4x256xf32>
    %cst_73 = arith.constant dense<0.000000e+00> : vector<4xf32>
    %116 = vector.multi_reduction <add>, %115, %cst_73 [1] : vector<4x256xf32> to vector<4xf32>
    %117 = vector.shape_cast %116 : vector<4xf32> to vector<4x1xf32>
    %cst_74 = arith.constant 2.560000e+02 : f32
    %118 = vector.broadcast %cst_74 : f32 to vector<4x1xf32>
    %119 = arith.divf %117, %118 : vector<4x1xf32>
    %120 = arith.mulf %115, %115 : vector<4x256xf32>
    %cst_75 = arith.constant dense<0.000000e+00> : vector<4xf32>
    %121 = vector.multi_reduction <add>, %120, %cst_75 [1] : vector<4x256xf32> to vector<4xf32>
    %122 = vector.shape_cast %121 : vector<4xf32> to vector<4x1xf32>
    %cst_76 = arith.constant 2.560000e+02 : f32
    %123 = vector.broadcast %cst_76 : f32 to vector<4x1xf32>
    %124 = arith.divf %122, %123 : vector<4x1xf32>
    %125 = arith.mulf %119, %119 : vector<4x1xf32>
    %126 = arith.subf %124, %125 : vector<4x1xf32>
    %cst_77 = arith.constant 0.000000e+00 : f32
    %127 = vector.broadcast %cst_77 : f32 to vector<4x1xf32>
    %128 = arith.maximumf %126, %127 : vector<4x1xf32>
    %129 = vector.broadcast %119 : vector<4x1xf32> to vector<4x256xf32>
    %130 = arith.subf %115, %129 : vector<4x256xf32>
    %cst_78 = arith.constant 9.99999974E-6 : f32
    %131 = vector.broadcast %cst_78 : f32 to vector<4x1xf32>
    %132 = arith.addf %128, %131 : vector<4x1xf32>
    %133 = math.rsqrt %132 : vector<4x1xf32>
    %134 = vector.broadcast %133 : vector<4x1xf32> to vector<4x256xf32>
    %135 = arith.mulf %130, %134 : vector<4x256xf32>
    %cst_79 = arith.constant 0.000000e+00 : f32
    %136 = vector.broadcast %cst_79 : f32 to vector<4x256xf32>
    %137 = arith.maximumf %135, %136 : vector<4x256xf32>
    %c0_80 = arith.constant 0 : index
    %c0_81 = arith.constant 0 : index
    %c0_82 = arith.constant 0 : index
    %138 = vector.load %arg6[%c0_80, %c0_81, %c0_82] : memref<1x4x256xf32, #tpu.memory_space<vmem>>, vector<1x4x256xf32>
    %139 = vector.shape_cast %138 : vector<1x4x256xf32> to vector<4x256xf32>
    %140 = vector.shape_cast %137 : vector<4x256xf32> to vector<1x4x256xf32>
    tpu.vector_store %arg6[%c0_80, %c0_81, %c0_82], %140 {strides = array<i32>} : memref<1x4x256xf32, #tpu.memory_space<vmem>>, vector<1x4x256xf32>,
    return
  }
  func.func @transform_0(%arg0: i32) -> (i32, i32, i32) {
    %c0_i32 = arith.constant 0 : i32
    %c0_i32_0 = arith.constant 0 : i32
    %c0_i32_1 = arith.constant 0 : i32
    return %arg0, %c0_i32, %c0_i32_0 : i32, i32, i32
  }
  func.func @transform_1(%arg0: i32) -> (i32, i32, i32) {
    %c0_i32 = arith.constant 0 : i32
    %c0_i32_0 = arith.constant 0 : i32
    %c0_i32_1 = arith.constant 0 : i32
    %c0_i32_2 = arith.constant 0 : i32
    return %c0_i32, %c0_i32_0, %c0_i32_1 : i32, i32, i32
  }
  func.func @transform_2(%arg0: i32) -> (i32, i32) {
    %c0_i32 = arith.constant 0 : i32
    %c0_i32_0 = arith.constant 0 : i32
    %c0_i32_1 = arith.constant 0 : i32
    return %c0_i32, %c0_i32_0 : i32, i32
  }
  func.func @transform_3(%arg0: i32) -> (i32, i32, i32) {
    %c0_i32 = arith.constant 0 : i32
    %c0_i32_0 = arith.constant 0 : i32
    %c0_i32_1 = arith.constant 0 : i32
    %c0_i32_2 = arith.constant 0 : i32
    return %c0_i32, %c0_i32_0, %c0_i32_1 : i32, i32, i32
  }
  func.func @transform_4(%arg0: i32) -> (i32, i32) {
    %c0_i32 = arith.constant 0 : i32
    %c0_i32_0 = arith.constant 0 : i32
    %c0_i32_1 = arith.constant 0 : i32
    return %c0_i32, %c0_i32_0 : i32, i32
  }
  func.func @transform_5(%arg0: i32) -> (i32, i32, i32) {
    %c0_i32 = arith.constant 0 : i32
    %c0_i32_0 = arith.constant 0 : i32
    %c0_i32_1 = arith.constant 0 : i32
    return %arg0, %c0_i32, %c0_i32_0 : i32, i32, i32
  }
}

module attributes {stable_mosaic.version = 11 : i64} {
  func.func @_out_conv_kernel(%arg0: i32, %arg1: memref<1x4x256xf32, #tpu.memory_space<vmem>>, %arg2: memref<1x4xbf16, #tpu.memory_space<vmem>>, %arg3: memref<1x1xf32, #tpu.memory_space<vmem>>, %arg4: memref<1x1x256xf32, #tpu.memory_space<vmem>>) attributes {dimension_semantics = [#tpu.dimension_semantics<parallel>], iteration_bounds = array<i64: 2>, scalar_prefetch = 0 : i64, scratch_operands = 0 : i64, tpu.core_type = #tpu.core_type<tc>, window_params = [{transform_indices = @transform_0, window_bounds = array<i64: 1, 4, 256>}, {pipeline_mode = #tpu.pipeline_mode<synchronous>, transform_indices = @transform_1, window_bounds = array<i64: 1, 4>}, {pipeline_mode = #tpu.pipeline_mode<synchronous>, transform_indices = @transform_2, window_bounds = array<i64: 1, 1>}, {transform_indices = @transform_3, window_bounds = array<i64: 1, 1, 256>}]} {
    %c0 = arith.constant 0 : index
    %c0_0 = arith.constant 0 : index
    %0 = vector.load %arg2[%c0, %c0_0] : memref<1x4xbf16, #tpu.memory_space<vmem>>, vector<1x4xbf16>
    %c0_1 = arith.constant 0 : index
    %c0_2 = arith.constant 0 : index
    %c0_3 = arith.constant 0 : index
    %1 = vector.load %arg1[%c0_1, %c0_2, %c0_3] : memref<1x4x256xf32, #tpu.memory_space<vmem>>, vector<1x4x256xf32>
    %2 = vector.shape_cast %1 : vector<1x4x256xf32> to vector<4x256xf32>
    %3 = arith.truncf %2 : vector<4x256xf32> to vector<4x256xbf16>
    %cst = arith.constant dense<0.000000e+00> : vector<1x256xf32>
    %4 = tpu.matmul %0, %3, %cst {dimension_numbers = #tpu.dot_dimension_numbers<[1], [0], [0], [1], [0, 0, 1, 1], [], []>} : vector<1x4xbf16>, vector<4x256xbf16>, vector<1x256xf32> -> vector<1x256xf32>
    %c0_4 = arith.constant 0 : index
    %c0_5 = arith.constant 0 : index
    %5 = vector.load %arg3[%c0_4, %c0_5] : memref<1x1xf32, #tpu.memory_space<vmem>>, vector<1x1xf32>
    %6 = vector.broadcast %5 : vector<1x1xf32> to vector<1x256xf32>
    %7 = arith.addf %4, %6 : vector<1x256xf32>
    %c0_6 = arith.constant 0 : index
    %c0_7 = arith.constant 0 : index
    %c0_8 = arith.constant 0 : index
    %8 = vector.load %arg4[%c0_6, %c0_7, %c0_8] : memref<1x1x256xf32, #tpu.memory_space<vmem>>, vector<1x1x256xf32>
    %9 = vector.shape_cast %8 : vector<1x1x256xf32> to vector<1x256xf32>
    %10 = vector.shape_cast %7 : vector<1x256xf32> to vector<1x1x256xf32>
    tpu.vector_store %arg4[%c0_6, %c0_7, %c0_8], %10 {strides = array<i32>} : memref<1x1x256xf32, #tpu.memory_space<vmem>>, vector<1x1x256xf32>,
    return
  }
  func.func @transform_0(%arg0: i32) -> (i32, i32, i32) {
    %c0_i32 = arith.constant 0 : i32
    %c0_i32_0 = arith.constant 0 : i32
    %c0_i32_1 = arith.constant 0 : i32
    return %arg0, %c0_i32, %c0_i32_0 : i32, i32, i32
  }
  func.func @transform_1(%arg0: i32) -> (i32, i32) {
    %c0_i32 = arith.constant 0 : i32
    %c0_i32_0 = arith.constant 0 : i32
    %c0_i32_1 = arith.constant 0 : i32
    return %c0_i32, %c0_i32_0 : i32, i32
  }
  func.func @transform_2(%arg0: i32) -> (i32, i32) {
    %c0_i32 = arith.constant 0 : i32
    %c0_i32_0 = arith.constant 0 : i32
    %c0_i32_1 = arith.constant 0 : i32
    return %c0_i32, %c0_i32_0 : i32, i32
  }
  func.func @transform_3(%arg0: i32) -> (i32, i32, i32) {
    %c0_i32 = arith.constant 0 : i32
    %c0_i32_0 = arith.constant 0 : i32
    %c0_i32_1 = arith.constant 0 : i32
    return %arg0, %c0_i32, %c0_i32_0 : i32, i32, i32
  }
}

module attributes {stable_mosaic.version = 11 : i64} {
  func.func @_dc_merge_kernel(%arg0: i32, %arg1: memref<1x256xf32, #tpu.memory_space<vmem>>, %arg2: memref<4x256xf32, #tpu.memory_space<vmem>>, %arg3: memref<4x256xf32, #tpu.memory_space<vmem>>, %arg4: memref<4x256xf32, #tpu.memory_space<vmem>>) attributes {dimension_semantics = [#tpu.dimension_semantics<parallel>], iteration_bounds = array<i64: 1>, scalar_prefetch = 0 : i64, scratch_operands = 0 : i64, tpu.core_type = #tpu.core_type<tc>, window_params = [{transform_indices = @transform_0, window_bounds = array<i64: 1, 256>}, {transform_indices = @transform_1, window_bounds = array<i64: 4, 256>}, {transform_indices = @transform_2, window_bounds = array<i64: 4, 256>}, {transform_indices = @transform_3, window_bounds = array<i64: 4, 256>}]} {
    %c0 = arith.constant 0 : index
    %c0_0 = arith.constant 0 : index
    %0 = vector.load %arg1[%c0, %c0_0] : memref<1x256xf32, #tpu.memory_space<vmem>>, vector<1x256xf32>
    %c0_1 = arith.constant 0 : index
    %c0_2 = arith.constant 0 : index
    %1 = vector.load %arg2[%c0_1, %c0_2] : memref<4x256xf32, #tpu.memory_space<vmem>>, vector<4x256xf32>
    %2 = vector.broadcast %0 : vector<1x256xf32> to vector<4x256xf32>
    %3 = arith.mulf %2, %1 : vector<4x256xf32>
    %cst = arith.constant 1.000000e+00 : f32
    %4 = vector.broadcast %cst : f32 to vector<1x256xf32>
    %5 = arith.subf %4, %0 : vector<1x256xf32>
    %c0_3 = arith.constant 0 : index
    %c0_4 = arith.constant 0 : index
    %6 = vector.load %arg3[%c0_3, %c0_4] : memref<4x256xf32, #tpu.memory_space<vmem>>, vector<4x256xf32>
    %7 = vector.broadcast %5 : vector<1x256xf32> to vector<4x256xf32>
    %8 = arith.mulf %7, %6 : vector<4x256xf32>
    %9 = arith.addf %3, %8 : vector<4x256xf32>
    %c0_5 = arith.constant 0 : index
    %c0_6 = arith.constant 0 : index
    %10 = vector.load %arg4[%c0_5, %c0_6] : memref<4x256xf32, #tpu.memory_space<vmem>>, vector<4x256xf32>
    tpu.vector_store %arg4[%c0_5, %c0_6], %9 {strides = array<i32>} : memref<4x256xf32, #tpu.memory_space<vmem>>, vector<4x256xf32>,
    return
  }
  func.func @transform_0(%arg0: i32) -> (i32, i32) {
    %c0_i32 = arith.constant 0 : i32
    %c0_i32_0 = arith.constant 0 : i32
    return %c0_i32, %arg0 : i32, i32
  }
  func.func @transform_1(%arg0: i32) -> (i32, i32) {
    %c0_i32 = arith.constant 0 : i32
    %c0_i32_0 = arith.constant 0 : i32
    return %c0_i32, %arg0 : i32, i32
  }
  func.func @transform_2(%arg0: i32) -> (i32, i32) {
    %c0_i32 = arith.constant 0 : i32
    %c0_i32_0 = arith.constant 0 : i32
    return %c0_i32, %arg0 : i32, i32
  }
  func.func @transform_3(%arg0: i32) -> (i32, i32) {
    %c0_i32 = arith.constant 0 : i32
    %c0_i32_0 = arith.constant 0 : i32
    return %c0_i32, %arg0 : i32, i32
  }
}

</mosaic_0001>

<bundles_post_ra>
// kernel: dncn_forward.22
= control target key start
LH: loop header
LB: loop body
LE: loop exit
PB: predicated region body
PF: predicated region fallthrough
CT: control target
= control target key end

     0   :  { %s927_s18 = smov 0   ;;  %s1059_s0 = inlined_call_operand.vmem [shape: f32[2,4,64], index: 0, kind: input, shape index: {}]   ;;  %s1060_s1 = inlined_call_operand.vmem [shape: bf16[3,8,12], index: 1, kind: input, shape index: {}]   ;;  %s1061_s2 = inlined_call_operand.vmem [shape: f32[8,1], index: 2, kind: input, shape index: {}]   ;;  %s1062_s3 = inlined_call_operand.vmem [shape: bf16[3,8,24], index: 3, kind: input, shape index: {}]   ;;  %s1063_s4 = inlined_call_operand.vmem [shape: f32[8,1], index: 4, kind: input, shape index: {}]   ;;  %s1064_s5 = inlined_call_operand.vmem [shape: f32[2,8,64], index: 5, kind: output, shape index: {}]  }
   0x1 LB: > { %s769_s19 = sadd.s32 4294967295, %s887_s18   ;;  %p773_p0 = scmp.ge.s32.totalorder %s887_s18, 1  ;;  %s887_s18 = sphi %s927_s18, %s15_s18  }
   0x2   : > { %p186_p1 = scmp.lt.s32.totalorder %s887_s18, 3 }
   0x4   : > { %p187_p2 = pnand %p773_p0, %p186_p1 }
   0x5   : > { %p212_p3 = scmp.lt.s32.totalorder (!%p187_p2), %s769_s19, 1  ;;  %s890_s24 = smov (!%p187_p2), 112  }
   0x6   : > { %190 = sbr.rel (%p187_p2) target bundleno = 1273 (0x4f9), region = 40  ;;  %s891_s25 = smov (!%p187_p2), 120  }
   0x7   : > { %s894_s26 = smov (!%p187_p2), 9   ;;  %s895_s27 = smov (!%p187_p2), 7  }
   0x8   : > { %s896_s28 = smov (!%p187_p2), 8  }
   0xb   : > { %vm242_vm0 = vcmask 1043968   ;;  %vm243_vm1 = vcmask 523268   ;;  %v889_v0 = vmov 0   ;;  %s1066_s19 = smov (!%p212_p3, %s769_s19), 1  ;;  %vm248_vm3 = vcmask 517120   ;;  %v459_v24 = vld [vmem:[%s1061_s2] sm:$0xff] }
   0xc   : > { %vm244_vm2 = vmor %vm243_vm1, %vm242_vm0  ;;  %241 = vst [vmem:[#allocation2] sm:$0xf] %v889_v0  ;;  %869 = vset.pattern.permute.xlu0 %v889_v0  ;;  %870 = vset.pattern.permute.xlu1 %v889_v0  ;;  %s774_s20 = sshll.u32 %s1066_s19, 2  ;;  %v892_v10 = vmov 0.0   ;;  %vm893_vm4 = vmmov 0   ;;  %vm271_vm5 = vcmask 1041408   ;;  %v221_v40 = vlaneseq }
   0xd   : > { %245 = vst.msk [vmem:[#allocation2 + $0x4] sm:$0xff] %vm244_vm2, %v889_v0  ;;  %s215_s23 = scalar_lea.vmem %s1059_s0, %s774_s20  ;;  %811 = vmatprep.subr.bf16.mxu0 %v892_v10  ;;  %817 = vmatprep.subr.bf16.mxu1 %v892_v10  ;;  %vm264_vm6 = vcmask 982016   ;;  %vm278_vm7 = vcmask 1043456   ;;  %vm288_vm8 = vcmask 72704   ;;  %vm294_vm9 = vcmask 1045504   ;;  %s775_s22 = sshll.u32 %s1066_s19, 3 }
   0xe   : > { %v246_v1 = vld [vmem:[%s215_s23] sm:$0xf]  ;;  %813 = vmatprep.mubr.msk.bf16.mxu0 %vm893_vm4, %v892_v10  ;;  %819 = vmatprep.mubr.msk.bf16.mxu1 %vm893_vm4, %v892_v10  ;;  %vm356_vm10 = vcmask 56320   ;;  %vm290_vm11 = vcmask 97280   ;;  %vm409_vm12 = vcmask 64512   ;;  %v222_v41 = vand.u32 127, %v221_v40 }
   0xf   : > { %v247_v2 = vpack.c.bf16 %v246_v1, %v246_v1  ;;  %v250_v30 = vld [vmem:[%s1060_s1] sm:$0xf]  ;;  %v783_v35 = vld [vmem:[%s1060_s1 + $0x8] sm:$0xf]  ;;  %v782_v39 = vld [vmem:[%s1060_s1 + $0x4] sm:$0xf] }
  0x10   : > { %v227_v42 = vand.u32 7, %v222_v41  ;;  %vm466_vm15 = vcmask 523264   ;;  %vm486_vm0 = vcmask 519168   ;;  %vm522_vm1 = vcmask 195584  }
  0x11   : > { %249 = vst.msk [vmem:[#allocation2 + $0x4] sm:$0x3] %vm248_vm3, %v247_v2 }
  0x12   : > { %vm235_vm13 = vcmp.gt.s32.totalorder %v227_v42, 0  ;;  %vm238_vm14 = vcmp.lt.s32.totalorder %v227_v42, 7 }
  0x13   : > { %v993_v45 = vsel %vm235_vm13, 1.0, %v892_v10  ;;  %v996_v47 = vsel %vm238_vm14, 1.0, %v892_v10 }
  0x18   : > { %v871_v3 = vld [vmem:[#allocation2 + $0x4] ss:$0 sps:$4 sm:$0x33]  }
  0x19   : > { %v251_v4 = vld [vmem:[#allocation2] sm:$0x33]  ;;  %269 = vrot.lane.b32.xlu1 %v871_v3, %s890_s24  ;;  %v340_v5 = vrot.slane %v871_v3, 6 }
  0x1a   : > { %v778_v6 = vcombine.low %v251_v4, %v251_v4  ;;  %v779_v7 = vcombine.high %v251_v4, %v251_v4 }
  0x1c   : > { %v258_v8 = vrot.slane %v778_v6, 6  ;;  %v259_v9 = vrot.slane %v779_v7, 6 }
  0x1d   : > { %341 = vrot.lane.b32.xlu1 %v340_v5, %s891_s25 }
  0x1e   : > { %260 = vrot.lane.b32.xlu0 %v258_v8, %s891_s25 }
  0x22   : > { %262 = vrot.lane.b32.xlu0 %v259_v9, %s891_s25 }
  0x8b   : > { %v270_v11 = vpop.permute.xlu1 %269 }
  0x8f   : > { %v342_v13 = vpop.permute.xlu1 %341 }
  0x90   : > { %v261_v12 = vpop.permute.xlu0 %260  ;;  %v345_v19 = vsel %vm271_vm5, %v779_v7, %v342_v13  ;;  %v344_v21 = vsel %vm271_vm5, %v778_v6, %v342_v13 }
  0x91   : > { %v347_v22 = vsel %vm278_vm7, %v345_v19, %v270_v11  ;;  %v346_v23 = vsel %vm278_vm7, %v344_v21, %v270_v11 }
  0x94   : > { %v263_v14 = vpop.permute.xlu0 %262 }
  0x95   : > { %v265_v15 = vsel %vm264_vm6, %v261_v12, %v263_v14  ;;  %v277_v16 = vsel %vm271_vm5, %v779_v7, %v263_v14 }
  0x96   : > { %v281_v17 = vsel %vm278_vm7, %v277_v16, %v270_v11  ;;  %v274_v18 = vsel %vm271_vm5, %v778_v6, %v265_v15 }
  0x97   : > { %286 = vrot.lane.b32.xlu1 %v281_v17, %s894_s26  ;;  %v280_v20 = vsel %vm278_vm7, %v274_v18, %v270_v11 }
  0x98   : > { %284 = vrot.lane.b32.xlu0 %v280_v20, %s894_s26 }
  0x9b   : > { %354 = vrot.lane.b32.xlu1 %v347_v22, %s895_s27 }
  0x9c   : > { %352 = vrot.lane.b32.xlu0 %v346_v23, %s895_s27 }
  0x9f   : > { %407 = vrot.lane.b32.xlu1 %v347_v22, %s896_s28 }
  0xa0   : > { %405 = vrot.lane.b32.xlu0 %v346_v23, %s896_s28 }
  0xa4   : > { %462 = vperm.xlu0 %869, %v459_v24  }
 0x109   : > { %v287_v25 = vpop.permute.xlu1 %286 }
 0x10a   : > { %v285_v26 = vpop.permute.xlu0 %284 }
 0x10b   : > { %v289_v27 = vsel %vm288_vm8, %v285_v26, %v287_v25 }
 0x10c   : > { %v296_v28 = vsel %vm294_vm9, %v289_v27, 0 }
 0x10d   : > { %v355_v29 = vpop.permute.xlu1 %354  ;;  %812 = vmatpush3.bf16.msra.mxu0 %v296_v28 }
 0x10e   : > { %v353_v31 = vpop.permute.xlu0 %352  ;;  %823 = vmatprep.subr.bf16.mxu0 %v892_v10 }
 0x10f   : > { %v357_v32 = vsel %vm356_vm10, %v353_v31, %v355_v29  ;;  %v691_v29 = vld [vmem:[%s1063_s4] sm:$0xff] }
 0x110   : > { %814 = vmatmul.mubr.msk.bf16.vlgmr.msra.gmra.mxu0 %vm290_vm11, %v250_v30  ;;  %v362_v33 = vsel %vm294_vm9, %v357_v32, 0 }
 0x111   : > { %v408_v34 = vpop.permute.xlu1 %407  ;;  %818 = vmatpush3.bf16.msra.mxu1 %v362_v33  ;;  %825 = vmatprep.mubr.msk.bf16.mxu0 %vm893_vm4, %v892_v10 }
 0x112   : > { %v406_v36 = vpop.permute.xlu0 %405  ;;  %829 = vmatprep.subr.bf16.mxu1 %v892_v10 }
 0x113   : > { %v410_v37 = vsel %vm409_vm12, %v406_v36, %v408_v34 }
 0x114   : > { %v415_v38 = vsel %vm294_vm9, %v410_v37, 0  ;;  %820 = vmatmul.mubr.msk.bf16.vlgmr.msra.gmra.mxu1 %vm290_vm11, %v783_v35 }
 0x115   : > { %824 = vmatpush3.bf16.msra.mxu0 %v415_v38  ;;  %833 = vmatprep.mubr.msk.bf16.mxu1 %vm893_vm4, %v892_v10 }
 0x116   : > { %837 = vmatprep.subr.bf16.mxu0 %v892_v10 }
 0x118   : > { %826 = vmatmul.mubr.msk.bf16.vlgmr.msra.gmra.mxu0 %vm290_vm11, %v782_v39  ;;  %v488_v39 = vld [vmem:[%s1062_s3] sm:$0xf] }
 0x119   : > { %841 = vmatprep.mubr.msk.bf16.mxu0 %vm893_vm4, %v892_v10 }
 0x11f   : > { %v463_v56 = vpop.permute.xlu0 %462 }
 0x1d0   : > { %v332_v43 = vpop.f32.mrf.mxu0 }
 0x1d1   : > { %v404_v51 = vmul.f32 %v993_v45, %v332_v43  ;;  %v791_v43 = vld [vmem:[%s1062_s3 + $0x8] sm:$0xf] }
 0x1d2   : > { %v815_v44 = vpop.f32.mrf.mxu0 }
 0x1d4   : > { %v335_v46 = vpop.f32.mrf.mxu0  ;;  %v398_v48 = vpop.f32.mrf.mxu1 }
 0x1d5   : > { %v457_v52 = vmul.f32 %v996_v47, %v398_v48 }
 0x1d6   : > { %v816_v49 = vpop.f32.mrf.mxu0  ;;  %v821_v50 = vpop.f32.mrf.mxu1 }
 0x1d7   : > { %v790_v49 = vld [vmem:[%s1062_s3 + $0x4] sm:$0xf] }
 0x1d8   : > { %v451_v53 = vpop.f32.mrf.mxu0  ;;  %v401_v54 = vpop.f32.mrf.mxu1 }
 0x1d9   : > { %v452_v55 = vadd.f32 %v451_v53, %v404_v51 }
 0x1da   : > { %v827_v57 = vpop.f32.mrf.mxu0  ;;  %v822_v58 = vpop.f32.mrf.mxu1 }
 0x1db   : > { %v458_v59 = vadd.f32 %v457_v52, %v452_v55 }
 0x1dc   : > { %v454_v60 = vpop.f32.mrf.mxu0 }
 0x1dd   : > { %v465_v61 = vadd.f32 %v463_v56, %v458_v59 }
 0x1de   : > { %v828_v62 = vpop.f32.mrf.mxu0 }
 0x1df   : > { %v467_v63 = vsel %vm466_vm15, %v465_v61, 0.0  ;;  %v472_v0 = vmul.f32 %v465_v61, %v465_v61 }
 0x1e0   : > { %468 = vadd.xlane.f32.xlu1 %v467_v63 }
 0x1e1   : > { %v473_v1 = vsel %vm466_vm15, %v472_v0, 0.0 }
 0x1e2   : > { %474 = vadd.xlane.f32.xlu0 %v473_v1 }
 0x269   : > { %v469_v2 = vpop.xlane.xlu1 %468 }
 0x26a   : > { %v471_v3 = vmul.f32 0.015625, %v469_v2 }
 0x26b   : > { %v475_v4 = vpop.xlane.xlu0 %474 }
 0x26c   : > { %v477_v5 = vmul.f32 %v471_v3, %v471_v3  ;;  %v476_v6 = vmul.f32 0.015625, %v475_v4  ;;  %v480_v11 = vsub.f32 %v465_v61, %v471_v3 }
 0x26e   : > { %v478_v7 = vsub.f32 %v476_v6, %v477_v5 }
 0x270   : > { %v479_v8 = vmax.f32 %v478_v7, 0.0 }
 0x272   : > { %v481_v9 = vadd.f32 1e-05, %v479_v8 }
 0x274   : > { %877 = vrsqrt.f32 %v481_v9 }
 0x281   : > { %v878_v12 = vpop.eup %877 }
 0x282   : > { %v483_v13 = vmul.f32 %v878_v12, %v480_v11 }
 0x284   : > { %v484_v14 = vmax.f32 %v483_v13, 0.0 }
 0x286   : > { %v485_v15 = vpack.c.bf16 %v484_v14, %v484_v14 }
 0x288   : > { %487 = vst.msk [vmem:[#allocation2 + $0x4] sm:$0xf] %vm486_vm0, %v485_v15 }
 0x28f   : > { %v874_v16 = vld [vmem:[#allocation2 + $0x4] ss:$0 sps:$4 sm:$0xff]  }
 0x290   : > { %v489_v17 = vld [vmem:[#allocation2] sm:$0xff]  ;;  %504 = vrot.lane.b32.xlu1 %v874_v16, %s890_s24 }
 0x291   : > { %v786_v18 = vcombine.low %v489_v17, %v489_v17  ;;  %v787_v19 = vcombine.high %v489_v17, %v489_v17 }
 0x293   : > { %496 = vrot.lane.b32.xlu0 %v786_v18, %s891_s25 }
 0x294   : > { %498 = vrot.lane.b32.xlu1 %v787_v19, %s891_s25 }
 0x298   : > { %571 = vrot.lane.b32.xlu1 %v874_v16, %s891_s25  ;;  %s219_s25 = scalar_lea.vmem %s1064_s5, %s775_s22 }
 0x302   : > { %v505_v20 = vpop.permute.xlu1 %504 }
 0x303   : > { %584 = vrot.lane.b32.xlu1 %v505_v20, %s895_s27  ;;  %518 = vrot.lane.b32.xlu0 %v505_v20, %s894_s26 }
 0x305   : > { %v497_v21 = vpop.permute.xlu0 %496 }
 0x306   : > { %v499_v22 = vpop.permute.xlu1 %498 }
 0x307   : > { %v500_v23 = vsel %vm264_vm6, %v497_v21, %v499_v22  ;;  %639 = vrot.lane.b32.xlu0 %v505_v20, %s896_s28  ;;  %v511_v26 = vsel %vm278_vm7, %v787_v19, %v499_v22 }
 0x308   : > { %v508_v24 = vsel %vm278_vm7, %v786_v18, %v500_v23 }
 0x309   : > { %514 = vrot.lane.b32.xlu1 %v508_v24, %s894_s26 }
 0x30a   : > { %v572_v25 = vpop.permute.xlu1 %571 }
 0x30b   : > { %516 = vrot.lane.b32.xlu0 %v511_v26, %s894_s26  ;;  %v574_v27 = vsel %vm278_vm7, %v786_v18, %v572_v25  ;;  %v575_v28 = vsel %vm278_vm7, %v787_v19, %v572_v25 }
 0x30d   : > { %580 = vrot.lane.b32.xlu1 %v574_v27, %s895_s27 }
 0x30f   : > { %582 = vrot.lane.b32.xlu0 %v575_v28, %s895_s27 }
 0x311   : > { %635 = vrot.lane.b32.xlu1 %v574_v27, %s896_s28 }
 0x313   : > { %637 = vrot.lane.b32.xlu0 %v575_v28, %s896_s28 }
 0x315   : > { %694 = vperm.xlu1 %870, %v691_v29  }
 0x375   : > { %v585_v30 = vpop.permute.xlu1 %584  ;;  %v519_v31 = vpop.permute.xlu0 %518 }
 0x376   : > { %v592_v32 = vsel %vm278_vm7, %v585_v30, 0  ;;  %v527_v33 = vsel %vm278_vm7, %v519_v31, 0 }
 0x377   : > { %830 = vmatpush3.bf16.msra.mxu1 %v527_v33  ;;  %838 = vmatpush3.bf16.msra.mxu0 %v592_v32 }
 0x378   : > { %831 = vmatprep.subr.bf16.mxu1 %v892_v10  ;;  %839 = vmatprep.subr.bf16.mxu0 %v892_v10 }
 0x379   : > { %v640_v34 = vpop.permute.xlu0 %639 }
 0x37a   : > { %v647_v41 = vsel %vm278_vm7, %v640_v34, 0 }
 0x37b   : > { %v515_v35 = vpop.permute.xlu1 %514 }
 0x37d   : > { %v517_v36 = vpop.permute.xlu0 %516 }
 0x37e   : > { %v520_v37 = vsel %vm288_vm8, %v515_v35, %v517_v36 }
 0x37f   : > { %832 = vmatpush3.bf16.msra.mxu1 %v520_v37  ;;  %v581_v38 = vpop.permute.xlu1 %580 }
 0x380   : > { %845 = vmatprep.subr.bf16.mxu1 %v892_v10 }
 0x381   : > { %v583_v40 = vpop.permute.xlu0 %582 }
 0x382   : > { %v586_v42 = vsel %vm356_vm10, %v581_v38, %v583_v40  ;;  %834 = vmatmul.mubr.msk.bf16.vlgmr.msra.gmra.mxu1 %vm522_vm1, %v488_v39 }
 0x383   : > { %840 = vmatpush3.bf16.msra.mxu0 %v586_v42  ;;  %846 = vmatpush3.bf16.msra.mxu1 %v647_v41  ;;  %v636_v44 = vpop.permute.xlu1 %635 }
 0x384   : > { %847 = vmatprep.subr.bf16.mxu1 %v892_v10  ;;  %849 = vmatprep.mubr.msk.bf16.mxu1 %vm893_vm4, %v892_v10 }
 0x385   : > { %v638_v46 = vpop.permute.xlu0 %637 }
 0x386   : > { %v641_v48 = vsel %vm409_vm12, %v636_v44, %v638_v46  ;;  %842 = vmatmul.mubr.msk.bf16.vlgmr.msra.gmra.mxu0 %vm522_vm1, %v791_v43 }
 0x387   : > { %848 = vmatpush3.bf16.msra.mxu1 %v641_v48 }
 0x38a   : > { %850 = vmatmul.mubr.msk.bf16.vlgmr.msra.gmra.mxu1 %vm522_vm1, %v790_v49 }
 0x390   : > { %v695_v60 = vpop.permute.xlu1 %694 }
 0x442   : > { %v563_v50 = vpop.f32.mrf.mxu1 }
 0x443   : > { %v634_v10 = vmul.f32 %v993_v45, %v563_v50 }
 0x444   : > { %v835_v51 = vpop.f32.mrf.mxu1 }
 0x446   : > { %v566_v52 = vpop.f32.mrf.mxu1  ;;  %v628_v53 = vpop.f32.mrf.mxu0 }
 0x447   : > { %v689_v56 = vmul.f32 %v996_v47, %v628_v53 }
 0x448   : > { %v836_v54 = vpop.f32.mrf.mxu1  ;;  %v843_v55 = vpop.f32.mrf.mxu0 }
 0x44a   : > { %v683_v57 = vpop.f32.mrf.mxu1  ;;  %v631_v58 = vpop.f32.mrf.mxu0 }
 0x44b   : > { %v684_v59 = vadd.f32 %v683_v57, %v634_v10 }
 0x44c   : > { %v851_v61 = vpop.f32.mrf.mxu1  ;;  %v844_v62 = vpop.f32.mrf.mxu0 }
 0x44d   : > { %v690_v63 = vadd.f32 %v689_v56, %v684_v59 }
 0x44e   : > { %v686_v0 = vpop.f32.mrf.mxu1 }
 0x44f   : > { %v697_v1 = vadd.f32 %v695_v60, %v690_v63 }
 0x450   : > { %v852_v2 = vpop.f32.mrf.mxu1 }
 0x451   : > { %v698_v3 = vsel %vm466_vm15, %v697_v1, 0.0  ;;  %v702_v4 = vmul.f32 %v697_v1, %v697_v1 }
 0x452   : > { %699 = vadd.xlane.f32.xlu0 %v698_v3 }
 0x453   : > { %v703_v5 = vsel %vm466_vm15, %v702_v4, 0.0 }
 0x454   : > { %704 = vadd.xlane.f32.xlu1 %v703_v5 }
 0x4db   : > { %v700_v45 = vpop.xlane.xlu0 %699 }
 0x4dc   : > { %v701_v47 = vmul.f32 0.015625, %v700_v45 }
 0x4dd   : > { %v705_v6 = vpop.xlane.xlu1 %704 }
 0x4de   : > { %v707_v7 = vmul.f32 %v701_v47, %v701_v47  ;;  %v706_v8 = vmul.f32 0.015625, %v705_v6  ;;  %v710_v13 = vsub.f32 %v697_v1, %v701_v47 }
 0x4e0   : > { %v708_v9 = vsub.f32 %v706_v8, %v707_v7 }
 0x4e2   : > { %v709_v11 = vmax.f32 %v708_v9, 0.0 }
 0x4e4   : > { %v711_v12 = vadd.f32 1e-05, %v709_v11 }
 0x4e6   : > { %879 = vrsqrt.f32 %v711_v12 }
 0x4f3   : > { %v880_v14 = vpop.eup %879 }
 0x4f4   : > { %v713_v15 = vmul.f32 %v880_v14, %v710_v13 }
 0x4f6   : > { %v714_v16 = vmax.f32 %v713_v15, 0.0 }
 0x4f8   : > { %715 = vst.msk [vmem:[%s219_s25] sm:$0xff] %vm466_vm15, %v714_v16 }
 0x4f9 PF: > { %s15_s18 = sadd.s32 1, %s887_s18  }
 0x4fa   : > { %p12_p4 = scmp.ge.s32.totalorder %s15_s18, 4  }
 0x4fc   :  { %14 = sbr.rel (!%p12_p4) target bundleno = 1 (0x1), region = 74 }

// kernel: dncn_forward.21
= control target key start
LH: loop header
LB: loop body
LE: loop exit
PB: predicated region body
PF: predicated region fallthrough
CT: control target
= control target key end

     0   :  { %s1349_s18 = smov 0   ;;  %s1610_s0 = inlined_call_operand.vmem [shape: f32[2,1,256], index: 0, kind: input, shape index: {}]   ;;  %s1611_s1 = inlined_call_operand.vmem [shape: bf16[3,4,3], index: 1, kind: input, shape index: {}]   ;;  %s1612_s2 = inlined_call_operand.vmem [shape: f32[4,1], index: 2, kind: input, shape index: {}]   ;;  %s1613_s3 = inlined_call_operand.vmem [shape: bf16[3,4,12], index: 3, kind: input, shape index: {}]   ;;  %s1614_s4 = inlined_call_operand.vmem [shape: f32[4,1], index: 4, kind: input, shape index: {}]   ;;  %s1615_s5 = inlined_call_operand.vmem [shape: f32[2,4,256], index: 5, kind: output, shape index: {}]  }
   0x1 LB: > { %s1217_s19 = sadd.s32 4294967295, %s1308_s18   ;;  %p1221_p0 = scmp.ge.s32.totalorder %s1308_s18, 1  ;;  %s1308_s18 = sphi %s1349_s18, %s15_s18  }
   0x2   : > { %p186_p1 = scmp.lt.s32.totalorder %s1308_s18, 3 }
   0x4   : > { %p187_p2 = pnand %p1221_p0, %p186_p1 }
   0x5   : > { %p213_p3 = scmp.lt.s32.totalorder (!%p187_p2), %s1217_s19, 1  ;;  %s1312_s24 = smov (!%p187_p2), 96  }
   0x6   : > { %190 = sbr.rel (%p187_p2) target bundleno = 1333 (0x535), region = 40  ;;  %s1313_s25 = smov (!%p187_p2), 112  }
   0x7   : > { %s1314_s26 = smov (!%p187_p2), 17   ;;  %s1315_s27 = smov (!%p187_p2), 16  }
   0x8   : > { %s1316_s28 = smov (!%p187_p2), 15  }
   0xb   : > { %v223_v0 = vlaneseq  ;;  %v1310_v1 = vmov 0   ;;  %v1311_v2 = vmov 1983009808   ;;  %s1619_s19 = smov (!%p213_p3, %s1217_s19), 1  ;;  %vm289_vm0 = vcmask 1040384  }
   0xc   : > { %263 = vst [vmem:[#allocation2 + $0x6] sm:$0x3] %v1310_v1  ;;  %v282_v3 = vunpack.c.l.s4 %v1311_v2  ;;  %262 = vst [vmem:[#allocation2] sm:$0x3] %v1310_v1  ;;  %442 = vmatprep.mubr.bf16.mxu0 %v1310_v1  ;;  %623 = vmatprep.mubr.bf16.mxu1 %v1310_v1  ;;  %vm290_vm1 = vsmask.f32 256 }
   0xd   : > { %v267_v4 = vshrl.u32 %v223_v0, 7  ;;  %1286 = vset.pattern.permute.xlu1 %v1310_v1  ;;  %1287 = vset.pattern.permute.xlu0 %v1310_v1  ;;  %s1222_s20 = sshll.u32 %s1619_s19, 1  ;;  %vm292_vm2 = vcmask 1042434   ;;  %vm293_vm3 = vsmask.f32 2304  ;;  %vm1371_vm4 = vmand %vm289_vm0, %vm290_vm1  ;;  %vm369_vm7 = vcmask 785408  }
   0xe   : > { %v283_v5 = vunpack.c.0.s8 %v282_v3  ;;  %s216_s23 = scalar_lea.vmem %s1610_s0, %s1222_s20  ;;  %vm294_vm5 = vmand %vm292_vm2, %vm293_vm3  ;;  %v296_v14 = vld [vmem:[#allocation2 + $0x2] sm:$0x5]  ;;  %vm337_vm8 = vcmask 916480   ;;  %vm401_vm9 = vcmask 1041408   ;;  %vm394_vm10 = vcmask 138240   ;;  %s1248_s22 = sshll.u32 %s1619_s19, 3 }
   0xf   : > { %v268_v6 = vsub.s32 0, %v267_v4  ;;  %v272_v7 = vsub.s32 1, %v267_v4  ;;  %v264_v8 = vld [vmem:[%s216_s23] sm:$0x3]  ;;  %vm295_vm6 = vmor %vm294_vm5, %vm1371_vm4  ;;  %vm643_vm11 = vcmask 130048   ;;  %vm579_vm12 = vcmask 121856  }
  0x10   : > { %v1375_v12 = vsub.s32 %v283_v5, %v267_v4  ;;  %vm397_vm13 = vcmask 23552   ;;  %vm708_vm2 = vcmask 1043456   ;;  %vm842_vm3 = vcmask 1045504  }
  0x11   : > { %v269_v10 = vrot.slane %v264_v8, %v268_v6  ;;  %v273_v11 = vrot.slane %v264_v8, %v272_v7 }
  0x13   : > { %v1229_v13 = vpack.c.bf16 %v273_v11, %v269_v10 }
  0x15   : > { %v287_v15 = vrot.slane %v1229_v13, %v1375_v12 }
  0x17   : > { %v297_v16 = vsel %vm295_vm6, %v287_v15, %v296_v14 }
  0x18   : > { %298 = vst [vmem:[#allocation2 + $0x2] sm:$0x5] %v297_v16 }
  0x1f   : > { %v301_v17 = vld [vmem:[#allocation2 + $0x2] sm:$0x15] }
  0x20   : > { %v300_v18 = vld [vmem:[#allocation2] sm:$0x15]  ;;  %v351_v20 = vrot.slane %v301_v17, %v1375_v12  ;;  %v344_v27 = vcombine.high %v301_v17, %v301_v17 }
  0x21   : > { %v455_v19 = vld [vmem:[#allocation2 + $0x2] sm:$0x15]  ;;  %v1382_v21 = vrot.slane %v300_v18, %v1375_v12  ;;  %v303_v24 = vcombine.high %v300_v18, %v300_v18 }
  0x22   : > { %v1232_v22 = vld.sshfl [vmem:[#allocation2 + $0x2] sm:$0x11 pattern:$0x76325410]  ;;  %v507_v23 = vrot.slane %v455_v19, %v1375_v12  ;;  %v500_v28 = vcombine.high %v455_v19, %v455_v19  ;;  %v360_v29 = vrot.slane %v351_v20, 7  ;;  %v359_v37 = vcombine.high %v351_v20, %v351_v20 }
  0x23   : > { %v486_v25 = vshll.u32 %v1232_v22, 16  ;;  %v484_v26 = vcombine.high %v1232_v22, %v1232_v22  ;;  %v323_v30 = vshll.u32 %v1382_v21, 16  ;;  %v317_v32 = vrot.slane %v303_v24, %v1375_v12  ;;  %v453_v58 = vld [vmem:[#allocation2] sm:$0x15] }
  0x24   : > { %v542_v31 = vshll.u32 %v507_v23, 16  ;;  %v1389_v34 = vcombine.high %v1382_v21, %v1382_v21  ;;  %363 = vrot.lane.b32.xlu1 %v360_v29, %s1312_s24  ;;  %v358_v40 = vrot.slane %v344_v27, %v1375_v12  ;;  %v514_v41 = vrot.slane %v500_v28, %v1375_v12 }
  0x25   : > { %v489_v33 = vshll.u32 %v484_v26, 16  ;;  %v1266_v35 = vpack.i.bf16 %v486_v25, %v323_v30  ;;  %v329_v36 = vshll.u32 %v317_v32, 16  ;;  %v515_v42 = vcombine.high %v507_v23, %v507_v23 }
  0x26   : > { %v326_v39 = vshll.u32 %v1389_v34, 16  ;;  %v361_v44 = vrot.slane %v359_v37, 7  ;;  %v362_v45 = vrot.slane %v358_v40, 7  ;;  %v548_v47 = vshll.u32 %v514_v41, 16 }
  0x27   : > { %v1271_v38 = vpack.i.bf16 %v542_v31, %v489_v33  ;;  %1267 = vrot.lane.b32.xlu0 %v1266_v35, %s1313_s25  ;;  %v545_v46 = vshll.u32 %v515_v42, 16  ;;  %v516_v48 = vrot.slane %v507_v23, 7  ;;  %v518_v50 = vrot.slane %v514_v41, 7 }
  0x28   : > { %v1276_v43 = vpack.i.bf16 %v329_v36, %v326_v39  ;;  %v517_v51 = vrot.slane %v515_v42, 7  ;;  %v457_v62 = vcombine.high %v453_v58, %v453_v58  ;;  %v464_v63 = vrot.slane %v453_v58, %v1375_v12 }
  0x29   : > { %1272 = vrot.lane.b32.xlu1 %v1271_v38, %s1313_s25  ;;  %v1281_v49 = vpack.i.bf16 %v548_v47, %v545_v46  ;;  %v1317_v46 = vmov 65535  }
  0x2a   : > { %v471_v10 = vrot.slane %v457_v62, %v1375_v12  ;;  %v472_v11 = vcombine.high %v464_v63, %v464_v63  ;;  %v402_v47 = vsel %vm289_vm0, 4294967295, %v1317_v46 }
  0x2b   : > { %1277 = vrot.lane.b32.xlu0 %v1276_v43, %s1313_s25 }
  0x2d   : > { %365 = vrot.lane.b32.xlu1 %v361_v44, %s1312_s24 }
  0x2f   : > { %367 = vrot.lane.b32.xlu0 %v362_v45, %s1312_s24 }
  0x31   : > { %519 = vrot.lane.b32.xlu1 %v516_v48, %s1312_s24 }
  0x33   : > { %1282 = vrot.lane.b32.xlu0 %v1281_v49, %s1313_s25 }
  0x35   : > { %523 = vrot.lane.b32.xlu1 %v518_v50, %s1312_s24  ;;  %v403_v50 = vsel %vm401_vm9, %v402_v47, 0 }
  0x37   : > { %521 = vrot.lane.b32.xlu0 %v517_v51, %s1312_s24 }
  0x96   : > { %v364_v52 = vpop.permute.xlu1 %363 }
  0x99   : > { %v1404_v53 = vpop.permute.xlu0 %1267 }
  0x9a   : > { %v1270_v5 = vunpack.i.h.bf16 %v1404_v53  ;;  %v1269_v24 = vunpack.i.l.bf16 %v1404_v53 }
  0x9b   : > { %v1273_v54 = vpop.permute.xlu1 %1272 }
  0x9c   : > { %v1274_v2 = vunpack.i.l.bf16 %v1273_v54  ;;  %v1275_v13 = vunpack.i.h.bf16 %v1273_v54  ;;  %v527_v41 = vsel %vm1371_vm4, %v464_v63, %v1270_v5 }
  0x9d   : > { %v1278_v55 = vpop.permute.xlu0 %1277 }
  0x9e   : > { %v1280_v56 = vunpack.i.h.bf16 %v1278_v55  ;;  %v1279_v6 = vunpack.i.l.bf16 %v1278_v55  ;;  %v495_v15 = vsel %vm337_vm8, %v1270_v5, %v1274_v2  ;;  %v529_v22 = vsel %vm1371_vm4, %v471_v10, %v1274_v2 }
  0x9f   : > { %v366_v57 = vpop.permute.xlu1 %365  ;;  %v528_v23 = vsel %vm1371_vm4, %v472_v11, %v495_v15  ;;  %v1318_v15 = vmov 0.0  }
  0xa0   : > { %v374_v61 = vsel %vm1371_vm4, %v317_v32, %v1280_v56  ;;  %v339_v18 = vsel %vm337_vm8, %v1279_v6, %v1280_v56  ;;  %v370_v27 = vsel %vm369_vm7, %v364_v52, %v366_v57  ;;  %v338_v31 = vsel %vm337_vm8, %v1269_v24, %v1279_v6  ;;  %v1231_v6 = vld [vmem:[%s1611_s1 + $0x2] sm:$0x3] }
  0xa1   : > { %v368_v59 = vpop.permute.xlu0 %367  ;;  %v373_v29 = vsel %vm1371_vm4, %v1389_v34, %v339_v18  ;;  %v372_v35 = vsel %vm1371_vm4, %v1382_v21, %v338_v31  ;;  %v561_v34 = vsel %vm1371_vm4, %v464_v63, %v1275_v13  ;;  %v700_v21 = vld [vmem:[%s1612_s2] sm:$0xf] }
  0xa2   : > { %v371_v60 = vsel %vm369_vm7, %v366_v57, %v368_v59  ;;  %v381_v33 = vsel %vm289_vm0, %v373_v29, %v370_v27  ;;  %v378_v38 = vsel %vm289_vm0, %v372_v35, %v364_v52 }
  0xa3   : > { %v520_v3 = vpop.permute.xlu1 %519  ;;  %v384_v4 = vsel %vm289_vm0, %v374_v61, %v371_v60  ;;  %v299_v60 = vld [vmem:[%s1611_s1] sm:$0x3] }
  0xa4   : > { %392 = vrot.lane.b32.xlu1 %v384_v4, %s1314_s26  ;;  %v565_v37 = vsel %vm289_vm0, %v561_v34, %v520_v3  ;;  %v532_v42 = vsel %vm289_vm0, %v527_v41, %v520_v3  ;;  %v1233_v4 = vld [vmem:[%s1611_s1 + $0x4] sm:$0x3] }
  0xa5   : > { %v1283_v7 = vpop.permute.xlu0 %1282 }
  0xa6   : > { %v1284_v8 = vunpack.i.l.bf16 %v1283_v7  ;;  %v1285_v30 = vunpack.i.h.bf16 %v1283_v7  ;;  %v224_v7 = vand.u32 127, %v223_v0 }
  0xa7   : > { %v524_v14 = vpop.permute.xlu1 %523 }
  0xa8   : > { %v556_v17 = vsel %vm337_vm8, %v1275_v13, %v1284_v8  ;;  %v557_v36 = vsel %vm337_vm8, %v1284_v8, %v1285_v30  ;;  %v225_v8 = vadd.s32 128, %v224_v7 }
  0xa9   : > { %v522_v16 = vpop.permute.xlu0 %521  ;;  %v562_v28 = vsel %vm1371_vm4, %v472_v11, %v556_v17  ;;  %v563_v39 = vsel %vm1371_vm4, %v471_v10, %v557_v36  ;;  %v230_v10 = vand.u32 15, %v224_v7  ;;  %vm838_vm4 = vcmask 97280  }
  0xaa   : > { %v525_v19 = vsel %vm369_vm7, %v520_v3, %v522_v16  ;;  %v526_v20 = vsel %vm369_vm7, %v522_v16, %v524_v14  ;;  %v237_v11 = vand.u32 15, %v225_v8 }
  0xab   : > { %v538_v25 = vsel %vm289_vm0, %v529_v22, %v526_v20  ;;  %v535_v26 = vsel %vm289_vm0, %v528_v23, %v525_v19  ;;  %v567_v32 = vsel %vm289_vm0, %v562_v28, %v525_v19  ;;  %v569_v40 = vsel %vm289_vm0, %v563_v39, %v526_v20 }
  0xac   : > { %641 = vrot.lane.b32.xlu0 %v538_v25, %s1315_s27  ;;  %639 = vrot.lane.b32.xlu1 %v535_v26, %s1315_s27  ;;  %vm250_vm14 = vcmp.gt.s32.totalorder %v230_v10, 0  ;;  %vm256_vm15 = vcmp.lt.s32.totalorder %v230_v10, 15  ;;  %vm251_vm0 = vcmp.gt.s32.totalorder %v237_v11, 0  ;;  %vm257_vm1 = vcmp.lt.s32.totalorder %v237_v11, 15 }
  0xad   : > { %v1484_v16 = vsel %vm250_vm14, 1.0, %v1318_v15  ;;  %v1486_v18 = vsel %vm256_vm15, 1.0, %v1318_v15  ;;  %v1488_v20 = vsel %vm251_vm0, 1.0, %v1318_v15  ;;  %v1492_v25 = vsel %vm257_vm1, 1.0, %v1318_v15 }
  0xb0   : > { %575 = vrot.lane.b32.xlu1 %v567_v32, %s1316_s28  ;;  %390 = vrot.lane.b32.xlu0 %v381_v33, %s1314_s26 }
  0xb4   : > { %573 = vrot.lane.b32.xlu1 %v565_v37, %s1316_s28  ;;  %388 = vrot.lane.b32.xlu0 %v378_v38, %s1314_s26 }
  0xb8   : > { %577 = vrot.lane.b32.xlu0 %v569_v40, %s1316_s28  ;;  %703 = vperm.xlu1 %1286, %v700_v21  }
  0xbc   : > { %637 = vrot.lane.b32.xlu0 %v532_v42, %s1315_s27 }
 0x116   : > { %v393_v43 = vpop.permute.xlu1 %392 }
 0x11e   : > { %v642_v44 = vpop.permute.xlu0 %641  ;;  %v640_v45 = vpop.permute.xlu1 %639 }
 0x11f   : > { %v645_v52 = vsel %vm643_vm11, %v640_v45, %v642_v44 }
 0x120   : > { %v653_v57 = vand.u32 %v645_v52, %v403_v50 }
 0x122   : > { %v576_v48 = vpop.permute.xlu1 %575  ;;  %v391_v49 = vpop.permute.xlu0 %390 }
 0x123   : > { %v396_v9 = vsel %vm394_vm10, %v391_v49, %v393_v43 }
 0x124   : > { %v408_v51 = vand.u32 %v403_v50, %v396_v9 }
 0x126   : > { %424 = vmatprep.subr.bf16.mxu0 %v408_v51  ;;  %v389_v53 = vpop.permute.xlu0 %388  ;;  %v574_v54 = vpop.permute.xlu1 %573 }
 0x127   : > { %v395_v55 = vsel %vm394_vm10, %v389_v53, %v391_v49  ;;  %v580_v58 = vsel %vm579_vm12, %v574_v54, %v576_v48 }
 0x128   : > { %v405_v56 = vand.u32 %v403_v50, %v395_v55  ;;  %v586_v63 = vand.u32 %v580_v58, %v403_v50 }
 0x12a   : > { %425 = vmatpush1.bf16.msra.mxu0 %v405_v56  ;;  %v578_v59 = vpop.permute.xlu0 %577 }
 0x12b   : > { %669 = vmatprep.subr.bf16.mxu0 %v653_v57  ;;  %v581_v61 = vsel %vm579_vm12, %v576_v48, %v578_v59 }
 0x12c   : > { %v589_v62 = vand.u32 %v581_v61, %v403_v50 }
 0x12d   : > { %1230 = vmatmul.mubr.msk.bf16.vlgmr.msra.gmra.mxu0 %vm397_vm13, %v299_v60 }
 0x12e   : > { %605 = vmatprep.subr.bf16.mxu1 %v589_v62  ;;  %v638_v2 = vpop.permute.xlu0 %637  ;;  %687 = vmatprep.mubr.bf16.mxu0 %v1310_v1 }
 0x12f   : > { %v644_v3 = vsel %vm643_vm11, %v638_v2, %v640_v45  ;;  %606 = vmatpush1.bf16.msra.mxu1 %v586_v63 }
 0x130   : > { %v650_v5 = vand.u32 %v644_v3, %v403_v50 }
 0x132   : > { %1234 = vmatmul.mubr.msk.bf16.vlgmr.msra.gmra.mxu1 %vm397_vm13, %v1233_v4  ;;  %670 = vmatpush1.bf16.msra.mxu0 %v650_v5 }
 0x133   : > { %881 = vmatprep.mubr.bf16.mxu1 %v1310_v1  ;;  %v704_v31 = vpop.permute.xlu1 %703 }
 0x135   : > { %1235 = vmatmul.mubr.msk.bf16.vlgmr.msra.gmra.mxu0 %vm397_vm13, %v1231_v6 }
 0x136   : > { %1048 = vmatprep.mubr.bf16.mxu0 %v1310_v1 }
 0x1ed   : > { %v444_v13 = vpop.f32.mrf.mxu0 }
 0x1ee   : > { %v632_v0 = vmul.f32 %v1484_v16, %v444_v13 }
 0x1ef   : > { %v446_v14 = vpop.f32.mrf.mxu0 }
 0x1f0   : > { %v633_v27 = vmul.f32 %v1488_v20, %v446_v14 }
 0x1f1   : > { %v448_v17 = vpop.f32.mrf.mxu0 }
 0x1f2   : > { %v625_v19 = vpop.f32.mrf.mxu1 }
 0x1f3   : > { %v449_v22 = vpop.f32.mrf.mxu0  ;;  %v696_v23 = vmul.f32 %v1486_v18, %v625_v19 }
 0x1f4   : > { %v627_v24 = vpop.f32.mrf.mxu1 }
 0x1f5   : > { %v689_v26 = vpop.f32.mrf.mxu0  ;;  %v697_v32 = vmul.f32 %v1492_v25, %v627_v24 }
 0x1f6   : > { %v690_v28 = vadd.f32 %v689_v26, %v632_v0  ;;  %v629_v29 = vpop.f32.mrf.mxu1 }
 0x1f7   : > { %v691_v30 = vpop.f32.mrf.mxu0 }
 0x1f8   : > { %v698_v33 = vadd.f32 %v696_v23, %v690_v28  ;;  %v692_v35 = vadd.f32 %v691_v30, %v633_v27  ;;  %v630_v36 = vpop.f32.mrf.mxu1 }
 0x1f9   : > { %v693_v34 = vpop.f32.mrf.mxu0 }
 0x1fa   : > { %v699_v37 = vadd.f32 %v697_v32, %v692_v35  ;;  %v706_v38 = vadd.f32 %v704_v31, %v698_v33 }
 0x1fb   : > { %v694_v39 = vpop.f32.mrf.mxu0 }
 0x1fc   : > { %v707_v21 = vadd.f32 %v704_v31, %v699_v37  ;;  %v716_v40 = vmul.f32 %v706_v38, %v706_v38  ;;  %v709_v41 = vsel %vm708_vm2, %v706_v38, 0.0 }
 0x1fe   : > { %v710_v42 = vsel %vm708_vm2, %v707_v21, 0.0  ;;  %v717_v43 = vmul.f32 %v707_v21, %v707_v21  ;;  %v718_v45 = vsel %vm708_vm2, %v716_v40, 0.0 }
 0x1ff   : > { %v711_v44 = vadd.f32 %v710_v42, %v709_v41 }
 0x200   : > { %v719_v46 = vsel %vm708_vm2, %v717_v43, 0.0 }
 0x201   : > { %712 = vadd.xlane.f32.xlu0 %v711_v44  ;;  %v720_v47 = vadd.f32 %v719_v46, %v718_v45 }
 0x203   : > { %721 = vadd.xlane.f32.xlu1 %v720_v47 }
 0x28a   : > { %v713_v48 = vpop.xlane.xlu0 %712 }
 0x28b   : > { %v715_v49 = vmul.f32 0.00390625, %v713_v48 }
 0x28c   : > { %v722_v50 = vpop.xlane.xlu1 %721 }
 0x28d   : > { %v723_v9 = vmul.f32 0.00390625, %v722_v50  ;;  %v724_v51 = vmul.f32 %v715_v49, %v715_v49  ;;  %v727_v55 = vsub.f32 %v706_v38, %v715_v49  ;;  %v728_v56 = vsub.f32 %v707_v21, %v715_v49 }
 0x28f   : > { %v725_v52 = vsub.f32 %v723_v9, %v724_v51 }
 0x291   : > { %v726_v53 = vmax.f32 %v725_v52, 0.0 }
 0x293   : > { %v729_v54 = vadd.f32 1e-05, %v726_v53 }
 0x295   : > { %1298 = vrsqrt.f32 %v729_v54 }
 0x2a2   : > { %v1299_v57 = vpop.eup %1298 }
 0x2a3   : > { %v731_v58 = vmul.f32 %v1299_v57, %v727_v55  ;;  %v732_v59 = vmul.f32 %v1299_v57, %v728_v56 }
 0x2a5   : > { %v733_v60 = vmax.f32 %v731_v58, 0.0  ;;  %v734_v61 = vmax.f32 %v732_v59, 0.0 }
 0x2a7   : > { %v1236_v62 = vpack.c.bf16 %v734_v61, %v733_v60 }
 0x2a9   : > { %1237 = vst.sshfl [vmem:[#allocation2 + $0x2] sm:$0x33 pattern:$0x76325410] %v1236_v62 }
 0x2b0   : > { %v750_v63 = vld [vmem:[#allocation2] sm:$0x3f] }
 0x2b1   : > { %v751_v2 = vld [vmem:[#allocation2 + $0x2] sm:$0x3f]  ;;  %v1501_v4 = vrot.slane %v750_v63, %v1375_v12  ;;  %v769_v8 = vcombine.low %v750_v63, %v750_v63  ;;  %v753_v39 = vcombine.high %v750_v63, %v750_v63 }
 0x2b2   : > { %v894_v3 = vld [vmem:[#allocation2 + $0x2] sm:$0x3f]  ;;  %v794_v5 = vrot.slane %v751_v2, %v1375_v12  ;;  %v787_v13 = vcombine.high %v751_v2, %v751_v2 }
 0x2b3   : > { %782 = vrot.lane.b32.xlu0 %v1501_v4, %s1313_s25  ;;  %v935_v7 = vrot.slane %v894_v3, %v1375_v12  ;;  %v776_v11 = vrot.slane %v769_v8, %v1375_v12  ;;  %v1293_v17 = vld [vmem:[#allocation2 + $0x2] ss:$0 sps:$4 sm:$0xff]   ;;  %v970_v0 = vcombine.low %v894_v3, %v894_v3  ;;  %v928_v26 = vcombine.high %v894_v3, %v894_v3 }
 0x2b4   : > { %v802_v6 = vcombine.low %v794_v5, %v794_v5  ;;  %v801_v15 = vrot.slane %v787_v13, %v1375_v12  ;;  %v920_v22 = vrot.slane %v1293_v17, %v1375_v12  ;;  %v892_v37 = vld [vmem:[#allocation2] sm:$0x3f]  ;;  %v767_v44 = vrot.slane %v753_v39, %v1375_v12 }
 0x2b5   : > { %v943_v10 = vcombine.low %v935_v7, %v935_v7  ;;  %v777_v14 = vcombine.high %v776_v11, %v776_v11  ;;  %v977_v24 = vrot.slane %v970_v0, %v1375_v12  ;;  %v942_v28 = vrot.slane %v928_v26, %v1375_v12  ;;  %v1124_v17 = vld [vmem:[%s1614_s4] sm:$0xf] }
 0x2b6   : > { %804 = vrot.lane.b32.xlu1 %v802_v6, %s1312_s24  ;;  %v803_v19 = vcombine.low %v801_v15, %v801_v15  ;;  %v921_v23 = vcombine.high %v920_v22, %v920_v22  ;;  %v903_v21 = vrot.slane %v892_v37, %v1375_v12  ;;  %v768_v9 = vcombine.high %v1501_v4, %v1501_v4 }
 0x2b7   : > { %806 = vrot.lane.b32.xlu0 %v794_v5, %s1312_s24  ;;  %v978_v27 = vcombine.high %v977_v24, %v977_v24  ;;  %v944_v29 = vcombine.low %v942_v28, %v942_v28  ;;  %v896_v51 = vcombine.high %v892_v37, %v892_v37 }
 0x2b8   : > { %v911_v60 = vcombine.high %v903_v21, %v903_v21 }
 0x2b9   : > { %v910_v61 = vrot.slane %v896_v51, %v1375_v12 }
 0x2ba   : > { %945 = vrot.lane.b32.xlu1 %v943_v10, %s1312_s24 }
 0x2bb   : > { %983 = vrot.lane.b32.xlu0 %v935_v7, %s1313_s25 }
 0x2be   : > { %780 = vrot.lane.b32.xlu1 %v777_v14, %s1313_s25 }
 0x2bf   : > { %778 = vrot.lane.b32.xlu0 %v776_v11, %s1313_s25 }
 0x2c2   : > { %808 = vrot.lane.b32.xlu1 %v803_v19, %s1312_s24 }
 0x2c3   : > { %922 = vrot.lane.b32.xlu0 %v920_v22, %s1313_s25 }
 0x2c6   : > { %924 = vrot.lane.b32.xlu1 %v921_v23, %s1313_s25 }
 0x2c7   : > { %979 = vrot.lane.b32.xlu0 %v977_v24, %s1313_s25 }
 0x2ca   : > { %981 = vrot.lane.b32.xlu1 %v978_v27, %s1313_s25  ;;  %s221_s25 = scalar_lea.vmem %s1615_s5, %s1248_s22 }
 0x2cb   : > { %947 = vrot.lane.b32.xlu0 %v935_v7, %s1312_s24 }
 0x2ce   : > { %949 = vrot.lane.b32.xlu1 %v944_v29, %s1312_s24  ;;  %v749_v29 = vld [vmem:[%s1613_s3] sm:$0x3] }
 0x325   : > { %v783_v30 = vpop.permute.xlu0 %782 }
 0x326   : > { %v820_v49 = vsel %vm401_vm9, %v767_v44, %v783_v30 }
 0x328   : > { %v805_v31 = vpop.permute.xlu1 %804 }
 0x329   : > { %v807_v32 = vpop.permute.xlu0 %806 }
 0x32a   : > { %v810_v59 = vsel %vm369_vm7, %v805_v31, %v807_v32 }
 0x32c   : > { %v946_v33 = vpop.permute.xlu1 %945 }
 0x32d   : > { %v984_v35 = vpop.permute.xlu0 %983 }
 0x330   : > { %v781_v36 = vpop.permute.xlu1 %780 }
 0x331   : > { %v779_v34 = vpop.permute.xlu0 %778  ;;  %v785_v46 = vsel %vm337_vm8, %v781_v36, %v783_v30 }
 0x332   : > { %v784_v47 = vsel %vm337_vm8, %v779_v34, %v781_v36  ;;  %v817_v55 = vsel %vm401_vm9, %v768_v9, %v785_v46  ;;  %v1241_v36 = vld [vmem:[%s1613_s3 + $0x4] sm:$0x3] }
 0x333   : > { %v814_v56 = vsel %vm401_vm9, %v1501_v4, %v784_v47  ;;  %v824_v2 = vsel %vm708_vm2, %v817_v55, %v810_v59 }
 0x334   : > { %v809_v38 = vpop.permute.xlu1 %808  ;;  %v822_v3 = vsel %vm708_vm2, %v814_v56, %v805_v31 }
 0x335   : > { %v923_v40 = vpop.permute.xlu0 %922  ;;  %v811_v45 = vsel %vm369_vm7, %v807_v32, %v809_v38 }
 0x336   : > { %v955_v41 = vsel %vm401_vm9, %v903_v21, %v923_v40  ;;  %v826_v54 = vsel %vm708_vm2, %v820_v49, %v811_v45 }
 0x337   : > { %v963_v43 = vsel %vm708_vm2, %v955_v41, %v946_v33 }
 0x338   : > { %v925_v42 = vpop.permute.xlu1 %924  ;;  %1062 = vrot.lane.b32.xlu0 %v963_v43, %s1315_s27 }
 0x339   : > { %v980_v48 = vpop.permute.xlu0 %979  ;;  %v926_v12 = vsel %vm337_vm8, %v923_v40, %v925_v42  ;;  %v961_v11 = vsel %vm401_vm9, %v910_v61, %v925_v42  ;;  %v1240_v40 = vld [vmem:[%s1613_s3 + $0x2] sm:$0x3] }
 0x33a   : > { %v988_v50 = vsel %vm401_vm9, %v903_v21, %v980_v48  ;;  %v958_v13 = vsel %vm401_vm9, %v911_v60, %v926_v12 }
 0x33b   : > { %v993_v53 = vsel %vm708_vm2, %v988_v50, %v946_v33 }
 0x33c   : > { %v982_v52 = vpop.permute.xlu1 %981  ;;  %999 = vrot.lane.b32.xlu1 %v993_v53, %s1316_s28  ;;  %834 = vrot.lane.b32.xlu0 %v826_v54, %s1314_s26 }
 0x33d   : > { %v985_v57 = vsel %vm337_vm8, %v980_v48, %v982_v52  ;;  %v948_v58 = vpop.permute.xlu0 %947  ;;  %v986_v62 = vsel %vm337_vm8, %v982_v52, %v984_v35 }
 0x33e   : > { %v951_v5 = vsel %vm369_vm7, %v946_v33, %v948_v58  ;;  %v990_v4 = vsel %vm401_vm9, %v911_v60, %v985_v57  ;;  %v992_v7 = vsel %vm401_vm9, %v910_v61, %v986_v62 }
 0x33f   : > { %v994_v10 = vsel %vm708_vm2, %v990_v4, %v951_v5  ;;  %v965_v14 = vsel %vm708_vm2, %v958_v13, %v951_v5 }
 0x340   : > { %v950_v63 = vpop.permute.xlu1 %949  ;;  %832 = vrot.lane.b32.xlu1 %v824_v2, %s1314_s26  ;;  %830 = vrot.lane.b32.xlu0 %v822_v3, %s1314_s26 }
 0x341   : > { %v952_v6 = vsel %vm369_vm7, %v948_v58, %v950_v63 }
 0x342   : > { %v995_v8 = vsel %vm708_vm2, %v992_v7, %v952_v6  ;;  %v967_v15 = vsel %vm708_vm2, %v961_v11, %v952_v6 }
 0x344   : > { %1003 = vrot.lane.b32.xlu1 %v995_v8, %s1316_s28  ;;  %1001 = vrot.lane.b32.xlu0 %v994_v10, %s1316_s28 }
 0x348   : > { %1064 = vrot.lane.b32.xlu1 %v965_v14, %s1315_s27  ;;  %1066 = vrot.lane.b32.xlu0 %v967_v15, %s1315_s27 }
 0x34c   : > { %1127 = vperm.xlu1 %1286, %v1124_v17  }
 0x3aa   : > { %v1063_v19 = vpop.permute.xlu0 %1062 }
 0x3ae   : > { %v1000_v22 = vpop.permute.xlu1 %999  ;;  %v835_v0 = vpop.permute.xlu0 %834 }
 0x3b2   : > { %v833_v23 = vpop.permute.xlu1 %832  ;;  %v831_v24 = vpop.permute.xlu0 %830 }
 0x3b3   : > { %v837_v26 = vsel %vm394_vm10, %v833_v23, %v835_v0  ;;  %v836_v27 = vsel %vm394_vm10, %v831_v24, %v833_v23 }
 0x3b4   : > { %v844_v28 = vsel %vm842_vm3, %v836_v27, 0  ;;  %1238 = vmatprep.subr.msk.bf16.mxu1 %vm842_vm3, %v837_v26 }
 0x3b5   : > { %864 = vmatpush1.bf16.msra.mxu1 %v844_v28 }
 0x3b6   : > { %v1004_v30 = vpop.permute.xlu1 %1003  ;;  %v1002_v31 = vpop.permute.xlu0 %1001 }
 0x3b7   : > { %v1005_v32 = vsel %vm579_vm12, %v1000_v22, %v1002_v31  ;;  %v1006_v33 = vsel %vm579_vm12, %v1002_v31, %v1004_v30 }
 0x3b8   : > { %v1011_v35 = vsel %vm842_vm3, %v1005_v32, 0  ;;  %1239 = vmatmul.mubr.msk.bf16.vlgmr.msra.gmra.mxu1 %vm838_vm4, %v749_v29  ;;  %1242 = vmatprep.subr.msk.bf16.mxu0 %vm842_vm3, %v1006_v33 }
 0x3b9   : > { %1031 = vmatpush1.bf16.msra.mxu0 %v1011_v35  ;;  %1111 = vmatprep.mubr.bf16.mxu1 %v1310_v1 }
 0x3ba   : > { %v1065_v34 = vpop.permute.xlu1 %1064  ;;  %v1067_v37 = vpop.permute.xlu0 %1066 }
 0x3bb   : > { %v1068_v38 = vsel %vm643_vm11, %v1063_v19, %v1065_v34  ;;  %v1069_v39 = vsel %vm643_vm11, %v1065_v34, %v1067_v37 }
 0x3bc   : > { %v1074_v21 = vsel %vm842_vm3, %v1068_v38, 0  ;;  %1244 = vmatprep.subr.msk.bf16.mxu1 %vm842_vm3, %v1069_v39  ;;  %1243 = vmatmul.mubr.msk.bf16.vlgmr.msra.gmra.mxu0 %vm838_vm4, %v1241_v36 }
 0x3bd   : > { %1094 = vmatpush1.bf16.msra.mxu1 %v1074_v21 }
 0x3c0   : > { %1245 = vmatmul.mubr.msk.bf16.vlgmr.msra.gmra.mxu1 %vm838_vm4, %v1240_v40 }
 0x3c7   : > { %v1128_v56 = vpop.permute.xlu1 %1127 }
 0x478   : > { %v883_v1 = vpop.f32.mrf.mxu1 }
 0x479   : > { %v1057_v46 = vmul.f32 %v1484_v16, %v883_v1 }
 0x47a   : > { %v885_v41 = vpop.f32.mrf.mxu1 }
 0x47b   : > { %v1058_v50 = vmul.f32 %v1488_v20, %v885_v41 }
 0x47c   : > { %v887_v42 = vpop.f32.mrf.mxu1  ;;  %v1050_v43 = vpop.f32.mrf.mxu0 }
 0x47d   : > { %v1120_v47 = vmul.f32 %v1486_v18, %v1050_v43 }
 0x47e   : > { %v888_v44 = vpop.f32.mrf.mxu1  ;;  %v1052_v45 = vpop.f32.mrf.mxu0 }
 0x47f   : > { %v1121_v54 = vmul.f32 %v1492_v25, %v1052_v45 }
 0x480   : > { %v1113_v48 = vpop.f32.mrf.mxu1  ;;  %v1054_v49 = vpop.f32.mrf.mxu0 }
 0x481   : > { %v1114_v9 = vadd.f32 %v1113_v48, %v1057_v46 }
 0x482   : > { %v1115_v51 = vpop.f32.mrf.mxu1  ;;  %v1055_v52 = vpop.f32.mrf.mxu0 }
 0x483   : > { %v1122_v53 = vadd.f32 %v1120_v47, %v1114_v9  ;;  %v1116_v55 = vadd.f32 %v1115_v51, %v1058_v50 }
 0x484   : > { %v1117_v57 = vpop.f32.mrf.mxu1 }
 0x485   : > { %v1130_v58 = vadd.f32 %v1128_v56, %v1122_v53  ;;  %v1123_v59 = vadd.f32 %v1121_v54, %v1116_v55 }
 0x486   : > { %v1118_v60 = vpop.f32.mrf.mxu1 }
 0x487   : > { %v1131_v61 = vadd.f32 %v1128_v56, %v1123_v59  ;;  %v1138_v16 = vmul.f32 %v1130_v58, %v1130_v58  ;;  %v1132_v18 = vsel %vm708_vm2, %v1130_v58, 0.0 }
 0x489   : > { %v1133_v62 = vsel %vm708_vm2, %v1131_v61, 0.0  ;;  %v1139_v63 = vmul.f32 %v1131_v61, %v1131_v61  ;;  %v1140_v2 = vsel %vm708_vm2, %v1138_v16, 0.0 }
 0x48a   : > { %v1134_v20 = vadd.f32 %v1133_v62, %v1132_v18 }
 0x48b   : > { %v1141_v3 = vsel %vm708_vm2, %v1139_v63, 0.0 }
 0x48c   : > { %1135 = vadd.xlane.f32.xlu0 %v1134_v20  ;;  %v1142_v25 = vadd.f32 %v1141_v3, %v1140_v2 }
 0x48e   : > { %1143 = vadd.xlane.f32.xlu1 %v1142_v25 }
 0x515   : > { %v1136_v5 = vpop.xlane.xlu0 %1135 }
 0x516   : > { %v1137_v6 = vmul.f32 0.00390625, %v1136_v5 }
 0x517   : > { %v1144_v4 = vpop.xlane.xlu1 %1143 }
 0x518   : > { %v1145_v7 = vmul.f32 0.00390625, %v1144_v4  ;;  %v1146_v12 = vmul.f32 %v1137_v6, %v1137_v6  ;;  %v1149_v13 = vsub.f32 %v1130_v58, %v1137_v6  ;;  %v1150_v14 = vsub.f32 %v1131_v61, %v1137_v6 }
 0x51a   : > { %v1147_v8 = vsub.f32 %v1145_v7, %v1146_v12 }
 0x51c   : > { %v1148_v10 = vmax.f32 %v1147_v8, 0.0 }
 0x51e   : > { %v1151_v11 = vadd.f32 1e-05, %v1148_v10 }
 0x520   : > { %1300 = vrsqrt.f32 %v1151_v11 }
 0x52d   : > { %v1301_v15 = vpop.eup %1300 }
 0x52e   : > { %v1153_v17 = vmul.f32 %v1301_v15, %v1149_v13  ;;  %v1154_v19 = vmul.f32 %v1301_v15, %v1150_v14 }
 0x530   : > { %v1155_v22 = vmax.f32 %v1153_v17, 0.0  ;;  %v1156_v0 = vmax.f32 %v1154_v19, 0.0 }
 0x532   : > { %v1159_v23 = vcombine.low %v1155_v22, %v1156_v0 }
 0x534   : > { %1161 = vst [vmem:[%s221_s25] sm:$0xff] %v1159_v23 }
 0x535 PF: > { %s15_s18 = sadd.s32 1, %s1308_s18  }
 0x536   : > { %p12_p4 = scmp.ge.s32.totalorder %s15_s18, 4  }
 0x538   :  { %14 = sbr.rel (!%p12_p4) target bundleno = 1 (0x1), region = 74 }

// kernel: dncn_forward.23
= control target key start
LH: loop header
LB: loop body
LE: loop exit
PB: predicated region body
PF: predicated region fallthrough
CT: control target
= control target key end

     0   :  { %s933_s18 = smov 0   ;;  %s1076_s0 = inlined_call_operand.vmem [shape: f32[2,8,16], index: 0, kind: input, shape index: {}]   ;;  %s1077_s1 = inlined_call_operand.vmem [shape: bf16[3,8,24], index: 1, kind: input, shape index: {}]   ;;  %s1078_s2 = inlined_call_operand.vmem [shape: f32[8,1], index: 2, kind: input, shape index: {}]   ;;  %s1079_s3 = inlined_call_operand.vmem [shape: bf16[3,8,24], index: 3, kind: input, shape index: {}]   ;;  %s1080_s4 = inlined_call_operand.vmem [shape: f32[8,1], index: 4, kind: input, shape index: {}]   ;;  %s1081_s5 = inlined_call_operand.vmem [shape: f32[2,8,16], index: 5, kind: output, shape index: {}]  }
   0x1 LB: > { %s766_s19 = sadd.s32 4294967295, %s893_s18   ;;  %p770_p0 = scmp.ge.s32.totalorder %s893_s18, 1  ;;  %s893_s18 = sphi %s933_s18, %s15_s18  }
   0x2   : > { %p186_p1 = scmp.lt.s32.totalorder %s893_s18, 3 }
   0x4   : > { %p187_p2 = pnand %p770_p0, %p186_p1 }
   0x5   : > { %p212_p3 = scmp.lt.s32.totalorder (!%p187_p2), %s766_s19, 1  ;;  %s896_s24 = smov (!%p187_p2), 120  }
   0x6   : > { %190 = sbr.rel (%p187_p2) target bundleno = 1268 (0x4f4), region = 40  ;;  %s897_s25 = smov (!%p187_p2), 124  }
   0x7   : > { %s900_s26 = smov (!%p187_p2), 3   ;;  %s901_s27 = smov (!%p187_p2), 5  }
   0x8   : > { %s902_s28 = smov (!%p187_p2), 4  }
   0xb   : > { %vm242_vm0 = vcmask 1043584   ;;  %vm243_vm1 = vcmask 130052   ;;  %v895_v0 = vmov 0   ;;  %s1083_s19 = smov (!%p212_p3, %s766_s19), 1  ;;  %vm248_vm3 = vcmask 125952   ;;  %v458_v17 = vld [vmem:[%s1078_s2] sm:$0xff] }
   0xc   : > { %vm244_vm2 = vmor %vm243_vm1, %vm242_vm0  ;;  %241 = vst [vmem:[#allocation2] sm:$0xf] %v895_v0  ;;  %875 = vset.pattern.permute.xlu1 %v895_v0  ;;  %876 = vset.pattern.permute.xlu0 %v895_v0  ;;  %s771_s20 = sshll.u32 %s1083_s19, 3  ;;  %v898_v7 = vmov 0.0   ;;  %vm899_vm4 = vmmov 0   ;;  %vm262_vm5 = vcmask 1014784   ;;  %v221_v36 = vlaneseq }
   0xd   : > { %245 = vst.msk [vmem:[#allocation2 + $0x4] sm:$0xff] %vm244_vm2, %v895_v0  ;;  %s215_s23 = scalar_lea.vmem %s1076_s0, %s771_s20  ;;  %811 = vmatprep.subr.bf16.mxu0 %v898_v7  ;;  %819 = vmatprep.subr.bf16.mxu1 %v898_v7  ;;  %vm269_vm6 = vcmask 1043456   ;;  %vm284_vm7 = vcmask 39936   ;;  %v250_v27 = vld [vmem:[%s1077_s1] sm:$0xf]  ;;  %vm287_vm8 = vcmask 195584  }
   0xe   : > { %v246_v1 = vld [vmem:[%s215_s23] sm:$0xff]  ;;  %815 = vmatprep.mubr.msk.bf16.mxu0 %vm899_vm4, %v898_v7  ;;  %823 = vmatprep.mubr.msk.bf16.mxu1 %vm899_vm4, %v898_v7  ;;  %vm351_vm9 = vcmask 23552   ;;  %vm407_vm10 = vcmask 31744   ;;  %v780_v31 = vld [vmem:[%s1077_s1 + $0x8] sm:$0xf]  ;;  %v222_v37 = vand.u32 127, %v221_v36 }
   0xf   : > { %v247_v2 = vpack.c.bf16 %v246_v1, %v246_v1  ;;  %v779_v35 = vld [vmem:[%s1077_s1 + $0x4] sm:$0xf]  ;;  %vm465_vm13 = vcmask 130048  }
  0x10   : > { %v227_v38 = vand.u32 3, %v222_v37 }
  0x11   : > { %249 = vst.msk [vmem:[#allocation2 + $0x4] sm:$0xf] %vm248_vm3, %v247_v2 }
  0x12   : > { %vm235_vm11 = vcmp.gt.s32.totalorder %v227_v38, 0  ;;  %vm238_vm12 = vcmp.lt.s32.totalorder %v227_v38, 3 }
  0x13   : > { %v1008_v41 = vsel %vm235_vm11, 1.0, %v898_v7  ;;  %v1011_v43 = vsel %vm238_vm12, 1.0, %v898_v7 }
  0x18   : > { %v877_v3 = vld [vmem:[#allocation2 + $0x4] ss:$0 sps:$4 sm:$0xff]  }
  0x19   : > { %v251_v4 = vld [vmem:[#allocation2] sm:$0xff]  ;;  %267 = vrot.lane.b32.xlu0 %v877_v3, %s896_s24 }
  0x1a   : > { %v776_v5 = vcombine.high %v251_v4, %v251_v4  ;;  %v775_v6 = vcombine.low %v251_v4, %v251_v4 }
  0x1c   : > { %260 = vrot.lane.b32.xlu1 %v776_v5, %s897_s25 }
  0x1d   : > { %258 = vrot.lane.b32.xlu0 %v775_v6, %s897_s25 }
  0x20   : > { %336 = vrot.lane.b32.xlu1 %v877_v3, %s897_s25 }
  0x8b   : > { %v268_v8 = vpop.permute.xlu0 %267 }
  0x8c   : > { %349 = vrot.lane.b32.xlu1 %v268_v8, %s900_s26  ;;  %282 = vrot.lane.b32.xlu0 %v268_v8, %s901_s27 }
  0x8e   : > { %v261_v9 = vpop.permute.xlu1 %260 }
  0x8f   : > { %v259_v10 = vpop.permute.xlu0 %258  ;;  %v275_v14 = vsel %vm269_vm6, %v776_v5, %v261_v9 }
  0x90   : > { %v263_v11 = vsel %vm262_vm5, %v259_v10, %v261_v9  ;;  %405 = vrot.lane.b32.xlu0 %v268_v8, %s902_s28 }
  0x91   : > { %v272_v13 = vsel %vm269_vm6, %v775_v6, %v263_v11 }
  0x92   : > { %v337_v12 = vpop.permute.xlu1 %336  ;;  %278 = vrot.lane.b32.xlu1 %v272_v13, %s901_s27 }
  0x93   : > { %v339_v15 = vsel %vm269_vm6, %v775_v6, %v337_v12  ;;  %v340_v16 = vsel %vm269_vm6, %v776_v5, %v337_v12 }
  0x94   : > { %280 = vrot.lane.b32.xlu0 %v275_v14, %s901_s27 }
  0x96   : > { %345 = vrot.lane.b32.xlu1 %v339_v15, %s900_s26 }
  0x98   : > { %347 = vrot.lane.b32.xlu0 %v340_v16, %s900_s26 }
  0x9a   : > { %401 = vrot.lane.b32.xlu1 %v339_v15, %s902_s28 }
  0x9c   : > { %403 = vrot.lane.b32.xlu0 %v340_v16, %s902_s28 }
  0x9e   : > { %461 = vperm.xlu1 %875, %v458_v17  }
  0xfe   : > { %v350_v18 = vpop.permute.xlu1 %349  ;;  %v283_v19 = vpop.permute.xlu0 %282 }
  0xff   : > { %v292_v20 = vsel %vm269_vm6, %v283_v19, 0  ;;  %v358_v21 = vsel %vm269_vm6, %v350_v18, 0 }
 0x100   : > { %812 = vmatpush3.bf16.msra.mxu0 %v292_v20  ;;  %820 = vmatpush3.bf16.msra.mxu1 %v358_v21 }
 0x101   : > { %813 = vmatprep.subr.bf16.mxu0 %v898_v7  ;;  %821 = vmatprep.subr.bf16.mxu1 %v898_v7 }
 0x102   : > { %v406_v22 = vpop.permute.xlu0 %405 }
 0x103   : > { %v414_v29 = vsel %vm269_vm6, %v406_v22, 0 }
 0x104   : > { %v279_v23 = vpop.permute.xlu1 %278 }
 0x106   : > { %v281_v24 = vpop.permute.xlu0 %280 }
 0x107   : > { %v285_v25 = vsel %vm284_vm7, %v279_v23, %v281_v24 }
 0x108   : > { %814 = vmatpush3.bf16.msra.mxu0 %v285_v25  ;;  %v346_v26 = vpop.permute.xlu1 %345  ;;  %v688_v25 = vld [vmem:[%s1080_s4] sm:$0xff] }
 0x109   : > { %827 = vmatprep.subr.bf16.mxu0 %v898_v7 }
 0x10a   : > { %v348_v28 = vpop.permute.xlu0 %347 }
 0x10b   : > { %816 = vmatmul.mubr.msk.bf16.vlgmr.msra.gmra.mxu0 %vm287_vm8, %v250_v27  ;;  %v352_v30 = vsel %vm351_vm9, %v346_v26, %v348_v28 }
 0x10c   : > { %822 = vmatpush3.bf16.msra.mxu1 %v352_v30  ;;  %828 = vmatpush3.bf16.msra.mxu0 %v414_v29  ;;  %v402_v32 = vpop.permute.xlu1 %401 }
 0x10d   : > { %829 = vmatprep.subr.bf16.mxu0 %v898_v7  ;;  %831 = vmatprep.mubr.msk.bf16.mxu0 %vm899_vm4, %v898_v7 }
 0x10e   : > { %v404_v33 = vpop.permute.xlu0 %403  ;;  %835 = vmatprep.subr.bf16.mxu1 %v898_v7 }
 0x10f   : > { %v408_v34 = vsel %vm407_vm10, %v402_v32, %v404_v33  ;;  %824 = vmatmul.mubr.msk.bf16.vlgmr.msra.gmra.mxu1 %vm287_vm8, %v780_v31 }
 0x110   : > { %830 = vmatpush3.bf16.msra.mxu0 %v408_v34  ;;  %839 = vmatprep.mubr.msk.bf16.mxu1 %vm899_vm4, %v898_v7 }
 0x111   : > { %843 = vmatprep.subr.bf16.mxu0 %v898_v7 }
 0x113   : > { %832 = vmatmul.mubr.msk.bf16.vlgmr.msra.gmra.mxu0 %vm287_vm8, %v779_v35  ;;  %v486_v35 = vld [vmem:[%s1079_s3] sm:$0xf] }
 0x114   : > { %847 = vmatprep.mubr.msk.bf16.mxu0 %vm899_vm4, %v898_v7 }
 0x119   : > { %v462_v52 = vpop.permute.xlu1 %461 }
 0x1cb   : > { %v328_v39 = vpop.f32.mrf.mxu0 }
 0x1cc   : > { %v400_v47 = vmul.f32 %v1008_v41, %v328_v39  ;;  %v788_v39 = vld [vmem:[%s1079_s3 + $0x8] sm:$0xf] }
 0x1cd   : > { %v817_v40 = vpop.f32.mrf.mxu0 }
 0x1cf   : > { %v331_v42 = vpop.f32.mrf.mxu0  ;;  %v394_v44 = vpop.f32.mrf.mxu1 }
 0x1d0   : > { %v456_v48 = vmul.f32 %v1011_v43, %v394_v44 }
 0x1d1   : > { %v818_v45 = vpop.f32.mrf.mxu0  ;;  %v825_v46 = vpop.f32.mrf.mxu1 }
 0x1d2   : > { %v787_v45 = vld [vmem:[%s1079_s3 + $0x4] sm:$0xf] }
 0x1d3   : > { %v397_v49 = vpop.f32.mrf.mxu1  ;;  %v450_v50 = vpop.f32.mrf.mxu0 }
 0x1d4   : > { %v451_v51 = vadd.f32 %v450_v50, %v400_v47 }
 0x1d5   : > { %v826_v53 = vpop.f32.mrf.mxu1  ;;  %v833_v54 = vpop.f32.mrf.mxu0 }
 0x1d6   : > { %v457_v55 = vadd.f32 %v456_v48, %v451_v51 }
 0x1d7   : > { %v453_v56 = vpop.f32.mrf.mxu0 }
 0x1d8   : > { %v464_v57 = vadd.f32 %v462_v52, %v457_v55 }
 0x1d9   : > { %v834_v58 = vpop.f32.mrf.mxu0 }
 0x1da   : > { %v466_v59 = vsel %vm465_vm13, %v464_v57, 0.0  ;;  %v471_v60 = vmul.f32 %v464_v57, %v464_v57 }
 0x1db   : > { %467 = vadd.xlane.f32.xlu0 %v466_v59 }
 0x1dc   : > { %v472_v61 = vsel %vm465_vm13, %v471_v60, 0.0 }
 0x1dd   : > { %473 = vadd.xlane.f32.xlu1 %v472_v61 }
 0x264   : > { %v468_v62 = vpop.xlane.xlu0 %467 }
 0x265   : > { %v470_v63 = vmul.f32 0.0625, %v468_v62 }
 0x266   : > { %v474_v0 = vpop.xlane.xlu1 %473 }
 0x267   : > { %v476_v1 = vmul.f32 %v470_v63, %v470_v63  ;;  %v475_v2 = vmul.f32 0.0625, %v474_v0  ;;  %v479_v6 = vsub.f32 %v464_v57, %v470_v63 }
 0x269   : > { %v477_v3 = vsub.f32 %v475_v2, %v476_v1 }
 0x26b   : > { %v478_v4 = vmax.f32 %v477_v3, 0.0 }
 0x26d   : > { %v480_v5 = vadd.f32 1e-05, %v478_v4 }
 0x26f   : > { %883 = vrsqrt.f32 %v480_v5 }
 0x27c   : > { %v884_v8 = vpop.eup %883 }
 0x27d   : > { %v482_v9 = vmul.f32 %v884_v8, %v479_v6 }
 0x27f   : > { %v483_v10 = vmax.f32 %v482_v9, 0.0 }
 0x281   : > { %v484_v11 = vpack.c.bf16 %v483_v10, %v483_v10 }
 0x283   : > { %485 = vst.msk [vmem:[#allocation2 + $0x4] sm:$0xf] %vm248_vm3, %v484_v11 }
 0x28a   : > { %v880_v12 = vld [vmem:[#allocation2 + $0x4] ss:$0 sps:$4 sm:$0xff]  }
 0x28b   : > { %v487_v13 = vld [vmem:[#allocation2] sm:$0xff]  ;;  %502 = vrot.lane.b32.xlu0 %v880_v12, %s896_s24 }
 0x28c   : > { %v783_v14 = vcombine.low %v487_v13, %v487_v13  ;;  %v784_v15 = vcombine.high %v487_v13, %v487_v13 }
 0x28e   : > { %494 = vrot.lane.b32.xlu1 %v783_v14, %s897_s25 }
 0x28f   : > { %496 = vrot.lane.b32.xlu0 %v784_v15, %s897_s25 }
 0x292   : > { %568 = vrot.lane.b32.xlu1 %v880_v12, %s897_s25  ;;  %s219_s25 = scalar_lea.vmem %s1081_s5, %s771_s20 }
 0x2fd   : > { %v503_v16 = vpop.permute.xlu0 %502 }
 0x2fe   : > { %516 = vrot.lane.b32.xlu0 %v503_v16, %s901_s27  ;;  %581 = vrot.lane.b32.xlu1 %v503_v16, %s900_s26 }
 0x300   : > { %v495_v17 = vpop.permute.xlu1 %494 }
 0x301   : > { %v497_v18 = vpop.permute.xlu0 %496 }
 0x302   : > { %v498_v19 = vsel %vm262_vm5, %v495_v17, %v497_v18  ;;  %636 = vrot.lane.b32.xlu0 %v503_v16, %s902_s28  ;;  %v509_v22 = vsel %vm269_vm6, %v784_v15, %v497_v18 }
 0x303   : > { %v506_v20 = vsel %vm269_vm6, %v783_v14, %v498_v19 }
 0x304   : > { %v569_v21 = vpop.permute.xlu1 %568  ;;  %512 = vrot.lane.b32.xlu1 %v506_v20, %s901_s27 }
 0x305   : > { %v571_v23 = vsel %vm269_vm6, %v783_v14, %v569_v21  ;;  %v572_v24 = vsel %vm269_vm6, %v784_v15, %v569_v21 }
 0x306   : > { %514 = vrot.lane.b32.xlu0 %v509_v22, %s901_s27 }
 0x308   : > { %577 = vrot.lane.b32.xlu1 %v571_v23, %s900_s26 }
 0x30a   : > { %579 = vrot.lane.b32.xlu0 %v572_v24, %s900_s26 }
 0x30c   : > { %632 = vrot.lane.b32.xlu1 %v571_v23, %s902_s28 }
 0x30e   : > { %634 = vrot.lane.b32.xlu0 %v572_v24, %s902_s28 }
 0x310   : > { %691 = vperm.xlu1 %875, %v688_v25  }
 0x370   : > { %v517_v26 = vpop.permute.xlu0 %516  ;;  %v582_v27 = vpop.permute.xlu1 %581 }
 0x371   : > { %v524_v28 = vsel %vm269_vm6, %v517_v26, 0  ;;  %v589_v29 = vsel %vm269_vm6, %v582_v27, 0 }
 0x372   : > { %836 = vmatpush3.bf16.msra.mxu1 %v524_v28  ;;  %844 = vmatpush3.bf16.msra.mxu0 %v589_v29 }
 0x373   : > { %837 = vmatprep.subr.bf16.mxu1 %v898_v7  ;;  %845 = vmatprep.subr.bf16.mxu0 %v898_v7 }
 0x374   : > { %v637_v30 = vpop.permute.xlu0 %636 }
 0x375   : > { %v644_v37 = vsel %vm269_vm6, %v637_v30, 0 }
 0x376   : > { %v513_v31 = vpop.permute.xlu1 %512 }
 0x378   : > { %v515_v32 = vpop.permute.xlu0 %514 }
 0x379   : > { %v518_v33 = vsel %vm284_vm7, %v513_v31, %v515_v32 }
 0x37a   : > { %838 = vmatpush3.bf16.msra.mxu1 %v518_v33  ;;  %v578_v34 = vpop.permute.xlu1 %577 }
 0x37b   : > { %851 = vmatprep.subr.bf16.mxu1 %v898_v7 }
 0x37c   : > { %v580_v36 = vpop.permute.xlu0 %579 }
 0x37d   : > { %v583_v38 = vsel %vm351_vm9, %v578_v34, %v580_v36  ;;  %840 = vmatmul.mubr.msk.bf16.vlgmr.msra.gmra.mxu1 %vm287_vm8, %v486_v35 }
 0x37e   : > { %846 = vmatpush3.bf16.msra.mxu0 %v583_v38  ;;  %852 = vmatpush3.bf16.msra.mxu1 %v644_v37  ;;  %v633_v40 = vpop.permute.xlu1 %632 }
 0x37f   : > { %853 = vmatprep.subr.bf16.mxu1 %v898_v7  ;;  %855 = vmatprep.mubr.msk.bf16.mxu1 %vm899_vm4, %v898_v7 }
 0x380   : > { %v635_v42 = vpop.permute.xlu0 %634 }
 0x381   : > { %v638_v44 = vsel %vm407_vm10, %v633_v40, %v635_v42  ;;  %848 = vmatmul.mubr.msk.bf16.vlgmr.msra.gmra.mxu0 %vm287_vm8, %v788_v39 }
 0x382   : > { %854 = vmatpush3.bf16.msra.mxu1 %v638_v44 }
 0x385   : > { %856 = vmatmul.mubr.msk.bf16.vlgmr.msra.gmra.mxu1 %vm287_vm8, %v787_v45 }
 0x38b   : > { %v692_v59 = vpop.permute.xlu1 %691 }
 0x43d   : > { %v560_v46 = vpop.f32.mrf.mxu1 }
 0x43e   : > { %v631_v7 = vmul.f32 %v1008_v41, %v560_v46 }
 0x43f   : > { %v841_v47 = vpop.f32.mrf.mxu1 }
 0x441   : > { %v563_v48 = vpop.f32.mrf.mxu1  ;;  %v625_v49 = vpop.f32.mrf.mxu0 }
 0x442   : > { %v686_v52 = vmul.f32 %v1011_v43, %v625_v49 }
 0x443   : > { %v842_v50 = vpop.f32.mrf.mxu1  ;;  %v849_v51 = vpop.f32.mrf.mxu0 }
 0x445   : > { %v628_v53 = vpop.f32.mrf.mxu0  ;;  %v680_v54 = vpop.f32.mrf.mxu1 }
 0x446   : > { %v681_v55 = vadd.f32 %v680_v54, %v631_v7 }
 0x447   : > { %v850_v56 = vpop.f32.mrf.mxu0  ;;  %v857_v57 = vpop.f32.mrf.mxu1 }
 0x448   : > { %v687_v58 = vadd.f32 %v686_v52, %v681_v55 }
 0x449   : > { %v683_v60 = vpop.f32.mrf.mxu1 }
 0x44a   : > { %v694_v61 = vadd.f32 %v692_v59, %v687_v58 }
 0x44b   : > { %v858_v62 = vpop.f32.mrf.mxu1 }
 0x44c   : > { %v695_v63 = vsel %vm465_vm13, %v694_v61, 0.0  ;;  %v699_v0 = vmul.f32 %v694_v61, %v694_v61 }
 0x44d   : > { %696 = vadd.xlane.f32.xlu0 %v695_v63 }
 0x44e   : > { %v700_v1 = vsel %vm465_vm13, %v699_v0, 0.0 }
 0x44f   : > { %701 = vadd.xlane.f32.xlu1 %v700_v1 }
 0x4d6   : > { %v697_v41 = vpop.xlane.xlu0 %696 }
 0x4d7   : > { %v698_v43 = vmul.f32 0.0625, %v697_v41 }
 0x4d8   : > { %v702_v2 = vpop.xlane.xlu1 %701 }
 0x4d9   : > { %v704_v3 = vmul.f32 %v698_v43, %v698_v43  ;;  %v703_v4 = vmul.f32 0.0625, %v702_v2  ;;  %v707_v9 = vsub.f32 %v694_v61, %v698_v43 }
 0x4db   : > { %v705_v5 = vsub.f32 %v703_v4, %v704_v3 }
 0x4dd   : > { %v706_v6 = vmax.f32 %v705_v5, 0.0 }
 0x4df   : > { %v708_v8 = vadd.f32 1e-05, %v706_v6 }
 0x4e1   : > { %885 = vrsqrt.f32 %v708_v8 }
 0x4ee   : > { %v886_v10 = vpop.eup %885 }
 0x4ef   : > { %v710_v11 = vmul.f32 %v886_v10, %v707_v9 }
 0x4f1   : > { %v711_v12 = vmax.f32 %v710_v11, 0.0 }
 0x4f3   : > { %712 = vst.msk [vmem:[%s219_s25] sm:$0xff] %vm465_vm13, %v711_v12 }
 0x4f4 PF: > { %s15_s18 = sadd.s32 1, %s893_s18  }
 0x4f5   : > { %p12_p4 = scmp.ge.s32.totalorder %s15_s18, 4  }
 0x4f7   :  { %14 = sbr.rel (!%p12_p4) target bundleno = 1 (0x1), region = 74 }

// kernel: dncn_forward.24
= control target key start
LH: loop header
LB: loop body
LE: loop exit
PB: predicated region body
PF: predicated region fallthrough
CT: control target
= control target key end

     0   :  { %s956_s18 = smov 0   ;;  %s1087_s0 = inlined_call_operand.vmem [shape: f32[2,16,64], index: 0, kind: input, shape index: {}]   ;;  %s1088_s1 = inlined_call_operand.vmem [shape: bf16[3,4,48], index: 1, kind: input, shape index: {}]   ;;  %s1089_s2 = inlined_call_operand.vmem [shape: f32[4,1], index: 2, kind: input, shape index: {}]   ;;  %s1090_s3 = inlined_call_operand.vmem [shape: bf16[3,4,12], index: 3, kind: input, shape index: {}]   ;;  %s1091_s4 = inlined_call_operand.vmem [shape: f32[4,1], index: 4, kind: input, shape index: {}]   ;;  %s1092_s5 = inlined_call_operand.vmem [shape: f32[2,4,64], index: 5, kind: output, shape index: {}]  }
   0x1 LB: > { %s782_s19 = sadd.s32 4294967295, %s916_s18   ;;  %p786_p0 = scmp.ge.s32.totalorder %s916_s18, 1  ;;  %s916_s18 = sphi %s956_s18, %s15_s18  }
   0x2   : > { %p187_p1 = scmp.lt.s32.totalorder %s916_s18, 3 }
   0x4   : > { %p188_p2 = pnand %p786_p0, %p187_p1 }
   0x5   : > { %p214_p3 = scmp.lt.s32.totalorder (!%p188_p2), %s782_s19, 1  ;;  %s919_s24 = smov (!%p188_p2), 112  }
   0x6   : > { %191 = sbr.rel (%p188_p2) target bundleno = 1275 (0x4fb), region = 40  ;;  %s920_s25 = smov (!%p188_p2), 120  }
   0x7   : > { %s921_s26 = smov (!%p188_p2), 9   ;;  %s924_s27 = smov (!%p188_p2), 8  }
   0x8   : > { %s925_s28 = smov (!%p188_p2), 7  }
   0xb   : > { %vm246_vm0 = vcmask 1043968   ;;  %vm247_vm1 = vcmask 523268   ;;  %v918_v0 = vmov 0   ;;  %s1094_s19 = smov (!%p214_p3, %s782_s19), 1  ;;  %vm261_vm3 = vcmask 519168  }
   0xc   : > { %vm248_vm2 = vmor %vm247_vm1, %vm246_vm0  ;;  %244 = vst [vmem:[#allocation2] sm:$0xf] %v918_v0  ;;  %897 = vset.pattern.permute.xlu1 %v918_v0  ;;  %898 = vset.pattern.permute.xlu0 %v918_v0  ;;  %s812_s20 = sshll.u32 %s1094_s19, 4  ;;  %v922_v8 = vmov 0.0   ;;  %vm923_vm4 = vmmov 0   ;;  %vm281_vm5 = vcmask 982016   ;;  %v224_v35 = vlaneseq }
   0xd   : > { %245 = vst [vmem:[#allocation2 + $0xc] sm:$0xf] %v918_v0  ;;  %249 = vst.msk [vmem:[#allocation2 + $0x4] sm:$0xff] %vm248_vm2, %v918_v0  ;;  %s218_s23 = scalar_lea.vmem %s1087_s0, %s812_s20  ;;  %833 = vmatprep.subr.bf16.mxu0 %v922_v8  ;;  %843 = vmatprep.subr.bf16.mxu1 %v922_v8  ;;  %v471_v14 = vld [vmem:[%s1089_s2] sm:$0xf]  ;;  %vm300_vm6 = vcmask 72704  }
   0xe   : > { %250 = vst.msk [vmem:[#allocation2 + $0x10] sm:$0xff] %vm248_vm2, %v918_v0  ;;  %v251_v1 = vld [vmem:[%s218_s23] sm:$0xff]  ;;  %v252_v2 = vld [vmem:[%s218_s23 + $0x8] sm:$0xff]  ;;  %839 = vmatprep.mubr.msk.bf16.mxu0 %vm923_vm4, %v922_v8  ;;  %849 = vmatprep.mubr.msk.bf16.mxu1 %vm923_vm4, %v922_v8  ;;  %vm306_vm7 = vcmask 392192   ;;  %vm364_vm8 = vcmask 56320   ;;  %vm421_vm9 = vcmask 64512  }
   0xf   : > { %v813_v3 = vpack.c.bf16 %v251_v1, %v251_v1  ;;  %v814_v4 = vpack.c.bf16 %v252_v2, %v252_v2  ;;  %v264_v24 = vld [vmem:[%s1088_s1] sm:$0x3]  ;;  %v799_v30 = vld [vmem:[%s1088_s1 + $0x4] sm:$0x3]  ;;  %v798_v34 = vld [vmem:[%s1088_s1 + $0x2] sm:$0x3] }
  0x10   : > { %v225_v36 = vand.u32 127, %v224_v35  ;;  %vm497_vm12 = vcmask 517120   ;;  %vm519_vm13 = vcmask 1041408   ;;  %vm526_vm14 = vcmask 1043456   ;;  %s789_s22 = sshll.u32 %s1094_s19, 2 }
  0x11   : > { %262 = vst.msk [vmem:[#allocation2 + $0x4] sm:$0xf] %vm261_vm3, %v813_v3  ;;  %263 = vst.msk [vmem:[#allocation2 + $0x10] sm:$0xf] %vm261_vm3, %v814_v4  ;;  %vm541_vm15 = vcmask 1045504   ;;  %vm537_vm0 = vcmask 97280  }
  0x12   : > { %v230_v38 = vand.u32 7, %v225_v36  ;;  %v499_v36 = vld [vmem:[%s1090_s3] sm:$0x3] }
  0x14   : > { %v902_v7 = vld [vmem:[#allocation2] ss:$12 sps:$4 sm:$0xff]   ;;  %vm238_vm10 = vcmp.gt.s32.totalorder %v230_v38, 0  ;;  %vm241_vm11 = vcmp.lt.s32.totalorder %v230_v38, 7 }
  0x15   : > { %v1031_v42 = vsel %vm238_vm10, 1.0, %v922_v8  ;;  %v1034_v43 = vsel %vm241_vm11, 1.0, %v922_v8 }
  0x18   : > { %v899_v5 = vld [vmem:[#allocation2 + $0x4] ss:$12 sps:$4 sm:$0xff]  }
  0x19   : > { %v900_v6 = vld [vmem:[#allocation2 + $0x4] ss:$12 sps:$4 sm:$0xff]   ;;  %288 = vrot.lane.b32.xlu0 %v899_v5, %s919_s24 }
  0x1a   : > { %279 = vrot.lane.b32.xlu1 %v900_v6, %s920_s25 }
  0x1d   : > { %277 = vrot.lane.b32.xlu0 %v902_v7, %s920_s25 }
  0x1e   : > { %352 = vrot.lane.b32.xlu1 %v899_v5, %s920_s25 }
  0x21   : > { %292 = vrot.lane.b32.xlu0 %v900_v6, %s921_s26 }
  0x22   : > { %290 = vrot.lane.b32.xlu1 %v902_v7, %s921_s26 }
  0x8b   : > { %v289_v9 = vpop.permute.xlu0 %288 }
  0x8c   : > { %298 = vrot.lane.b32.xlu0 %v289_v9, %s921_s26  ;;  %v280_v10 = vpop.permute.xlu1 %279 }
  0x8f   : > { %v278_v11 = vpop.permute.xlu0 %277 }
  0x90   : > { %296 = vrot.lane.b32.xlu0 %v280_v10, %s921_s26  ;;  %v282_v12 = vsel %vm281_vm5, %v278_v11, %v280_v10  ;;  %v353_v13 = vpop.permute.xlu1 %352 }
  0x91   : > { %294 = vrot.lane.b32.xlu1 %v282_v12, %s921_s26 }
  0x93   : > { %v293_v15 = vpop.permute.xlu0 %292 }
  0x94   : > { %419 = vrot.lane.b32.xlu0 %v289_v9, %s924_s27  ;;  %v291_v17 = vpop.permute.xlu1 %290 }
  0x95   : > { %362 = vrot.lane.b32.xlu1 %v289_v9, %s925_s28  ;;  %v301_v23 = vsel %vm300_vm6, %v291_v17, %v293_v15 }
  0x98   : > { %417 = vrot.lane.b32.xlu0 %v353_v13, %s924_s27 }
  0x99   : > { %360 = vrot.lane.b32.xlu1 %v353_v13, %s925_s28 }
  0x9c   : > { %358 = vrot.lane.b32.xlu0 %v900_v6, %s925_s28 }
  0x9d   : > { %356 = vrot.lane.b32.xlu1 %v902_v7, %s925_s28 }
  0xa0   : > { %415 = vrot.lane.b32.xlu0 %v900_v6, %s924_s27 }
  0xa1   : > { %413 = vrot.lane.b32.xlu1 %v902_v7, %s924_s27 }
  0xa5   : > { %474 = vperm.xlu1 %897, %v471_v14  }
  0xfe   : > { %v299_v16 = vpop.permute.xlu0 %298 }
  0xff   : > { %834 = vmatpush3.bf16.msra.mxu0 %v299_v16 }
 0x100   : > { %835 = vmatprep.subr.bf16.mxu0 %v922_v8 }
 0x102   : > { %v297_v18 = vpop.permute.xlu0 %296 }
 0x103   : > { %v295_v19 = vpop.permute.xlu1 %294 }
 0x104   : > { %v302_v20 = vsel %vm300_vm6, %v295_v19, %v297_v18 }
 0x105   : > { %836 = vmatpush3.bf16.msra.mxu0 %v302_v20 }
 0x106   : > { %v420_v21 = vpop.permute.xlu0 %419  ;;  %837 = vmatprep.subr.bf16.mxu0 %v922_v8 }
 0x107   : > { %v363_v22 = vpop.permute.xlu1 %362 }
 0x108   : > { %844 = vmatpush3.bf16.msra.mxu1 %v363_v22 }
 0x109   : > { %838 = vmatpush3.bf16.msra.mxu0 %v301_v23  ;;  %845 = vmatprep.subr.bf16.mxu1 %v922_v8 }
 0x10a   : > { %v418_v25 = vpop.permute.xlu0 %417  ;;  %853 = vmatprep.subr.bf16.mxu0 %v922_v8 }
 0x10b   : > { %v361_v26 = vpop.permute.xlu1 %360 }
 0x10c   : > { %840 = vmatmul.mubr.msk.bf16.vlgmr.msra.gmra.mxu0 %vm306_vm7, %v264_v24  ;;  %846 = vmatpush3.bf16.msra.mxu1 %v361_v26 }
 0x10d   : > { %854 = vmatpush3.bf16.msra.mxu0 %v420_v21  ;;  %847 = vmatprep.subr.bf16.mxu1 %v922_v8 }
 0x10e   : > { %v359_v27 = vpop.permute.xlu0 %358  ;;  %855 = vmatprep.subr.bf16.mxu0 %v922_v8  ;;  %859 = vmatprep.mubr.msk.bf16.mxu0 %vm923_vm4, %v922_v8 }
 0x10f   : > { %v357_v28 = vpop.permute.xlu1 %356 }
 0x110   : > { %v365_v29 = vsel %vm364_vm8, %v357_v28, %v359_v27 }
 0x111   : > { %848 = vmatpush3.bf16.msra.mxu1 %v365_v29  ;;  %856 = vmatpush3.bf16.msra.mxu0 %v418_v25 }
 0x112   : > { %v416_v31 = vpop.permute.xlu0 %415  ;;  %857 = vmatprep.subr.bf16.mxu0 %v922_v8  ;;  %863 = vmatprep.subr.bf16.mxu1 %v922_v8 }
 0x113   : > { %v414_v32 = vpop.permute.xlu1 %413 }
 0x114   : > { %v422_v33 = vsel %vm421_vm9, %v414_v32, %v416_v31  ;;  %850 = vmatmul.mubr.msk.bf16.vlgmr.msra.gmra.mxu1 %vm306_vm7, %v799_v30  ;;  %v704_v31 = vld [vmem:[%s1091_s4] sm:$0xf] }
 0x115   : > { %858 = vmatpush3.bf16.msra.mxu0 %v422_v33  ;;  %865 = vmatprep.mubr.msk.bf16.mxu1 %vm923_vm4, %v922_v8 }
 0x116   : > { %875 = vmatprep.subr.bf16.mxu0 %v922_v8 }
 0x118   : > { %860 = vmatmul.mubr.msk.bf16.vlgmr.msra.gmra.mxu0 %vm306_vm7, %v798_v34 }
 0x119   : > { %877 = vmatprep.mubr.msk.bf16.mxu0 %vm923_vm4, %v922_v8 }
 0x120   : > { %v475_v51 = vpop.permute.xlu1 %474 }
 0x1cc   : > { %v344_v37 = vpop.f32.mrf.mxu0 }
 0x1cd   : > { %v412_v46 = vmul.f32 %v1031_v42, %v344_v37 }
 0x1ce   : > { %v841_v39 = vpop.f32.mrf.mxu0 }
 0x1d0   : > { %v347_v40 = vpop.f32.mrf.mxu0 }
 0x1d2   : > { %v842_v41 = vpop.f32.mrf.mxu0 }
 0x1d4   : > { %v406_v44 = vpop.f32.mrf.mxu1 }
 0x1d5   : > { %v469_v47 = vmul.f32 %v1034_v43, %v406_v44 }
 0x1d6   : > { %v851_v45 = vpop.f32.mrf.mxu1 }
 0x1d8   : > { %v409_v48 = vpop.f32.mrf.mxu1  ;;  %v463_v49 = vpop.f32.mrf.mxu0 }
 0x1d9   : > { %v464_v50 = vadd.f32 %v463_v49, %v412_v46  ;;  %v806_v48 = vld [vmem:[%s1090_s3 + $0x2] sm:$0x3] }
 0x1da   : > { %v852_v52 = vpop.f32.mrf.mxu1  ;;  %v861_v53 = vpop.f32.mrf.mxu0 }
 0x1db   : > { %v470_v54 = vadd.f32 %v469_v47, %v464_v50  ;;  %v807_v47 = vld [vmem:[%s1090_s3 + $0x4] sm:$0x3] }
 0x1dc   : > { %v466_v55 = vpop.f32.mrf.mxu0 }
 0x1dd   : > { %v477_v56 = vadd.f32 %v475_v51, %v470_v54 }
 0x1de   : > { %v862_v57 = vpop.f32.mrf.mxu0 }
 0x1df   : > { %v478_v58 = vsel %vm261_vm3, %v477_v56, 0.0  ;;  %v483_v59 = vmul.f32 %v477_v56, %v477_v56 }
 0x1e0   : > { %479 = vadd.xlane.f32.xlu0 %v478_v58 }
 0x1e1   : > { %v484_v60 = vsel %vm261_vm3, %v483_v59, 0.0 }
 0x1e2   : > { %485 = vadd.xlane.f32.xlu1 %v484_v60 }
 0x269   : > { %v480_v61 = vpop.xlane.xlu0 %479 }
 0x26a   : > { %v482_v62 = vmul.f32 0.015625, %v480_v61 }
 0x26b   : > { %v486_v63 = vpop.xlane.xlu1 %485 }
 0x26c   : > { %v488_v0 = vmul.f32 %v482_v62, %v482_v62  ;;  %v487_v1 = vmul.f32 0.015625, %v486_v63  ;;  %v491_v5 = vsub.f32 %v477_v56, %v482_v62 }
 0x26e   : > { %v489_v2 = vsub.f32 %v487_v1, %v488_v0 }
 0x270   : > { %v490_v3 = vmax.f32 %v489_v2, 0.0 }
 0x272   : > { %v492_v4 = vadd.f32 1e-05, %v490_v3 }
 0x274   : > { %906 = vrsqrt.f32 %v492_v4 }
 0x281   : > { %v907_v6 = vpop.eup %906 }
 0x282   : > { %v494_v7 = vmul.f32 %v907_v6, %v491_v5 }
 0x284   : > { %v495_v9 = vmax.f32 %v494_v7, 0.0 }
 0x286   : > { %v496_v10 = vpack.c.bf16 %v495_v9, %v495_v9 }
 0x288   : > { %498 = vst.msk [vmem:[#allocation2 + $0x4] sm:$0x3] %vm497_vm12, %v496_v10 }
 0x28f   : > { %v500_v11 = vld [vmem:[#allocation2] sm:$0x33] }
 0x290   : > { %v803_v12 = vcombine.high %v500_v11, %v500_v11  ;;  %v802_v13 = vcombine.low %v500_v11, %v500_v11  ;;  %v905_v16 = vld [vmem:[#allocation2 + $0x4] ss:$0 sps:$4 sm:$0x33]  }
 0x291   : > { %v587_v17 = vrot.slane %v905_v16, 6 }
 0x292   : > { %v508_v14 = vrot.slane %v803_v12, 6  ;;  %v507_v15 = vrot.slane %v802_v13, 6 }
 0x294   : > { %511 = vrot.lane.b32.xlu1 %v508_v14, %s920_s25  ;;  %509 = vrot.lane.b32.xlu0 %v507_v15, %s920_s25 }
 0x298   : > { %588 = vrot.lane.b32.xlu1 %v587_v17, %s920_s25  ;;  %517 = vrot.lane.b32.xlu0 %v905_v16, %s919_s24  ;;  %s222_s25 = scalar_lea.vmem %s1092_s5, %s789_s22 }
 0x306   : > { %v512_v18 = vpop.permute.xlu1 %511  ;;  %v510_v19 = vpop.permute.xlu0 %509 }
 0x307   : > { %v513_v20 = vsel %vm281_vm5, %v510_v19, %v512_v18  ;;  %v525_v21 = vsel %vm519_vm13, %v803_v12, %v512_v18 }
 0x308   : > { %v522_v24 = vsel %vm519_vm13, %v802_v13, %v513_v20 }
 0x30a   : > { %v589_v22 = vpop.permute.xlu1 %588  ;;  %v518_v23 = vpop.permute.xlu0 %517 }
 0x30b   : > { %v529_v25 = vsel %vm526_vm14, %v525_v21, %v518_v23  ;;  %v528_v26 = vsel %vm526_vm14, %v522_v24, %v518_v23  ;;  %v591_v27 = vsel %vm519_vm13, %v802_v13, %v589_v22  ;;  %v592_v28 = vsel %vm519_vm13, %v803_v12, %v589_v22 }
 0x30c   : > { %534 = vrot.lane.b32.xlu1 %v529_v25, %s921_s26  ;;  %532 = vrot.lane.b32.xlu0 %v528_v26, %s921_s26  ;;  %v594_v29 = vsel %vm526_vm14, %v592_v28, %v518_v23  ;;  %v593_v30 = vsel %vm526_vm14, %v591_v27, %v518_v23 }
 0x310   : > { %601 = vrot.lane.b32.xlu1 %v594_v29, %s925_s28  ;;  %599 = vrot.lane.b32.xlu0 %v593_v30, %s925_s28 }
 0x314   : > { %653 = vrot.lane.b32.xlu1 %v594_v29, %s924_s27  ;;  %651 = vrot.lane.b32.xlu0 %v593_v30, %s924_s27 }
 0x318   : > { %707 = vperm.xlu0 %898, %v704_v31  }
 0x37e   : > { %v535_v32 = vpop.permute.xlu1 %534  ;;  %v533_v33 = vpop.permute.xlu0 %532 }
 0x37f   : > { %v536_v34 = vsel %vm300_vm6, %v533_v33, %v535_v32 }
 0x380   : > { %v543_v35 = vsel %vm541_vm15, %v536_v34, 0 }
 0x381   : > { %864 = vmatpush3.bf16.msra.mxu1 %v543_v35 }
 0x382   : > { %v602_v37 = vpop.permute.xlu1 %601  ;;  %v600_v38 = vpop.permute.xlu0 %599  ;;  %869 = vmatprep.subr.bf16.mxu1 %v922_v8 }
 0x383   : > { %v603_v39 = vsel %vm364_vm8, %v600_v38, %v602_v37 }
 0x384   : > { %v608_v40 = vsel %vm541_vm15, %v603_v39, 0  ;;  %866 = vmatmul.mubr.msk.bf16.vlgmr.msra.gmra.mxu1 %vm537_vm0, %v499_v36 }
 0x385   : > { %870 = vmatpush3.bf16.msra.mxu1 %v608_v40  ;;  %871 = vmatprep.mubr.msk.bf16.mxu1 %vm923_vm4, %v922_v8 }
 0x386   : > { %v654_v41 = vpop.permute.xlu1 %653  ;;  %v652_v44 = vpop.permute.xlu0 %651 }
 0x387   : > { %v655_v45 = vsel %vm421_vm9, %v652_v44, %v654_v41 }
 0x388   : > { %v660_v46 = vsel %vm541_vm15, %v655_v45, 0 }
 0x389   : > { %876 = vmatpush3.bf16.msra.mxu0 %v660_v46 }
 0x38c   : > { %872 = vmatmul.mubr.msk.bf16.vlgmr.msra.gmra.mxu1 %vm537_vm0, %v807_v47  ;;  %878 = vmatmul.mubr.msk.bf16.vlgmr.msra.gmra.mxu0 %vm537_vm0, %v806_v48 }
 0x393   : > { %v708_v57 = vpop.permute.xlu0 %707 }
 0x444   : > { %v579_v8 = vpop.f32.mrf.mxu1 }
 0x445   : > { %v650_v52 = vmul.f32 %v1031_v42, %v579_v8 }
 0x446   : > { %v867_v49 = vpop.f32.mrf.mxu1 }
 0x448   : > { %v582_v50 = vpop.f32.mrf.mxu1 }
 0x44a   : > { %v868_v51 = vpop.f32.mrf.mxu1 }
 0x44c   : > { %v644_v53 = vpop.f32.mrf.mxu1  ;;  %v696_v54 = vpop.f32.mrf.mxu0 }
 0x44d   : > { %v702_v55 = vmul.f32 %v1034_v43, %v644_v53  ;;  %v697_v56 = vadd.f32 %v696_v54, %v650_v52 }
 0x44e   : > { %v873_v58 = vpop.f32.mrf.mxu1  ;;  %v879_v59 = vpop.f32.mrf.mxu0 }
 0x44f   : > { %v703_v60 = vadd.f32 %v702_v55, %v697_v56 }
 0x450   : > { %v647_v61 = vpop.f32.mrf.mxu1  ;;  %v699_v62 = vpop.f32.mrf.mxu0 }
 0x451   : > { %v710_v63 = vadd.f32 %v708_v57, %v703_v60 }
 0x452   : > { %v874_v0 = vpop.f32.mrf.mxu1  ;;  %v880_v1 = vpop.f32.mrf.mxu0 }
 0x453   : > { %v711_v2 = vsel %vm261_vm3, %v710_v63, 0.0  ;;  %v715_v3 = vmul.f32 %v710_v63, %v710_v63 }
 0x454   : > { %712 = vadd.xlane.f32.xlu1 %v711_v2 }
 0x455   : > { %v716_v42 = vsel %vm261_vm3, %v715_v3, 0.0 }
 0x456   : > { %717 = vadd.xlane.f32.xlu0 %v716_v42 }
 0x4dd   : > { %v713_v4 = vpop.xlane.xlu1 %712 }
 0x4de   : > { %v714_v43 = vmul.f32 0.015625, %v713_v4 }
 0x4df   : > { %v718_v5 = vpop.xlane.xlu0 %717 }
 0x4e0   : > { %v720_v6 = vmul.f32 %v714_v43, %v714_v43  ;;  %v719_v7 = vmul.f32 0.015625, %v718_v5  ;;  %v723_v12 = vsub.f32 %v710_v63, %v714_v43 }
 0x4e2   : > { %v721_v9 = vsub.f32 %v719_v7, %v720_v6 }
 0x4e4   : > { %v722_v10 = vmax.f32 %v721_v9, 0.0 }
 0x4e6   : > { %v724_v11 = vadd.f32 1e-05, %v722_v10 }
 0x4e8   : > { %908 = vrsqrt.f32 %v724_v11 }
 0x4f5   : > { %v909_v13 = vpop.eup %908 }
 0x4f6   : > { %v726_v14 = vmul.f32 %v909_v13, %v723_v12 }
 0x4f8   : > { %v727_v15 = vmax.f32 %v726_v14, 0.0 }
 0x4fa   : > { %728 = vst.msk [vmem:[%s222_s25] sm:$0xf] %vm261_vm3, %v727_v15 }
 0x4fb PF: > { %s15_s18 = sadd.s32 1, %s916_s18  }
 0x4fc   : > { %p12_p4 = scmp.ge.s32.totalorder %s15_s18, 4  }
 0x4fe   :  { %14 = sbr.rel (!%p12_p4) target bundleno = 1 (0x1), region = 74 }

// kernel: dncn_forward.26
= control target key start
LH: loop header
LB: loop body
LE: loop exit
PB: predicated region body
PF: predicated region fallthrough
CT: control target
= control target key end

     0   :  { %s375_s14 = smov 0   ;;  %s399_s0 = inlined_call_operand.vmem [shape: f32[2,4,256], index: 0, kind: input, shape index: {}]   ;;  %s400_s1 = inlined_call_operand.vmem [shape: bf16[1,4], index: 1, kind: input, shape index: {}]   ;;  %s401_s2 = inlined_call_operand.<no memory space> [shape: f32[1,1], index: 2, kind: input, shape index: {}]   ;;  %s402_s3 = inlined_call_operand.vmem [shape: f32[2,1,256], index: 3, kind: output, shape index: {}]  }
   0x1   :  { %v8_v0 = vstv %s401_s2 }
   0x2   :  { %9 = vst [vmem:[#allocation2] sm:$0x1] %v8_v0 }
   0x3 LB: > { %s317_s15 = sadd.s32 4294967295, %s348_s14   ;;  %p321_p0 = scmp.ge.s32.totalorder %s348_s14, 1  ;;  %s348_s14 = sphi %s375_s14, %s15_s14  }
   0x4   : > { %p139_p1 = scmp.lt.s32.totalorder %s348_s14, 3 }
   0x6   : > { %p140_p2 = pnand %p321_p0, %p139_p1 }
   0x7   : > { %p162_p3 = scmp.lt.s32.totalorder (!%p140_p2), %s317_s15, 1 }
   0x8   : > { %143 = sbr.rel (%p140_p2) target bundleno = 229 (0xe5), region = 32 }
   0xd   : > { %v350_v1 = vmov 0   ;;  %v179_v2 = vld [vmem:[#allocation2] sm:$0x1]  ;;  %s404_s15 = smov (!%p162_p3, %s317_s15), 1  ;;  %vm193_vm0 = vcmask 1041408   ;;  %vm189_vm1 = vcmask 31744   ;;  %v185_v9 = vlaneseq }
   0xe   : > { %232 = vmatprep.mubr.bf16.mxu0 %v350_v1  ;;  %340 = vset.pattern.permute.xlu0 %v350_v1  ;;  %s329_s2 = sshll.u32 %s404_s15, 3  ;;  %v172_v8 = vld [vmem:[%s400_s1] sm:$0x1]  ;;  %v351_v12 = vmov 1966171168   ;;  %s324_s21 = sshll.u32 %s404_s15, 1 }
   0xf   : > { %182 = vperm.xlu0 %340, %v179_v2   ;;  %s166_s18 = scalar_lea.vmem %s399_s0, %s329_s2  ;;  %v186_v10 = vshrl.u32 %v185_v9, 7  ;;  %v245_v13 = vunpack.c.l.s4 %v351_v12  ;;  %s170_s24 = scalar_lea.vmem %s402_s3, %s324_s21  ;;  %vm261_vm2 = vcmp.lt.s32.totalorder %v185_v9, 256 }
  0x10   : > { %v173_v3 = vld [vmem:[%s166_s18] sm:$0xff] }
  0x11   : > { %v175_v4 = vcombine.high %v173_v3, %v173_v3  ;;  %v177_v5 = vpack.c.bf16 %v173_v3, %v173_v3  ;;  %v187_v11 = vsub.s32 0, %v186_v10  ;;  %v246_v16 = vunpack.c.0.s8 %v245_v13 }
  0x13   : > { %v178_v6 = vpack.c.bf16 %v175_v4, %v175_v4  ;;  %v195_v7 = vsel %vm193_vm0, %v177_v5, 0  ;;  %v249_v21 = vsub.s32 %v246_v16, %v186_v10 }
  0x15   : > { %325 = vmatprep.subr.msk.bf16.mxu0 %vm193_vm0, %v178_v6 }
  0x16   : > { %215 = vmatpush1.bf16.msra.mxu0 %v195_v7 }
  0x19   : > { %326 = vmatmul.mubr.msk.bf16.vlgmr.msra.gmra.mxu0 %vm189_vm1, %v172_v8 }
  0x8a   : > { %v183_v14 = vpop.permute.xlu0 %182 }
  0x8b   : > { %v188_v15 = vrot.slane %v183_v14, %v187_v11 }
  0xd9   : > { %v234_v17 = vpop.f32.mrf.mxu0 }
  0xda   : > { %v235_v19 = vadd.f32 %v234_v17, %v188_v15 }
  0xdb   : > { %v236_v18 = vpop.f32.mrf.mxu0 }
  0xdc   : > { %v237_v20 = vadd.f32 %v236_v18, %v188_v15 }
  0xdd   : > { %v238_v22 = vpop.f32.mrf.mxu0 }
  0xde   : > { %v243_v23 = vcombine.low %v235_v19, %v237_v20 }
  0xdf   : > { %v239_v24 = vpop.f32.mrf.mxu0 }
  0xe0   : > { %v250_v25 = vrot.slane %v243_v23, %v249_v21 }
  0xe2   : > { %v257_v26 = vrot.slane %v250_v25, %v249_v21 }
  0xe4   : > { %263 = vst.msk [vmem:[%s170_s24] sm:$0x3] %vm261_vm2, %v257_v26 }
  0xe5 PF: > { %s15_s14 = sadd.s32 1, %s348_s14  }
  0xe6   : > { %p12_p4 = scmp.ge.s32.totalorder %s15_s14, 4  }
  0xe8   :  { %14 = sbr.rel (!%p12_p4) target bundleno = 3 (0x3), region = 62 }

// kernel: dncn_forward.25
= control target key start
LH: loop header
LB: loop body
LE: loop exit
PB: predicated region body
PF: predicated region fallthrough
CT: control target
= control target key end

     0   :  { %s1147_s18 = smov 0   ;;  %s1358_s0 = inlined_call_operand.vmem [shape: f32[2,8,256], index: 0, kind: input, shape index: {}]   ;;  %s1359_s1 = inlined_call_operand.vmem [shape: bf16[3,4,24], index: 1, kind: input, shape index: {}]   ;;  %s1360_s2 = inlined_call_operand.vmem [shape: f32[4,1], index: 2, kind: input, shape index: {}]   ;;  %s1361_s3 = inlined_call_operand.vmem [shape: bf16[3,4,12], index: 3, kind: input, shape index: {}]   ;;  %s1362_s4 = inlined_call_operand.vmem [shape: f32[4,1], index: 4, kind: input, shape index: {}]   ;;  %s1363_s5 = inlined_call_operand.vmem [shape: f32[2,4,256], index: 5, kind: output, shape index: {}]  }
   0x1 LB: > { %s1014_s19 = sadd.s32 4294967295, %s1108_s18   ;;  %p1018_p0 = scmp.ge.s32.totalorder %s1108_s18, 1  ;;  %s1108_s18 = sphi %s1147_s18, %s15_s18  }
   0x2   : > { %p187_p1 = scmp.lt.s32.totalorder %s1108_s18, 3 }
   0x4   : > { %p188_p2 = pnand %p1018_p0, %p187_p1 }
   0x5   : > { %p215_p3 = scmp.lt.s32.totalorder (!%p188_p2), %s1014_s19, 1  ;;  %s1111_s24 = smov (!%p188_p2), 96  }
   0x6   : > { %191 = sbr.rel (%p188_p2) target bundleno = 1306 (0x51a), region = 40  ;;  %s1112_s25 = smov (!%p188_p2), 112  }
   0x7   : > { %s1113_s26 = smov (!%p188_p2), 16   ;;  %s1114_s27 = smov (!%p188_p2), 17  }
   0x8   : > { %s1115_s28 = smov (!%p188_p2), 15  }
   0xb   : > { %v1110_v0 = vmov 0   ;;  %s1365_s19 = smov (!%p215_p3, %s1014_s19), 1  ;;  %vm314_vm0 = vcmask 785408   ;;  %vm317_vm1 = vcmask 1043456   ;;  %vm297_vm2 = vcmask 916480  }
   0xc   : > { %266 = vst [vmem:[#allocation2 + $0xc] sm:$0xf] %v1110_v0  ;;  %265 = vst [vmem:[#allocation2] sm:$0xf] %v1110_v0  ;;  %391 = vmatprep.mubr.bf16.mxu0 %v1110_v0  ;;  %498 = vmatprep.mubr.bf16.mxu1 %v1110_v0  ;;  %s1063_s20 = sshll.u32 %s1365_s19, 4  ;;  %vm342_vm3 = vcmask 138240  }
   0xd   : > { %1082 = vset.pattern.permute.xlu1 %v1110_v0  ;;  %1083 = vset.pattern.permute.xlu0 %v1110_v0  ;;  %s219_s23 = scalar_lea.vmem %s1358_s0, %s1063_s20  ;;  %v585_v38 = vld [vmem:[%s1360_s2] sm:$0xf]  ;;  %vm450_vm4 = vcmask 121856   ;;  %vm524_vm5 = vcmask 130048   ;;  %vm349_vm6 = vcmask 195584   ;;  %vm668_vm11 = vcmask 1041408  }
   0xe   : > { %v267_v1 = vld [vmem:[%s219_s23] sm:$0xff]  ;;  %v268_v2 = vld [vmem:[%s219_s23 + $0x8] sm:$0xff]  ;;  %vm699_vm12 = vcmask 1045504   ;;  %vm695_vm13 = vcmask 97280   ;;  %s1064_s22 = sshll.u32 %s1365_s19, 3 }
   0xf   : > { %v1065_v3 = vpack.c.bf16 %v268_v2, %v267_v1  ;;  %v1100_v5 = vpack.c.bf16 %v267_v1, %v267_v1  ;;  %v1101_v6 = vpack.c.bf16 %v268_v2, %v268_v2  ;;  %v278_v63 = vld [vmem:[%s1359_s1] sm:$0x3] }
  0x11   : > { %277 = vst [vmem:[#allocation2 + $0x4] sm:$0xff] %v1065_v3  ;;  %308 = vrot.lane.b32.xlu0 %v1100_v5, %s1111_s24 }
  0x13   : > { %v1084_v4 = vld [vmem:[#allocation2 + $0xc] ss:$0 sps:$4 sm:$0xff]  }
  0x14   : > { %312 = vrot.lane.b32.xlu1 %v1084_v4, %s1111_s24 }
  0x15   : > { %310 = vrot.lane.b32.xlu0 %v1101_v6, %s1111_s24 }
  0x18   : > { %v279_v7 = vld [vmem:[#allocation2] sm:$0xff]  ;;  %v1086_v8 = vld [vmem:[#allocation2 + $0x8] ss:$0 sps:$4 sm:$0xff]  }
  0x19   : > { %v1029_v9 = vcombine.high %v279_v7, %v279_v7  ;;  %295 = vrot.lane.b32.xlu0 %v1086_v8, %s1112_s25  ;;  %v1028_v10 = vcombine.low %v279_v7, %v279_v7 }
  0x1b   : > { %293 = vrot.lane.b32.xlu1 %v1029_v9, %s1112_s25 }
  0x1d   : > { %408 = vrot.lane.b32.xlu0 %v1100_v5, %s1112_s25 }
  0x1f   : > { %291 = vrot.lane.b32.xlu1 %v1028_v10, %s1112_s25 }
  0x21   : > { %421 = vrot.lane.b32.xlu0 %v1100_v5, %s1112_s25 }
  0x23   : > { %410 = vrot.lane.b32.xlu1 %v1101_v6, %s1112_s25 }
  0x25   : > { %425 = vrot.lane.b32.xlu0 %v1084_v4, %s1112_s25 }
  0x27   : > { %423 = vrot.lane.b32.xlu1 %v1101_v6, %s1112_s25 }
  0x83   : > { %v309_v11 = vpop.permute.xlu0 %308 }
  0x84   : > { %518 = vrot.lane.b32.xlu0 %v309_v11, %s1113_s26  ;;  %336 = vrot.lane.b32.xlu1 %v309_v11, %s1114_s27 }
  0x86   : > { %v313_v12 = vpop.permute.xlu1 %312 }
  0x87   : > { %v311_v13 = vpop.permute.xlu0 %310 }
  0x88   : > { %444 = vrot.lane.b32.xlu1 %v309_v11, %s1115_s28  ;;  %v315_v14 = vsel %vm314_vm0, %v309_v11, %v311_v13  ;;  %v316_v17 = vsel %vm314_vm0, %v311_v13, %v313_v12  ;;  %v1036_v11 = vld [vmem:[%s1359_s1 + $0x2] sm:$0x3]  ;;  %v226_v12 = vlaneseq }
  0x89   : > { %338 = vrot.lane.b32.xlu0 %v315_v14, %s1114_s27 }
  0x8a   : > { %v227_v13 = vand.u32 127, %v226_v12 }
  0x8b   : > { %v296_v16 = vpop.permute.xlu0 %295 }
  0x8c   : > { %340 = vrot.lane.b32.xlu1 %v316_v17, %s1114_s27  ;;  %v326_v18 = vsel %vm317_vm1, %v1086_v8, %v296_v16 }
  0x8d   : > { %v294_v15 = vpop.permute.xlu1 %293  ;;  %446 = vrot.lane.b32.xlu0 %v315_v14, %s1115_s28 }
  0x8e   : > { %v299_v24 = vsel %vm297_vm2, %v294_v15, %v296_v16 }
  0x8f   : > { %v409_v20 = vpop.permute.xlu0 %408  ;;  %v323_v26 = vsel %vm317_vm1, %v1029_v9, %v299_v24 }
  0x90   : > { %334 = vrot.lane.b32.xlu1 %v326_v18, %s1114_s27  ;;  %v414_v37 = vsel %vm317_vm1, %v1028_v10, %v409_v20 }
  0x91   : > { %v292_v19 = vpop.permute.xlu1 %291  ;;  %522 = vrot.lane.b32.xlu0 %v316_v17, %s1113_s26 }
  0x92   : > { %v298_v28 = vsel %vm297_vm2, %v292_v19, %v294_v15  ;;  %v233_v15 = vand.u32 15, %v227_v13  ;;  %v1116_v19 = vmov 0.0  }
  0x93   : > { %v422_v23 = vpop.permute.xlu0 %421  ;;  %v320_v32 = vsel %vm317_vm1, %v1028_v10, %v298_v28 }
  0x94   : > { %448 = vrot.lane.b32.xlu1 %v316_v17, %s1115_s28  ;;  %v430_v36 = vsel %vm317_vm1, %v1028_v10, %v422_v23  ;;  %v1039_v10 = vld [vmem:[%s1359_s1 + $0x4] sm:$0x3]  ;;  %vm253_vm7 = vcmp.gt.s32.totalorder %v233_v15, 0  ;;  %vm259_vm8 = vcmp.lt.s32.totalorder %v233_v15, 15 }
  0x95   : > { %v411_v21 = vpop.permute.xlu1 %410 }
  0x96   : > { %v418_v22 = vsel %vm317_vm1, %v1086_v8, %v411_v21  ;;  %v412_v31 = vsel %vm297_vm2, %v409_v20, %v411_v21  ;;  %v1248_v20 = vsel %vm253_vm7, 1.0, %v1116_v19 }
  0x97   : > { %516 = vrot.lane.b32.xlu0 %v418_v22, %s1113_s26  ;;  %v426_v30 = vpop.permute.xlu0 %425  ;;  %v416_v34 = vsel %vm317_vm1, %v1029_v9, %v412_v31  ;;  %v1250_v22 = vsel %vm259_vm8, 1.0, %v1116_v19 }
  0x98   : > { %520 = vrot.lane.b32.xlu1 %v315_v14, %s1113_s26  ;;  %v228_v14 = vadd.s32 128, %v227_v13 }
  0x99   : > { %v424_v25 = vpop.permute.xlu1 %423 }
  0x9a   : > { %v427_v27 = vsel %vm297_vm2, %v422_v23, %v424_v25  ;;  %v428_v33 = vsel %vm297_vm2, %v424_v25, %v426_v30  ;;  %v240_v16 = vand.u32 15, %v228_v14 }
  0x9b   : > { %332 = vrot.lane.b32.xlu0 %v323_v26, %s1114_s27  ;;  %v432_v29 = vsel %vm317_vm1, %v1029_v9, %v427_v27  ;;  %v434_v35 = vsel %vm317_vm1, %v1086_v8, %v428_v33 }
  0x9c   : > { %440 = vrot.lane.b32.xlu1 %v432_v29, %s1115_s28  ;;  %vm254_vm9 = vcmp.gt.s32.totalorder %v240_v16, 0  ;;  %vm260_vm10 = vcmp.lt.s32.totalorder %v240_v16, 15 }
  0x9d   : > { %v1252_v23 = vsel %vm254_vm9, 1.0, %v1116_v19  ;;  %v1255_v27 = vsel %vm260_vm10, 1.0, %v1116_v19 }
  0x9f   : > { %330 = vrot.lane.b32.xlu0 %v320_v32, %s1114_s27 }
  0xa0   : > { %514 = vrot.lane.b32.xlu1 %v416_v34, %s1113_s26 }
  0xa3   : > { %442 = vrot.lane.b32.xlu0 %v434_v35, %s1115_s28 }
  0xa4   : > { %438 = vrot.lane.b32.xlu1 %v430_v36, %s1115_s28 }
  0xa7   : > { %512 = vrot.lane.b32.xlu0 %v414_v37, %s1113_s26 }
  0xa8   : > { %588 = vperm.xlu1 %1082, %v585_v38  }
  0xf6   : > { %v519_v39 = vpop.permute.xlu0 %518  ;;  %v337_v40 = vpop.permute.xlu1 %336 }
  0xfa   : > { %v445_v41 = vpop.permute.xlu1 %444 }
  0xfb   : > { %v339_v42 = vpop.permute.xlu0 %338 }
  0xfc   : > { %v345_v43 = vsel %vm342_vm3, %v337_v40, %v339_v42 }
  0xfd   : > { %v354_v47 = vsel %vm317_vm1, %v345_v43, 0 }
  0xfe   : > { %v341_v44 = vpop.permute.xlu1 %340 }
  0xff   : > { %v447_v45 = vpop.permute.xlu0 %446  ;;  %v346_v46 = vsel %vm342_vm3, %v339_v42, %v341_v44 }
 0x100   : > { %1034 = vmatprep.subr.msk.bf16.mxu0 %vm317_vm1, %v346_v46  ;;  %v453_v50 = vsel %vm450_vm4, %v445_v41, %v447_v45 }
 0x101   : > { %372 = vmatpush1.bf16.msra.mxu0 %v354_v47  ;;  %v461_v54 = vsel %vm317_vm1, %v453_v50, 0 }
 0x102   : > { %v335_v48 = vpop.permute.xlu1 %334 }
 0x103   : > { %v523_v49 = vpop.permute.xlu0 %522 }
 0x106   : > { %v449_v51 = vpop.permute.xlu1 %448 }
 0x107   : > { %v454_v53 = vsel %vm450_vm4, %v447_v45, %v449_v51 }
 0x108   : > { %1040 = vmatprep.subr.msk.bf16.mxu1 %vm317_vm1, %v454_v53  ;;  %v1088_v53 = vld [vmem:[#allocation2 + $0xc] ss:$0 sps:$4 sm:$0x33]  }
 0x109   : > { %v517_v52 = vpop.permute.xlu0 %516  ;;  %479 = vmatpush1.bf16.msra.mxu1 %v461_v54 }
 0x10a   : > { %v521_v55 = vpop.permute.xlu1 %520 }
 0x10b   : > { %v527_v61 = vsel %vm524_vm5, %v519_v39, %v521_v55  ;;  %v528_v62 = vsel %vm524_vm5, %v521_v55, %v523_v49 }
 0x10c   : > { %v535_v3 = vsel %vm317_vm1, %v527_v61, 0 }
 0x10d   : > { %v333_v56 = vpop.permute.xlu0 %332 }
 0x10e   : > { %v344_v57 = vsel %vm342_vm3, %v333_v56, %v335_v48  ;;  %v441_v58 = vpop.permute.xlu1 %440 }
 0x10f   : > { %373 = vmatprep.subr.bf16.mxu0 %v344_v57 }
 0x111   : > { %v331_v59 = vpop.permute.xlu0 %330 }
 0x112   : > { %v343_v60 = vsel %vm342_vm3, %v331_v59, %v333_v56  ;;  %v515_v1 = vpop.permute.xlu1 %514 }
 0x113   : > { %374 = vmatpush1.bf16.msra.mxu0 %v343_v60  ;;  %v526_v5 = vsel %vm524_vm5, %v515_v1, %v517_v52 }
 0x114   : > { %1042 = vmatprep.subr.msk.bf16.mxu0 %vm317_vm1, %v528_v62 }
 0x115   : > { %v443_v2 = vpop.permute.xlu0 %442 }
 0x116   : > { %1035 = vmatmul.mubr.msk.bf16.vlgmr.msra.gmra.mxu0 %vm349_vm6, %v278_v63  ;;  %v452_v4 = vsel %vm450_vm4, %v441_v58, %v443_v2  ;;  %v439_v6 = vpop.permute.xlu1 %438 }
 0x117   : > { %480 = vmatprep.subr.bf16.mxu1 %v452_v4  ;;  %553 = vmatpush1.bf16.msra.mxu0 %v535_v3  ;;  %v451_v8 = vsel %vm450_vm4, %v439_v6, %v441_v58 }
 0x118   : > { %554 = vmatprep.subr.bf16.mxu0 %v526_v5  ;;  %572 = vmatprep.mubr.bf16.mxu0 %v1110_v0 }
 0x119   : > { %v513_v7 = vpop.permute.xlu0 %512  ;;  %481 = vmatpush1.bf16.msra.mxu1 %v451_v8 }
 0x11a   : > { %v525_v9 = vsel %vm524_vm5, %v513_v7, %v515_v1 }
 0x11b   : > { %555 = vmatpush1.bf16.msra.mxu0 %v525_v9 }
 0x11c   : > { %1041 = vmatmul.mubr.msk.bf16.vlgmr.msra.gmra.mxu1 %vm349_vm6, %v1039_v10 }
 0x11d   : > { %738 = vmatprep.mubr.bf16.mxu1 %v1110_v0 }
 0x11e   : > { %1043 = vmatmul.mubr.msk.bf16.vlgmr.msra.gmra.mxu0 %vm349_vm6, %v1036_v11 }
 0x11f   : > { %845 = vmatprep.mubr.bf16.mxu0 %v1110_v0 }
 0x123   : > { %v589_v35 = vpop.permute.xlu1 %588 }
 0x1d6   : > { %v393_v17 = vpop.f32.mrf.mxu0 }
 0x1d7   : > { %v507_v25 = vmul.f32 %v1248_v20, %v393_v17 }
 0x1d8   : > { %v395_v18 = vpop.f32.mrf.mxu0 }
 0x1d9   : > { %v508_v30 = vmul.f32 %v1252_v23, %v395_v18 }
 0x1da   : > { %v397_v21 = vpop.f32.mrf.mxu0 }
 0x1dc   : > { %v398_v24 = vpop.f32.mrf.mxu0  ;;  %v500_v26 = vpop.f32.mrf.mxu1 }
 0x1dd   : > { %v581_v28 = vmul.f32 %v1250_v22, %v500_v26 }
 0x1de   : > { %v574_v29 = vpop.f32.mrf.mxu0  ;;  %v502_v32 = vpop.f32.mrf.mxu1 }
 0x1df   : > { %v575_v31 = vadd.f32 %v574_v29, %v507_v25  ;;  %v582_v33 = vmul.f32 %v1255_v27, %v502_v32 }
 0x1e0   : > { %v576_v34 = vpop.f32.mrf.mxu0  ;;  %v504_v38 = vpop.f32.mrf.mxu1 }
 0x1e1   : > { %v583_v36 = vadd.f32 %v581_v28, %v575_v31  ;;  %v577_v37 = vadd.f32 %v576_v34, %v508_v30  ;;  %v775_v28 = vrot.slane %v1088_v53, 6 }
 0x1e2   : > { %v578_v39 = vpop.f32.mrf.mxu0  ;;  %v505_v42 = vpop.f32.mrf.mxu1 }
 0x1e3   : > { %v584_v40 = vadd.f32 %v582_v33, %v577_v37  ;;  %v591_v41 = vadd.f32 %v589_v35, %v583_v36 }
 0x1e4   : > { %v579_v43 = vpop.f32.mrf.mxu0 }
 0x1e5   : > { %v592_v44 = vadd.f32 %v589_v35, %v584_v40  ;;  %v600_v45 = vmul.f32 %v591_v41, %v591_v41  ;;  %v593_v46 = vsel %vm317_vm1, %v591_v41, 0.0 }
 0x1e7   : > { %v594_v47 = vsel %vm317_vm1, %v592_v44, 0.0  ;;  %v601_v48 = vmul.f32 %v592_v44, %v592_v44  ;;  %v602_v50 = vsel %vm317_vm1, %v600_v45, 0.0 }
 0x1e8   : > { %v595_v49 = vadd.f32 %v594_v47, %v593_v46 }
 0x1e9   : > { %v603_v51 = vsel %vm317_vm1, %v601_v48, 0.0 }
 0x1ea   : > { %596 = vadd.xlane.f32.xlu0 %v595_v49  ;;  %v604_v52 = vadd.f32 %v603_v51, %v602_v50 }
 0x1ec   : > { %605 = vadd.xlane.f32.xlu1 %v604_v52 }
 0x1fd   : > { %664 = vrot.lane.b32.xlu1 %v1088_v53, %s1111_s24 }
 0x273   : > { %v597_v54 = vpop.xlane.xlu0 %596 }
 0x274   : > { %v599_v55 = vmul.f32 0.00390625, %v597_v54 }
 0x275   : > { %v606_v56 = vpop.xlane.xlu1 %605 }
 0x276   : > { %v607_v57 = vmul.f32 0.00390625, %v606_v56  ;;  %v608_v58 = vmul.f32 %v599_v55, %v599_v55  ;;  %v611_v62 = vsub.f32 %v591_v41, %v599_v55  ;;  %v612_v63 = vsub.f32 %v592_v44, %v599_v55 }
 0x278   : > { %v609_v59 = vsub.f32 %v607_v57, %v608_v58 }
 0x279   : > { %v665_v29 = vpop.permute.xlu1 %664 }
 0x27a   : > { %v610_v60 = vmax.f32 %v609_v59, 0.0 }
 0x27c   : > { %v613_v61 = vadd.f32 1e-05, %v610_v60 }
 0x27e   : > { %1096 = vrsqrt.f32 %v613_v61 }
 0x28b   : > { %v1097_v1 = vpop.eup %1096 }
 0x28c   : > { %v615_v2 = vmul.f32 %v1097_v1, %v611_v62  ;;  %v616_v3 = vmul.f32 %v1097_v1, %v612_v63 }
 0x28e   : > { %v617_v4 = vmax.f32 %v615_v2, 0.0  ;;  %v618_v5 = vmax.f32 %v616_v3, 0.0  ;;  %v921_v2 = vld [vmem:[%s1362_s4] sm:$0xf] }
 0x290   : > { %v1066_v6 = vpack.c.bf16 %v618_v5, %v617_v4 }
 0x292   : > { %627 = vst [vmem:[#allocation2 + $0x4] sm:$0x33] %v1066_v6 }
 0x299   : > { %v631_v7 = vld [vmem:[#allocation2 + $0x4] sm:$0x33] }
 0x29a   : > { %v629_v8 = vld [vmem:[#allocation2] sm:$0x33]  ;;  %v1049_v9 = vcombine.high %v631_v7, %v631_v7  ;;  %v1048_v10 = vcombine.low %v631_v7, %v631_v7  ;;  %v1094_v17 = vld [vmem:[#allocation2 + $0x8] ss:$0 sps:$4 sm:$0x33]  }
 0x29b   : > { %v1265_v11 = vcombine.high %v629_v8, %v629_v8  ;;  %v1045_v12 = vcombine.low %v629_v8, %v629_v8  ;;  %v749_v13 = vld [vmem:[#allocation2 + $0x4] sm:$0x33]  ;;  %v643_v19 = vrot.slane %v1094_v17, 6 }
 0x29c   : > { %662 = vrot.lane.b32.xlu0 %v1049_v9, %s1111_s24  ;;  %660 = vrot.lane.b32.xlu1 %v1048_v10, %s1111_s24  ;;  %v1055_v16 = vcombine.high %v749_v13, %v749_v13  ;;  %v1054_v21 = vcombine.low %v749_v13, %v749_v13  ;;  %v774_v24 = vrot.slane %v1049_v9, 6  ;;  %v773_v26 = vrot.slane %v1048_v10, 6  ;;  %v628_v13 = vld [vmem:[%s1361_s3] sm:$0x3] }
 0x29d   : > { %v642_v14 = vrot.slane %v1265_v11, 6  ;;  %v641_v15 = vrot.slane %v1045_v12, 6 }
 0x29e   : > { %v756_v18 = vrot.slane %v1055_v16, 6  ;;  %v755_v25 = vrot.slane %v1054_v21, 6 }
 0x2a0   : > { %646 = vrot.lane.b32.xlu1 %v642_v14, %s1112_s25  ;;  %644 = vrot.lane.b32.xlu0 %v641_v15, %s1112_s25 }
 0x2a4   : > { %759 = vrot.lane.b32.xlu1 %v756_v18, %s1112_s25  ;;  %648 = vrot.lane.b32.xlu0 %v643_v19, %s1112_s25 }
 0x2a8   : > { %778 = vrot.lane.b32.xlu1 %v774_v24, %s1112_s25  ;;  %757 = vrot.lane.b32.xlu0 %v755_v25, %s1112_s25 }
 0x2ac   : > { %776 = vrot.lane.b32.xlu0 %v773_v26, %s1112_s25  ;;  %v1053_v26 = vld [vmem:[%s1361_s3 + $0x2] sm:$0x3] }
 0x2b0   : > { %780 = vrot.lane.b32.xlu0 %v775_v28, %s1112_s25  ;;  %s224_s25 = scalar_lea.vmem %s1363_s5, %s1064_s22 }
 0x30e   : > { %v663_v30 = vpop.permute.xlu0 %662  ;;  %v661_v31 = vpop.permute.xlu1 %660 }
 0x30f   : > { %v667_v35 = vsel %vm314_vm0, %v663_v30, %v665_v29  ;;  %v666_v55 = vsel %vm314_vm0, %v661_v31, %v663_v30 }
 0x312   : > { %v647_v32 = vpop.permute.xlu1 %646  ;;  %v645_v33 = vpop.permute.xlu0 %644 }
 0x313   : > { %v650_v39 = vsel %vm297_vm2, %v645_v33, %v647_v32 }
 0x314   : > { %v671_v43 = vsel %vm668_vm11, %v1045_v12, %v650_v39 }
 0x315   : > { %v679_v49 = vsel %vm317_vm1, %v671_v43, %v661_v31 }
 0x316   : > { %v649_v34 = vpop.permute.xlu0 %648  ;;  %v760_v37 = vpop.permute.xlu1 %759 }
 0x317   : > { %v677_v36 = vsel %vm668_vm11, %v1094_v17, %v649_v34  ;;  %v651_v44 = vsel %vm297_vm2, %v647_v32, %v649_v34  ;;  %v767_v58 = vsel %vm668_vm11, %v1094_v17, %v760_v37 }
 0x318   : > { %v683_v38 = vsel %vm317_vm1, %v677_v36, %v667_v35  ;;  %v674_v51 = vsel %vm668_vm11, %v1265_v11, %v651_v44  ;;  %v770_v61 = vsel %vm317_vm1, %v767_v58, %v667_v35 }
 0x319   : > { %691 = vrot.lane.b32.xlu1 %v683_v38, %s1114_s27  ;;  %v681_v56 = vsel %vm317_vm1, %v674_v51, %v666_v55 }
 0x31a   : > { %v758_v40 = vpop.permute.xlu0 %757  ;;  %v779_v45 = vpop.permute.xlu1 %778 }
 0x31b   : > { %v763_v41 = vsel %vm668_vm11, %v1045_v12, %v758_v40  ;;  %v761_v60 = vsel %vm297_vm2, %v758_v40, %v760_v37 }
 0x31c   : > { %v768_v42 = vsel %vm317_vm1, %v763_v41, %v661_v31  ;;  %v765_v63 = vsel %vm668_vm11, %v1265_v11, %v761_v60 }
 0x31d   : > { %859 = vrot.lane.b32.xlu1 %v768_v42, %s1113_s26  ;;  %v769_v1 = vsel %vm317_vm1, %v765_v63, %v666_v55 }
 0x31e   : > { %v777_v46 = vpop.permute.xlu0 %776 }
 0x31f   : > { %v782_v47 = vsel %vm297_vm2, %v777_v46, %v779_v45  ;;  %v785_v48 = vsel %vm668_vm11, %v1045_v12, %v777_v46 }
 0x320   : > { %v790_v50 = vsel %vm317_vm1, %v785_v48, %v661_v31  ;;  %v787_v52 = vsel %vm668_vm11, %v1265_v11, %v782_v47 }
 0x321   : > { %687 = vrot.lane.b32.xlu1 %v679_v49, %s1114_s27  ;;  %796 = vrot.lane.b32.xlu0 %v790_v50, %s1115_s28  ;;  %v791_v57 = vsel %vm317_vm1, %v787_v52, %v666_v55 }
 0x322   : > { %v781_v53 = vpop.permute.xlu0 %780 }
 0x323   : > { %v783_v54 = vsel %vm297_vm2, %v779_v45, %v781_v53 }
 0x324   : > { %v789_v59 = vsel %vm668_vm11, %v1094_v17, %v783_v54  ;;  %v1056_v17 = vld [vmem:[%s1361_s3 + $0x4] sm:$0x3] }
 0x325   : > { %689 = vrot.lane.b32.xlu0 %v681_v56, %s1114_s27  ;;  %798 = vrot.lane.b32.xlu1 %v791_v57, %s1115_s28  ;;  %v792_v62 = vsel %vm317_vm1, %v789_v59, %v667_v35 }
 0x329   : > { %863 = vrot.lane.b32.xlu1 %v770_v61, %s1113_s26  ;;  %800 = vrot.lane.b32.xlu0 %v792_v62, %s1115_s28 }
 0x32d   : > { %861 = vrot.lane.b32.xlu0 %v769_v1, %s1113_s26 }
 0x331   : > { %924 = vperm.xlu0 %1083, %v921_v2  }
 0x38b   : > { %v692_v3 = vpop.permute.xlu1 %691 }
 0x38f   : > { %v860_v4 = vpop.permute.xlu1 %859 }
 0x393   : > { %v688_v5 = vpop.permute.xlu1 %687  ;;  %v797_v6 = vpop.permute.xlu0 %796 }
 0x397   : > { %v799_v7 = vpop.permute.xlu1 %798  ;;  %v690_v8 = vpop.permute.xlu0 %689 }
 0x398   : > { %v693_v9 = vsel %vm342_vm3, %v688_v5, %v690_v8  ;;  %v694_v10 = vsel %vm342_vm3, %v690_v8, %v692_v3  ;;  %v802_v12 = vsel %vm450_vm4, %v797_v6, %v799_v7 }
 0x399   : > { %v701_v11 = vsel %vm699_vm12, %v693_v9, 0  ;;  %1051 = vmatprep.subr.msk.bf16.mxu1 %vm699_vm12, %v694_v10  ;;  %v808_v16 = vsel %vm699_vm12, %v802_v12, 0 }
 0x39a   : > { %721 = vmatpush1.bf16.msra.mxu1 %v701_v11 }
 0x39b   : > { %v801_v14 = vpop.permute.xlu0 %800  ;;  %v864_v18 = vpop.permute.xlu1 %863 }
 0x39c   : > { %v803_v15 = vsel %vm450_vm4, %v799_v7, %v801_v14 }
 0x39d   : > { %1052 = vmatmul.mubr.msk.bf16.vlgmr.msra.gmra.mxu1 %vm695_vm13, %v628_v13  ;;  %1057 = vmatprep.subr.msk.bf16.mxu0 %vm699_vm12, %v803_v15 }
 0x39e   : > { %828 = vmatpush1.bf16.msra.mxu0 %v808_v16  ;;  %908 = vmatprep.mubr.bf16.mxu1 %v1110_v0 }
 0x39f   : > { %v862_v19 = vpop.permute.xlu0 %861 }
 0x3a0   : > { %v865_v21 = vsel %vm524_vm5, %v860_v4, %v862_v19  ;;  %v866_v24 = vsel %vm524_vm5, %v862_v19, %v864_v18 }
 0x3a1   : > { %v871_v25 = vsel %vm699_vm12, %v865_v21, 0  ;;  %1059 = vmatprep.subr.msk.bf16.mxu1 %vm699_vm12, %v866_v24  ;;  %1058 = vmatmul.mubr.msk.bf16.vlgmr.msra.gmra.mxu0 %vm695_vm13, %v1056_v17 }
 0x3a2   : > { %891 = vmatpush1.bf16.msra.mxu1 %v871_v25 }
 0x3a5   : > { %1060 = vmatmul.mubr.msk.bf16.vlgmr.msra.gmra.mxu1 %vm695_vm13, %v1053_v26 }
 0x3ac   : > { %v925_v39 = vpop.permute.xlu0 %924 }
 0x45d   : > { %v740_v0 = vpop.f32.mrf.mxu1 }
 0x45e   : > { %v854_v33 = vmul.f32 %v1248_v20, %v740_v0 }
 0x45f   : > { %v742_v28 = vpop.f32.mrf.mxu1 }
 0x460   : > { %v855_v37 = vmul.f32 %v1252_v23, %v742_v28 }
 0x461   : > { %v744_v29 = vpop.f32.mrf.mxu1  ;;  %v847_v30 = vpop.f32.mrf.mxu0 }
 0x462   : > { %v917_v34 = vmul.f32 %v1250_v22, %v847_v30 }
 0x463   : > { %v745_v31 = vpop.f32.mrf.mxu1  ;;  %v849_v32 = vpop.f32.mrf.mxu0 }
 0x464   : > { %v918_v43 = vmul.f32 %v1255_v27, %v849_v32 }
 0x465   : > { %v910_v35 = vpop.f32.mrf.mxu1  ;;  %v851_v36 = vpop.f32.mrf.mxu0 }
 0x466   : > { %v911_v38 = vadd.f32 %v910_v35, %v854_v33 }
 0x467   : > { %v912_v40 = vpop.f32.mrf.mxu1  ;;  %v852_v41 = vpop.f32.mrf.mxu0 }
 0x468   : > { %v919_v42 = vadd.f32 %v917_v34, %v911_v38  ;;  %v913_v44 = vadd.f32 %v912_v40, %v855_v37 }
 0x469   : > { %v914_v45 = vpop.f32.mrf.mxu1 }
 0x46a   : > { %v920_v46 = vadd.f32 %v918_v43, %v913_v44  ;;  %v927_v47 = vadd.f32 %v925_v39, %v919_v42 }
 0x46b   : > { %v915_v48 = vpop.f32.mrf.mxu1 }
 0x46c   : > { %v928_v49 = vadd.f32 %v925_v39, %v920_v46  ;;  %v935_v20 = vmul.f32 %v927_v47, %v927_v47  ;;  %v929_v22 = vsel %vm317_vm1, %v927_v47, 0.0 }
 0x46e   : > { %v930_v50 = vsel %vm317_vm1, %v928_v49, 0.0  ;;  %v936_v51 = vmul.f32 %v928_v49, %v928_v49  ;;  %v937_v52 = vsel %vm317_vm1, %v935_v20, 0.0 }
 0x46f   : > { %v931_v23 = vadd.f32 %v930_v50, %v929_v22 }
 0x470   : > { %v938_v53 = vsel %vm317_vm1, %v936_v51, 0.0 }
 0x471   : > { %932 = vadd.xlane.f32.xlu1 %v931_v23  ;;  %v939_v27 = vadd.f32 %v938_v53, %v937_v52 }
 0x473   : > { %940 = vadd.xlane.f32.xlu0 %v939_v27 }
 0x4fa   : > { %v933_v54 = vpop.xlane.xlu1 %932 }
 0x4fb   : > { %v934_v55 = vmul.f32 0.00390625, %v933_v54 }
 0x4fc   : > { %v941_v56 = vpop.xlane.xlu0 %940 }
 0x4fd   : > { %v942_v57 = vmul.f32 0.00390625, %v941_v56  ;;  %v943_v58 = vmul.f32 %v934_v55, %v934_v55  ;;  %v946_v62 = vsub.f32 %v927_v47, %v934_v55  ;;  %v947_v63 = vsub.f32 %v928_v49, %v934_v55 }
 0x4ff   : > { %v944_v59 = vsub.f32 %v942_v57, %v943_v58 }
 0x501   : > { %v945_v60 = vmax.f32 %v944_v59, 0.0 }
 0x503   : > { %v948_v61 = vadd.f32 1e-05, %v945_v60 }
 0x505   : > { %1098 = vrsqrt.f32 %v948_v61 }
 0x512   : > { %v1099_v1 = vpop.eup %1098 }
 0x513   : > { %v950_v2 = vmul.f32 %v1099_v1, %v946_v62  ;;  %v951_v3 = vmul.f32 %v1099_v1, %v947_v63 }
 0x515   : > { %v952_v4 = vmax.f32 %v950_v2, 0.0  ;;  %v953_v5 = vmax.f32 %v951_v3, 0.0 }
 0x517   : > { %v956_v6 = vcombine.low %v952_v4, %v953_v5 }
 0x519   : > { %958 = vst [vmem:[%s224_s25] sm:$0xff] %v956_v6 }
 0x51a PF: > { %s15_s18 = sadd.s32 1, %s1108_s18  }
 0x51b   : > { %p12_p4 = scmp.ge.s32.totalorder %s15_s18, 4  }
 0x51d   :  { %14 = sbr.rel (!%p12_p4) target bundleno = 1 (0x1), region = 74 }

// kernel: dncn_forward.27
= control target key start
LH: loop header
LB: loop body
LE: loop exit
PB: predicated region body
PF: predicated region fallthrough
CT: control target
= control target key end

     0   :  { %v17_v0 = vlaneseq  ;;  %s95_s0 = inlined_call_operand.vmem [shape: f32[1,256], index: 0, kind: input, shape index: {}]   ;;  %s96_s1 = inlined_call_operand.vmem [shape: f32[4,256], index: 1, kind: input, shape index: {}]   ;;  %s97_s2 = inlined_call_operand.vmem [shape: f32[4,256], index: 2, kind: input, shape index: {}]   ;;  %s98_s3 = inlined_call_operand.vmem [shape: f32[4,256], index: 3, kind: output, shape index: {}]  }
   0x1   :  { %v14_v1 = vld [vmem:[%s95_s0] sm:$0x3] }
   0x2   :  { %v15_v2 = vld [vmem:[%s96_s1] sm:$0xff]  ;;  %v18_v4 = vshrl.u32 %v17_v0, 7  ;;  %v32_v5 = vsub.f32 1.0, %v14_v1 }
   0x3   :  { %v33_v3 = vld [vmem:[%s97_s2] sm:$0xff]  ;;  %v28_v8 = vcombine.high %v15_v2, %v15_v2 }
   0x4   :  { %v19_v6 = vsub.s32 0, %v18_v4  ;;  %v23_v7 = vsub.s32 1, %v18_v4  ;;  %v46_v9 = vcombine.high %v33_v3, %v33_v3 }
   0x6   :  { %v20_v10 = vrot.slane %v14_v1, %v19_v6  ;;  %v24_v11 = vrot.slane %v14_v1, %v23_v7  ;;  %v38_v12 = vrot.slane %v32_v5, %v19_v6  ;;  %v42_v13 = vrot.slane %v32_v5, %v23_v7 }
   0x8   :  { %v30_v14 = vmul.f32 %v20_v10, %v15_v2  ;;  %v31_v15 = vmul.f32 %v28_v8, %v24_v11  ;;  %v48_v16 = vmul.f32 %v38_v12, %v33_v3  ;;  %v49_v17 = vmul.f32 %v46_v9, %v42_v13 }
   0xa   :  { %v50_v18 = vadd.f32 %v48_v16, %v30_v14  ;;  %v51_v19 = vadd.f32 %v49_v17, %v31_v15 }
   0xc   :  { %v54_v20 = vcombine.low %v50_v18, %v51_v19 }
   0xe   :  { %56 = vst [vmem:[%s98_s3] sm:$0xff] %v54_v20 }

</bundles_post_ra>
